<compile_context>
chip_gen: v5e
topology: v5e:2x2
jax: 0.10.0
libtpu: 0.0.40
codegen_flags: <defaults>
</compile_context>

<pallas_src>
import jax
import jax.numpy as jnp
from jax import lax
from jax.experimental import pallas as pl
from jax.experimental.pallas import tpu as pltpu

# ----------------------------- hyper-params (consistent with module) ---------
VOCAB = 50
VOCAB_PAD = 64          # one-hot / embedding table padded to 64 lanes
EMBED_DIM = 32          # opts.embed_size
HIDDEN_SIZE = 32        # opts.hidden_size
BIDIRECTIONAL = True    # opts.bidirectional
FLAG = 2 if BIDIRECTIONAL else 1
KERNEL_SIZES = (3, 5)   # opts.kernel_size
KERNEL_NUM = 8          # opts.kernel_num
LABEL_NUM = 5           # label_vocab.m_size
B, T = 2, 16            # logical batch / sequence length
BP = 8                  # batch padded to one full sublane group

H = HIDDEN_SIZE
E = EMBED_DIM
D = H * FLAG                              # 64   biLSTM feature dim
C_TOT = len(KERNEL_SIZES) * KERNEL_NUM    # 16   all conv channels (= in_fea)
IN_FEA = C_TOT
K_MAX = max(KERNEL_SIZES)                 # 5
PAD = K_MAX // 2                          # 2    time padding of the widest conv
T_PAD = T + 2 * PAD                       # 20

# packed LSTM weight buffer (row offsets, all multiples of 8)
ROW_WIH_F = 0
ROW_WIH_B = E                  # 32
ROW_WHH = 2 * E                # 64
ROW_BIH = 2 * E + 2 * H        # 128
LSTM_ROWS = ROW_BIH + 8        # 136

# packed conv + MLP ("head") buffer (row offsets, all multiples of 8)
HR_WCONV = 0
HR_BCONV = K_MAX * D           # 320
HR_W1 = HR_BCONV + 8           # 328
HR_B1 = HR_W1 + IN_FEA         # 344
HR_W2 = HR_B1 + 8              # 352
HR_B2 = HR_W2 + 8              # 360
HEAD_ROWS = HR_B2 + 8          # 368


# ----------------------------- the single fused kernel ------------------------
def _lstm_cnn_kernel(tok_ref, embed_ref, lstm_ref, head_ref, out_ref,
                     gx_ref, hcat_ref, y_ref):
    # tok_ref   : (T*BP, 2) int32   col 0: row s*BP+b = token[b, s]
    #                               col 1: row s*BP+b = token[b, T-1-s]
    # embed_ref : (VOCAB_PAD, E)
    # lstm_ref  : (LSTM_ROWS, 8H)   rows [wih_fwd | wih_bwd | whh | bih]
    #             gate-major columns [I_f I_b | F_f F_b | O_f O_b | G_f G_b]
    # head_ref  : (HEAD_ROWS, C_TOT) rows [wconv(320) | bconv | w1 | b1 | w2 | b2]
    # out_ref   : (BP, LABEL_NUM)
    # gx_ref    : (T*BP, 8H)    scratch — per-step input gates (fwd@t=s, bwd@t=T-1-s)
    # hcat_ref  : (T*BP, 2H)    scratch — per-step [h_fwd | h_bwd]
    # y_ref     : (T_PAD*BP, D) scratch — zero-padded, time-major biLSTM output
    f32 = jnp.float32

    # ---- embedding lookup as one-hot MXU matmuls (forward + time-reversed) --
    vocab_iota = lax.broadcasted_iota(jnp.int32, (T * BP, VOCAB_PAD), 1)
    x_f = jnp.dot((vocab_iota == tok_ref[:, 0:1]).astype(f32), embed_ref[...],
                  preferred_element_type=f32)                    # (T*BP, E)
    x_b = jnp.dot((vocab_iota == tok_ref[:, 1:2]).astype(f32), embed_ref[...],
                  preferred_element_type=f32)                    # time-reversed

    # ---- hoisted input projection for BOTH directions (off the serial path) -
    wih_f = lstm_ref[ROW_WIH_F:ROW_WIH_F + E, :]                 # (E, 8H) fwd cols
    wih_b = lstm_ref[ROW_WIH_B:ROW_WIH_B + E, :]                 # (E, 8H) bwd cols
    bih = lstm_ref[ROW_BIH:ROW_BIH + 1, :]                       # (1, 8H)
    gx_ref[...] = (jnp.dot(x_f, wih_f, preferred_element_type=f32)
                   + jnp.dot(x_b, wih_b, preferred_element_type=f32) + bih)

    whh = lstm_ref[ROW_WHH:ROW_WHH + 2 * H, :]                   # (2H, 8H), in vregs

    # ---- interleaved fwd/bwd recurrence (statically unrolled over T) --------
    h_cat = jnp.zeros((BP, 2 * H), f32)    # [h_fwd | h_bwd]
    c_cat = jnp.zeros((BP, 2 * H), f32)
    for s in range(T):
        gates = gx_ref[s * BP:(s + 1) * BP, :] + jnp.dot(
            h_cat, whh, preferred_element_type=f32)              # (BP, 8H)
        sg = jax.nn.sigmoid(gates[:, 0:6 * H])                   # [i | f | o]
        gg = jnp.tanh(gates[:, 6 * H:8 * H])                     # [g]
        c_cat = sg[:, 2 * H:4 * H] * c_cat + sg[:, 0:2 * H] * gg
        h_cat = sg[:, 4 * H:6 * H] * jnp.tanh(c_cat)
        hcat_ref[s * BP:(s + 1) * BP, :] = h_cat                 # one aligned store

    # ---- assemble zero-padded, time-major biLSTM output (bulk, off the path)
    y_ref[...] = jnp.zeros_like(y_ref)
    hcat = hcat_ref[...]                                         # (T*BP, 2H)
    hcat_rev = jnp.concatenate(                                  # time-reversed blocks
        [hcat_ref[(T - 1 - t) * BP:(T - t) * BP, :] for t in range(T)], axis=0)
    col = lax.broadcasted_iota(jnp.int32, (T * BP, D), 1)
    # fwd half (cols < H) in natural time order, bwd half time-reversed back.
    y_ref[PAD * BP:(PAD + T) * BP, :] = jnp.where(col < H, hcat, hcat_rev)

    # ---- fused conv (both widths) via one im2col matmul + tanh --------------
    wconv = head_ref[HR_WCONV:HR_WCONV + K_MAX * D, :]           # (K_MAX*D, C_TOT)
    bconv = head_ref[HR_BCONV:HR_BCONV + 1, :]                   # (1, C_TOT)
    im2col = jnp.concatenate(
        [y_ref[k * BP:k * BP + T * BP, :] for k in range(K_MAX)], axis=1)
    s_act = jnp.tanh(jnp.dot(im2col, wconv, preferred_element_type=f32) + bconv)

    # ---- max-pool over time: log2 fold of whole (t, b) row blocks -----------
    m = s_act                                                    # (T*BP, C_TOT)
    rows = T * BP
    while rows > BP:
        rows //= 2
        m = jnp.maximum(m[0:rows, :], m[rows:2 * rows, :])
    feat = m                                                     # (BP, C_TOT)

    # ---- relu -> linear1 -> relu -> linear2 ---------------------------------
    w1 = head_ref[HR_W1:HR_W1 + IN_FEA, 0:IN_FEA // 2]           # (16, 8)
    b1 = head_ref[HR_B1:HR_B1 + 1, 0:IN_FEA // 2]                # (1, 8)
    w2 = head_ref[HR_W2:HR_W2 + IN_FEA // 2, 0:LABEL_NUM]        # (8, 5)
    b2 = head_ref[HR_B2:HR_B2 + 1, 0:LABEL_NUM]                  # (1, 5)
    h1 = jnp.maximum(feat, 0.0)
    h1 = jnp.maximum(jnp.dot(h1, w1, preferred_element_type=f32) + b1, 0.0)
    out_ref[...] = jnp.dot(h1, w2, preferred_element_type=f32) + b2


# ----------------------------- wrapper (single pallas_call) -------------------
@jax.jit
def lstm_cnn_forward(tokens, packed):
    tok = tokens.astype(jnp.int32)
    tok_pad = jnp.zeros((BP, T), jnp.int32).at[:B].set(tok)          # pad batch -> 8
    tok_f = jnp.transpose(tok_pad, (1, 0)).reshape(T * BP, 1)        # time-major
    tok_b = jnp.transpose(tok_pad[:, ::-1], (1, 0)).reshape(T * BP, 1)
    tok2 = jnp.concatenate([tok_f, tok_b], axis=1)                   # (T*BP, 2)

    out = pl.pallas_call(
        _lstm_cnn_kernel,
        out_shape=jax.ShapeDtypeStruct((BP, LABEL_NUM), jnp.float32),
        in_specs=[pl.BlockSpec(memory_space=pltpu.MemorySpace.VMEM)] * 4,
        out_specs=pl.BlockSpec(memory_space=pltpu.MemorySpace.VMEM),
        scratch_shapes=[pltpu.VMEM((T * BP, 8 * H), jnp.float32),    # gx
                        pltpu.VMEM((T * BP, 2 * H), jnp.float32),    # h_cat history
                        pltpu.VMEM((T_PAD * BP, D), jnp.float32)],   # padded y
    )(tok2, packed["embed"], packed["lstm"], packed["head"])
    return out[:B]


# ----------------------------- parameter init (deterministic, synthetic) ------
def init_params(key):
    ks = jax.random.split(key, 16)

    def u(k, shape, scale=0.1):
        return jax.random.uniform(k, shape, jnp.float32, -scale, scale)

    return {
        "embed": u(ks[0], (VOCAB, E)),
        # LSTM, PyTorch gate order (i, f, g, o); W stored transposed (in, 4H)
        "wih_f": u(ks[1], (E, 4 * H)),
        "whh_f": u(ks[2], (H, 4 * H)),
        "b_f": u(ks[3], (1, 4 * H)),       # b_ih + b_hh merged, forward dir
        "wih_b": u(ks[4], (E, 4 * H)),
        "whh_b": u(ks[5], (H, 4 * H)),
        "b_b": u(ks[6], (1, 4 * H)),       # merged, backward dir
        # Convs: PyTorch (C, 1, K, D) stored as (K, D, C)
        "conv_w": [u(ks[7 + i], (K, D, KERNEL_NUM))
                   for i, K in enumerate(KERNEL_SIZES)],
        "conv_b": [u(ks[9 + i], (1, KERNEL_NUM))
                   for i in range(len(KERNEL_SIZES))],
        # Linear layers stored transposed (in, out)
        "w1": u(ks[11], (IN_FEA, IN_FEA // 2)),
        "b1": u(ks[12], (1, IN_FEA // 2)),
        "w2": u(ks[13], (IN_FEA // 2, LABEL_NUM)),
        "b2": u(ks[14], (1, LABEL_NUM)),
    }


# ----------------------------- one-time weight repack --------------------------
def _gate_blocks(m):
    """(R, 4H) in PyTorch gate order (i, f, g, o) -> blocks in kernel order [i, f, o, g]."""
    return [m[:, 0:H], m[:, H:2 * H], m[:, 3 * H:4 * H], m[:, 2 * H:3 * H]]


def _place_dir(blocks, rows, d):
    """Scatter gate blocks into (rows, 8H) gate-major, direction-interleaved columns:
    [I_f I_b | F_f F_b | O_f O_b | G_f G_b]   (d=0 forward, d=1 backward)."""
    out = jnp.zeros((rows, 8 * H), jnp.float32)
    for gi, blk in enumerate(blocks):
        lo = gi * 2 * H + d * H
        out = out.at[:, lo:lo + H].set(blk)
    return out


def pack_params(p):
    """One-time repack of weights into the kernel's fused layouts."""
    # embedding table, vocab padded to 64 lanes
    embed = jnp.zeros((VOCAB_PAD, E), jnp.float32).at[:VOCAB].set(p["embed"])

    # LSTM: gate-major, direction-interleaved columns; block-structured whh rows
    wih_f8 = _place_dir(_gate_blocks(p["wih_f"]), E, 0)
    wih_b8 = _place_dir(_gate_blocks(p["wih_b"]), E, 1)
    whh = jnp.concatenate([_place_dir(_gate_blocks(p["whh_f"]), H, 0),
                           _place_dir(_gate_blocks(p["whh_b"]), H, 1)], axis=0)
    bih = (_place_dir(_gate_blocks(p["b_f"]), 1, 0)
           + _place_dir(_gate_blocks(p["b_b"]), 1, 1))
    lstm = jnp.zeros((LSTM_ROWS, 8 * H), jnp.float32)
    lstm = lstm.at[ROW_WIH_F:ROW_WIH_F + E].set(wih_f8)
    lstm = lstm.at[ROW_WIH_B:ROW_WIH_B + E].set(wih_b8)
    lstm = lstm.at[ROW_WHH:ROW_WHH + 2 * H].set(whh)
    lstm = lstm.at[ROW_BIH:ROW_BIH + 1].set(bih)

    # Convs: both widths merged into one (K_MAX*D, C_TOT) im2col weight; the
    # narrower kernel is centered, its extra taps read zero-padded rows, which
    # exactly matches Conv2d(padding=(K//2, 0)) for each width.
    wconv = jnp.zeros((K_MAX, D, C_TOT), jnp.float32)
    off = 0
    for i, K in enumerate(KERNEL_SIZES):
        shift = (K_MAX - K) // 2
        wconv = wconv.at[shift:shift + K, :, off:off + KERNEL_NUM].set(p["conv_w"][i])
        off += KERNEL_NUM
    bconv = jnp.concatenate(p["conv_b"], axis=1)

    # Head pack: conv + MLP weights in one 16-lane-wide buffer
    head = jnp.zeros((HEAD_ROWS, C_TOT), jnp.float32)
    head = head.at[HR_WCONV:HR_WCONV + K_MAX * D].set(wconv.reshape(K_MAX * D, C_TOT))
    head = head.at[HR_BCONV:HR_BCONV + 1].set(bconv)
    head = head.at[HR_W1:HR_W1 + IN_FEA, 0:IN_FEA // 2].set(p["w1"])
    head = head.at[HR_B1:HR_B1 + 1, 0:IN_FEA // 2].set(p["b1"])
    head = head.at[HR_W2:HR_W2 + IN_FEA // 2, 0:LABEL_NUM].set(p["w2"])
    head = head.at[HR_B2:HR_B2 + 1, 0:LABEL_NUM].set(p["b2"])

    return {"embed": embed, "lstm": lstm, "head": head}


if __name__ == "__main__":
    key = jax.random.PRNGKey(0)
    k_tok, k_par = jax.random.split(key)
    tokens = jax.random.randint(k_tok, (B, T), 0, VOCAB, dtype=jnp.int32)
    params = init_params(k_par)
    packed = pack_params(params)

    out = lstm_cnn_forward(tokens, packed)
    jax.block_until_ready(out)
    assert out.shape == (B, LABEL_NUM), out.shape
    print("KERNEL_OK")
</pallas_src>

<mosaic_0001>
module attributes {stable_mosaic.version = 11 : i64} {
  func.func @_lstm_cnn_kernel(%arg0: memref<128x2xi32, #tpu.memory_space<vmem>>, %arg1: memref<64x32xf32, #tpu.memory_space<vmem>>, %arg2: memref<136x256xf32, #tpu.memory_space<vmem>>, %arg3: memref<368x16xf32, #tpu.memory_space<vmem>>, %arg4: memref<8x5xf32, #tpu.memory_space<vmem>>, %arg5: memref<128x256xf32, #tpu.memory_space<vmem>>, %arg6: memref<128x64xf32, #tpu.memory_space<vmem>>, %arg7: memref<160x64xf32, #tpu.memory_space<vmem>>) attributes {dimension_semantics = [], scalar_prefetch = 0 : i64, scratch_operands = 3 : i64, tpu.core_type = #tpu.core_type<tc>} {
    %0 = tpu.iota {dimensions = array<i32: 1>} : vector<128x64xi32>
    %c0 = arith.constant 0 : index
    %c0_0 = arith.constant 0 : index
    %1 = vector.load %arg0[%c0, %c0_0] : memref<128x2xi32, #tpu.memory_space<vmem>>, vector<128x1xi32>
    %2 = vector.broadcast %1 : vector<128x1xi32> to vector<128x64xi32>
    %3 = arith.cmpi eq, %0, %2 : vector<128x64xi32>
    %4 = arith.extui %3 : vector<128x64xi1> to vector<128x64xi32>
    %5 = arith.sitofp %4 : vector<128x64xi32> to vector<128x64xf32>
    %c0_1 = arith.constant 0 : index
    %c0_2 = arith.constant 0 : index
    %6 = vector.load %arg1[%c0_1, %c0_2] : memref<64x32xf32, #tpu.memory_space<vmem>>, vector<64x32xf32>
    %cst = arith.constant dense<0.000000e+00> : vector<128x32xf32>
    %7 = tpu.matmul %5, %6, %cst {dimension_numbers = #tpu.dot_dimension_numbers<[1], [0], [0], [1], [0, 0, 1, 1], [], []>} : vector<128x64xf32>, vector<64x32xf32>, vector<128x32xf32> -> vector<128x32xf32>
    %c0_3 = arith.constant 0 : index
    %c1 = arith.constant 1 : index
    %8 = vector.load %arg0[%c0_3, %c1] : memref<128x2xi32, #tpu.memory_space<vmem>>, vector<128x1xi32>
    %9 = vector.broadcast %8 : vector<128x1xi32> to vector<128x64xi32>
    %10 = arith.cmpi eq, %0, %9 : vector<128x64xi32>
    %11 = arith.extui %10 : vector<128x64xi1> to vector<128x64xi32>
    %12 = arith.sitofp %11 : vector<128x64xi32> to vector<128x64xf32>
    %c0_4 = arith.constant 0 : index
    %c0_5 = arith.constant 0 : index
    %13 = vector.load %arg1[%c0_4, %c0_5] : memref<64x32xf32, #tpu.memory_space<vmem>>, vector<64x32xf32>
    %cst_6 = arith.constant dense<0.000000e+00> : vector<128x32xf32>
    %14 = tpu.matmul %12, %13, %cst_6 {dimension_numbers = #tpu.dot_dimension_numbers<[1], [0], [0], [1], [0, 0, 1, 1], [], []>} : vector<128x64xf32>, vector<64x32xf32>, vector<128x32xf32> -> vector<128x32xf32>
    %c0_7 = arith.constant 0 : index
    %c0_8 = arith.constant 0 : index
    %15 = vector.load %arg2[%c0_7, %c0_8] : memref<136x256xf32, #tpu.memory_space<vmem>>, vector<32x256xf32>
    %c32 = arith.constant 32 : index
    %c0_9 = arith.constant 0 : index
    %16 = vector.load %arg2[%c32, %c0_9] : memref<136x256xf32, #tpu.memory_space<vmem>>, vector<32x256xf32>
    %c128 = arith.constant 128 : index
    %c0_10 = arith.constant 0 : index
    %17 = vector.load %arg2[%c128, %c0_10] : memref<136x256xf32, #tpu.memory_space<vmem>>, vector<1x256xf32>
    %cst_11 = arith.constant dense<0.000000e+00> : vector<128x256xf32>
    %18 = tpu.matmul %7, %15, %cst_11 {dimension_numbers = #tpu.dot_dimension_numbers<[1], [0], [0], [1], [0, 0, 1, 1], [], []>} : vector<128x32xf32>, vector<32x256xf32>, vector<128x256xf32> -> vector<128x256xf32>
    %cst_12 = arith.constant dense<0.000000e+00> : vector<128x256xf32>
    %19 = tpu.matmul %14, %16, %cst_12 {dimension_numbers = #tpu.dot_dimension_numbers<[1], [0], [0], [1], [0, 0, 1, 1], [], []>} : vector<128x32xf32>, vector<32x256xf32>, vector<128x256xf32> -> vector<128x256xf32>
    %20 = arith.addf %18, %19 : vector<128x256xf32>
    %21 = vector.broadcast %17 : vector<1x256xf32> to vector<128x256xf32>
    %22 = arith.addf %20, %21 : vector<128x256xf32>
    %c0_13 = arith.constant 0 : index
    %c0_14 = arith.constant 0 : index
    %23 = vector.load %arg5[%c0_13, %c0_14] : memref<128x256xf32, #tpu.memory_space<vmem>>, vector<128x256xf32>
    tpu.vector_store %arg5[%c0_13, %c0_14], %22 {strides = array<i32>} : memref<128x256xf32, #tpu.memory_space<vmem>>, vector<128x256xf32>,
    %c64 = arith.constant 64 : index
    %c0_15 = arith.constant 0 : index
    %24 = vector.load %arg2[%c64, %c0_15] : memref<136x256xf32, #tpu.memory_space<vmem>>, vector<64x256xf32>
    %cst_16 = arith.constant 0.000000e+00 : f32
    %25 = vector.broadcast %cst_16 : f32 to vector<8x64xf32>
    %cst_17 = arith.constant 0.000000e+00 : f32
    %26 = vector.broadcast %cst_17 : f32 to vector<8x64xf32>
    %c0_18 = arith.constant 0 : index
    %c0_19 = arith.constant 0 : index
    %27 = vector.load %arg5[%c0_18, %c0_19] : memref<128x256xf32, #tpu.memory_space<vmem>>, vector<8x256xf32>
    %cst_20 = arith.constant dense<0.000000e+00> : vector<8x256xf32>
    %28 = tpu.matmul %25, %24, %cst_20 {dimension_numbers = #tpu.dot_dimension_numbers<[1], [0], [0], [1], [0, 0, 1, 1], [], []>} : vector<8x64xf32>, vector<64x256xf32>, vector<8x256xf32> -> vector<8x256xf32>
    %29 = arith.addf %27, %28 : vector<8x256xf32>
    %30 = vector.extract_strided_slice %29 {offsets = [0, 0], sizes = [8, 192], strides = [1, 1]} : vector<8x256xf32> to vector<8x192xf32>
    %31 = arith.negf %30 : vector<8x192xf32>
    %32 = math.exp %31 : vector<8x192xf32>
    %cst_21 = arith.constant 1.000000e+00 : f32
    %33 = vector.broadcast %cst_21 : f32 to vector<8x192xf32>
    %34 = arith.addf %33, %32 : vector<8x192xf32>
    %35 = arith.divf %33, %34 : vector<8x192xf32>
    %36 = vector.extract_strided_slice %29 {offsets = [0, 192], sizes = [8, 64], strides = [1, 1]} : vector<8x256xf32> to vector<8x64xf32>
    %37 = math.tanh %36 : vector<8x64xf32>
    %38 = vector.extract_strided_slice %35 {offsets = [0, 64], sizes = [8, 64], strides = [1, 1]} : vector<8x192xf32> to vector<8x64xf32>
    %39 = arith.mulf %38, %26 : vector<8x64xf32>
    %40 = vector.extract_strided_slice %35 {offsets = [0, 0], sizes = [8, 64], strides = [1, 1]} : vector<8x192xf32> to vector<8x64xf32>
    %41 = arith.mulf %40, %37 : vector<8x64xf32>
    %42 = arith.addf %39, %41 : vector<8x64xf32>
    %43 = vector.extract_strided_slice %35 {offsets = [0, 128], sizes = [8, 64], strides = [1, 1]} : vector<8x192xf32> to vector<8x64xf32>
    %44 = math.tanh %42 : vector<8x64xf32>
    %45 = arith.mulf %43, %44 : vector<8x64xf32>
    %c0_22 = arith.constant 0 : index
    %c0_23 = arith.constant 0 : index
    %46 = vector.load %arg6[%c0_22, %c0_23] : memref<128x64xf32, #tpu.memory_space<vmem>>, vector<8x64xf32>
    tpu.vector_store %arg6[%c0_22, %c0_23], %45 {strides = array<i32>} : memref<128x64xf32, #tpu.memory_space<vmem>>, vector<8x64xf32>,
    %c8 = arith.constant 8 : index
    %c0_24 = arith.constant 0 : index
    %47 = vector.load %arg5[%c8, %c0_24] : memref<128x256xf32, #tpu.memory_space<vmem>>, vector<8x256xf32>
    %cst_25 = arith.constant dense<0.000000e+00> : vector<8x256xf32>
    %48 = tpu.matmul %45, %24, %cst_25 {dimension_numbers = #tpu.dot_dimension_numbers<[1], [0], [0], [1], [0, 0, 1, 1], [], []>} : vector<8x64xf32>, vector<64x256xf32>, vector<8x256xf32> -> vector<8x256xf32>
    %49 = arith.addf %47, %48 : vector<8x256xf32>
    %50 = vector.extract_strided_slice %49 {offsets = [0, 0], sizes = [8, 192], strides = [1, 1]} : vector<8x256xf32> to vector<8x192xf32>
    %51 = arith.negf %50 : vector<8x192xf32>
    %52 = math.exp %51 : vector<8x192xf32>
    %cst_26 = arith.constant 1.000000e+00 : f32
    %53 = vector.broadcast %cst_26 : f32 to vector<8x192xf32>
    %54 = arith.addf %53, %52 : vector<8x192xf32>
    %55 = arith.divf %53, %54 : vector<8x192xf32>
    %56 = vector.extract_strided_slice %49 {offsets = [0, 192], sizes = [8, 64], strides = [1, 1]} : vector<8x256xf32> to vector<8x64xf32>
    %57 = math.tanh %56 : vector<8x64xf32>
    %58 = vector.extract_strided_slice %55 {offsets = [0, 64], sizes = [8, 64], strides = [1, 1]} : vector<8x192xf32> to vector<8x64xf32>
    %59 = arith.mulf %58, %42 : vector<8x64xf32>
    %60 = vector.extract_strided_slice %55 {offsets = [0, 0], sizes = [8, 64], strides = [1, 1]} : vector<8x192xf32> to vector<8x64xf32>
    %61 = arith.mulf %60, %57 : vector<8x64xf32>
    %62 = arith.addf %59, %61 : vector<8x64xf32>
    %63 = vector.extract_strided_slice %55 {offsets = [0, 128], sizes = [8, 64], strides = [1, 1]} : vector<8x192xf32> to vector<8x64xf32>
    %64 = math.tanh %62 : vector<8x64xf32>
    %65 = arith.mulf %63, %64 : vector<8x64xf32>
    %c8_27 = arith.constant 8 : index
    %c0_28 = arith.constant 0 : index
    %66 = vector.load %arg6[%c8_27, %c0_28] : memref<128x64xf32, #tpu.memory_space<vmem>>, vector<8x64xf32>
    tpu.vector_store %arg6[%c8_27, %c0_28], %65 {strides = array<i32>} : memref<128x64xf32, #tpu.memory_space<vmem>>, vector<8x64xf32>,
    %c16 = arith.constant 16 : index
    %c0_29 = arith.constant 0 : index
    %67 = vector.load %arg5[%c16, %c0_29] : memref<128x256xf32, #tpu.memory_space<vmem>>, vector<8x256xf32>
    %cst_30 = arith.constant dense<0.000000e+00> : vector<8x256xf32>
    %68 = tpu.matmul %65, %24, %cst_30 {dimension_numbers = #tpu.dot_dimension_numbers<[1], [0], [0], [1], [0, 0, 1, 1], [], []>} : vector<8x64xf32>, vector<64x256xf32>, vector<8x256xf32> -> vector<8x256xf32>
    %69 = arith.addf %67, %68 : vector<8x256xf32>
    %70 = vector.extract_strided_slice %69 {offsets = [0, 0], sizes = [8, 192], strides = [1, 1]} : vector<8x256xf32> to vector<8x192xf32>
    %71 = arith.negf %70 : vector<8x192xf32>
    %72 = math.exp %71 : vector<8x192xf32>
    %cst_31 = arith.constant 1.000000e+00 : f32
    %73 = vector.broadcast %cst_31 : f32 to vector<8x192xf32>
    %74 = arith.addf %73, %72 : vector<8x192xf32>
    %75 = arith.divf %73, %74 : vector<8x192xf32>
    %76 = vector.extract_strided_slice %69 {offsets = [0, 192], sizes = [8, 64], strides = [1, 1]} : vector<8x256xf32> to vector<8x64xf32>
    %77 = math.tanh %76 : vector<8x64xf32>
    %78 = vector.extract_strided_slice %75 {offsets = [0, 64], sizes = [8, 64], strides = [1, 1]} : vector<8x192xf32> to vector<8x64xf32>
    %79 = arith.mulf %78, %62 : vector<8x64xf32>
    %80 = vector.extract_strided_slice %75 {offsets = [0, 0], sizes = [8, 64], strides = [1, 1]} : vector<8x192xf32> to vector<8x64xf32>
    %81 = arith.mulf %80, %77 : vector<8x64xf32>
    %82 = arith.addf %79, %81 : vector<8x64xf32>
    %83 = vector.extract_strided_slice %75 {offsets = [0, 128], sizes = [8, 64], strides = [1, 1]} : vector<8x192xf32> to vector<8x64xf32>
    %84 = math.tanh %82 : vector<8x64xf32>
    %85 = arith.mulf %83, %84 : vector<8x64xf32>
    %c16_32 = arith.constant 16 : index
    %c0_33 = arith.constant 0 : index
    %86 = vector.load %arg6[%c16_32, %c0_33] : memref<128x64xf32, #tpu.memory_space<vmem>>, vector<8x64xf32>
    tpu.vector_store %arg6[%c16_32, %c0_33], %85 {strides = array<i32>} : memref<128x64xf32, #tpu.memory_space<vmem>>, vector<8x64xf32>,
    %c24 = arith.constant 24 : index
    %c0_34 = arith.constant 0 : index
    %87 = vector.load %arg5[%c24, %c0_34] : memref<128x256xf32, #tpu.memory_space<vmem>>, vector<8x256xf32>
    %cst_35 = arith.constant dense<0.000000e+00> : vector<8x256xf32>
    %88 = tpu.matmul %85, %24, %cst_35 {dimension_numbers = #tpu.dot_dimension_numbers<[1], [0], [0], [1], [0, 0, 1, 1], [], []>} : vector<8x64xf32>, vector<64x256xf32>, vector<8x256xf32> -> vector<8x256xf32>
    %89 = arith.addf %87, %88 : vector<8x256xf32>
    %90 = vector.extract_strided_slice %89 {offsets = [0, 0], sizes = [8, 192], strides = [1, 1]} : vector<8x256xf32> to vector<8x192xf32>
    %91 = arith.negf %90 : vector<8x192xf32>
    %92 = math.exp %91 : vector<8x192xf32>
    %cst_36 = arith.constant 1.000000e+00 : f32
    %93 = vector.broadcast %cst_36 : f32 to vector<8x192xf32>
    %94 = arith.addf %93, %92 : vector<8x192xf32>
    %95 = arith.divf %93, %94 : vector<8x192xf32>
    %96 = vector.extract_strided_slice %89 {offsets = [0, 192], sizes = [8, 64], strides = [1, 1]} : vector<8x256xf32> to vector<8x64xf32>
    %97 = math.tanh %96 : vector<8x64xf32>
    %98 = vector.extract_strided_slice %95 {offsets = [0, 64], sizes = [8, 64], strides = [1, 1]} : vector<8x192xf32> to vector<8x64xf32>
    %99 = arith.mulf %98, %82 : vector<8x64xf32>
    %100 = vector.extract_strided_slice %95 {offsets = [0, 0], sizes = [8, 64], strides = [1, 1]} : vector<8x192xf32> to vector<8x64xf32>
    %101 = arith.mulf %100, %97 : vector<8x64xf32>
    %102 = arith.addf %99, %101 : vector<8x64xf32>
    %103 = vector.extract_strided_slice %95 {offsets = [0, 128], sizes = [8, 64], strides = [1, 1]} : vector<8x192xf32> to vector<8x64xf32>
    %104 = math.tanh %102 : vector<8x64xf32>
    %105 = arith.mulf %103, %104 : vector<8x64xf32>
    %c24_37 = arith.constant 24 : index
    %c0_38 = arith.constant 0 : index
    %106 = vector.load %arg6[%c24_37, %c0_38] : memref<128x64xf32, #tpu.memory_space<vmem>>, vector<8x64xf32>
    tpu.vector_store %arg6[%c24_37, %c0_38], %105 {strides = array<i32>} : memref<128x64xf32, #tpu.memory_space<vmem>>, vector<8x64xf32>,
    %c32_39 = arith.constant 32 : index
    %c0_40 = arith.constant 0 : index
    %107 = vector.load %arg5[%c32_39, %c0_40] : memref<128x256xf32, #tpu.memory_space<vmem>>, vector<8x256xf32>
    %cst_41 = arith.constant dense<0.000000e+00> : vector<8x256xf32>
    %108 = tpu.matmul %105, %24, %cst_41 {dimension_numbers = #tpu.dot_dimension_numbers<[1], [0], [0], [1], [0, 0, 1, 1], [], []>} : vector<8x64xf32>, vector<64x256xf32>, vector<8x256xf32> -> vector<8x256xf32>
    %109 = arith.addf %107, %108 : vector<8x256xf32>
    %110 = vector.extract_strided_slice %109 {offsets = [0, 0], sizes = [8, 192], strides = [1, 1]} : vector<8x256xf32> to vector<8x192xf32>
    %111 = arith.negf %110 : vector<8x192xf32>
    %112 = math.exp %111 : vector<8x192xf32>
    %cst_42 = arith.constant 1.000000e+00 : f32
    %113 = vector.broadcast %cst_42 : f32 to vector<8x192xf32>
    %114 = arith.addf %113, %112 : vector<8x192xf32>
    %115 = arith.divf %113, %114 : vector<8x192xf32>
    %116 = vector.extract_strided_slice %109 {offsets = [0, 192], sizes = [8, 64], strides = [1, 1]} : vector<8x256xf32> to vector<8x64xf32>
    %117 = math.tanh %116 : vector<8x64xf32>
    %118 = vector.extract_strided_slice %115 {offsets = [0, 64], sizes = [8, 64], strides = [1, 1]} : vector<8x192xf32> to vector<8x64xf32>
    %119 = arith.mulf %118, %102 : vector<8x64xf32>
    %120 = vector.extract_strided_slice %115 {offsets = [0, 0], sizes = [8, 64], strides = [1, 1]} : vector<8x192xf32> to vector<8x64xf32>
    %121 = arith.mulf %120, %117 : vector<8x64xf32>
    %122 = arith.addf %119, %121 : vector<8x64xf32>
    %123 = vector.extract_strided_slice %115 {offsets = [0, 128], sizes = [8, 64], strides = [1, 1]} : vector<8x192xf32> to vector<8x64xf32>
    %124 = math.tanh %122 : vector<8x64xf32>
    %125 = arith.mulf %123, %124 : vector<8x64xf32>
    %c32_43 = arith.constant 32 : index
    %c0_44 = arith.constant 0 : index
    %126 = vector.load %arg6[%c32_43, %c0_44] : memref<128x64xf32, #tpu.memory_space<vmem>>, vector<8x64xf32>
    tpu.vector_store %arg6[%c32_43, %c0_44], %125 {strides = array<i32>} : memref<128x64xf32, #tpu.memory_space<vmem>>, vector<8x64xf32>,
    %c40 = arith.constant 40 : index
    %c0_45 = arith.constant 0 : index
    %127 = vector.load %arg5[%c40, %c0_45] : memref<128x256xf32, #tpu.memory_space<vmem>>, vector<8x256xf32>
    %cst_46 = arith.constant dense<0.000000e+00> : vector<8x256xf32>
    %128 = tpu.matmul %125, %24, %cst_46 {dimension_numbers = #tpu.dot_dimension_numbers<[1], [0], [0], [1], [0, 0, 1, 1], [], []>} : vector<8x64xf32>, vector<64x256xf32>, vector<8x256xf32> -> vector<8x256xf32>
    %129 = arith.addf %127, %128 : vector<8x256xf32>
    %130 = vector.extract_strided_slice %129 {offsets = [0, 0], sizes = [8, 192], strides = [1, 1]} : vector<8x256xf32> to vector<8x192xf32>
    %131 = arith.negf %130 : vector<8x192xf32>
    %132 = math.exp %131 : vector<8x192xf32>
    %cst_47 = arith.constant 1.000000e+00 : f32
    %133 = vector.broadcast %cst_47 : f32 to vector<8x192xf32>
    %134 = arith.addf %133, %132 : vector<8x192xf32>
    %135 = arith.divf %133, %134 : vector<8x192xf32>
    %136 = vector.extract_strided_slice %129 {offsets = [0, 192], sizes = [8, 64], strides = [1, 1]} : vector<8x256xf32> to vector<8x64xf32>
    %137 = math.tanh %136 : vector<8x64xf32>
    %138 = vector.extract_strided_slice %135 {offsets = [0, 64], sizes = [8, 64], strides = [1, 1]} : vector<8x192xf32> to vector<8x64xf32>
    %139 = arith.mulf %138, %122 : vector<8x64xf32>
    %140 = vector.extract_strided_slice %135 {offsets = [0, 0], sizes = [8, 64], strides = [1, 1]} : vector<8x192xf32> to vector<8x64xf32>
    %141 = arith.mulf %140, %137 : vector<8x64xf32>
    %142 = arith.addf %139, %141 : vector<8x64xf32>
    %143 = vector.extract_strided_slice %135 {offsets = [0, 128], sizes = [8, 64], strides = [1, 1]} : vector<8x192xf32> to vector<8x64xf32>
    %144 = math.tanh %142 : vector<8x64xf32>
    %145 = arith.mulf %143, %144 : vector<8x64xf32>
    %c40_48 = arith.constant 40 : index
    %c0_49 = arith.constant 0 : index
    %146 = vector.load %arg6[%c40_48, %c0_49] : memref<128x64xf32, #tpu.memory_space<vmem>>, vector<8x64xf32>
    tpu.vector_store %arg6[%c40_48, %c0_49], %145 {strides = array<i32>} : memref<128x64xf32, #tpu.memory_space<vmem>>, vector<8x64xf32>,
    %c48 = arith.constant 48 : index
    %c0_50 = arith.constant 0 : index
    %147 = vector.load %arg5[%c48, %c0_50] : memref<128x256xf32, #tpu.memory_space<vmem>>, vector<8x256xf32>
    %cst_51 = arith.constant dense<0.000000e+00> : vector<8x256xf32>
    %148 = tpu.matmul %145, %24, %cst_51 {dimension_numbers = #tpu.dot_dimension_numbers<[1], [0], [0], [1], [0, 0, 1, 1], [], []>} : vector<8x64xf32>, vector<64x256xf32>, vector<8x256xf32> -> vector<8x256xf32>
    %149 = arith.addf %147, %148 : vector<8x256xf32>
    %150 = vector.extract_strided_slice %149 {offsets = [0, 0], sizes = [8, 192], strides = [1, 1]} : vector<8x256xf32> to vector<8x192xf32>
    %151 = arith.negf %150 : vector<8x192xf32>
    %152 = math.exp %151 : vector<8x192xf32>
    %cst_52 = arith.constant 1.000000e+00 : f32
    %153 = vector.broadcast %cst_52 : f32 to vector<8x192xf32>
    %154 = arith.addf %153, %152 : vector<8x192xf32>
    %155 = arith.divf %153, %154 : vector<8x192xf32>
    %156 = vector.extract_strided_slice %149 {offsets = [0, 192], sizes = [8, 64], strides = [1, 1]} : vector<8x256xf32> to vector<8x64xf32>
    %157 = math.tanh %156 : vector<8x64xf32>
    %158 = vector.extract_strided_slice %155 {offsets = [0, 64], sizes = [8, 64], strides = [1, 1]} : vector<8x192xf32> to vector<8x64xf32>
    %159 = arith.mulf %158, %142 : vector<8x64xf32>
    %160 = vector.extract_strided_slice %155 {offsets = [0, 0], sizes = [8, 64], strides = [1, 1]} : vector<8x192xf32> to vector<8x64xf32>
    %161 = arith.mulf %160, %157 : vector<8x64xf32>
    %162 = arith.addf %159, %161 : vector<8x64xf32>
    %163 = vector.extract_strided_slice %155 {offsets = [0, 128], sizes = [8, 64], strides = [1, 1]} : vector<8x192xf32> to vector<8x64xf32>
    %164 = math.tanh %162 : vector<8x64xf32>
    %165 = arith.mulf %163, %164 : vector<8x64xf32>
    %c48_53 = arith.constant 48 : index
    %c0_54 = arith.constant 0 : index
    %166 = vector.load %arg6[%c48_53, %c0_54] : memref<128x64xf32, #tpu.memory_space<vmem>>, vector<8x64xf32>
    tpu.vector_store %arg6[%c48_53, %c0_54], %165 {strides = array<i32>} : memref<128x64xf32, #tpu.memory_space<vmem>>, vector<8x64xf32>,
    %c56 = arith.constant 56 : index
    %c0_55 = arith.constant 0 : index
    %167 = vector.load %arg5[%c56, %c0_55] : memref<128x256xf32, #tpu.memory_space<vmem>>, vector<8x256xf32>
    %cst_56 = arith.constant dense<0.000000e+00> : vector<8x256xf32>
    %168 = tpu.matmul %165, %24, %cst_56 {dimension_numbers = #tpu.dot_dimension_numbers<[1], [0], [0], [1], [0, 0, 1, 1], [], []>} : vector<8x64xf32>, vector<64x256xf32>, vector<8x256xf32> -> vector<8x256xf32>
    %169 = arith.addf %167, %168 : vector<8x256xf32>
    %170 = vector.extract_strided_slice %169 {offsets = [0, 0], sizes = [8, 192], strides = [1, 1]} : vector<8x256xf32> to vector<8x192xf32>
    %171 = arith.negf %170 : vector<8x192xf32>
    %172 = math.exp %171 : vector<8x192xf32>
    %cst_57 = arith.constant 1.000000e+00 : f32
    %173 = vector.broadcast %cst_57 : f32 to vector<8x192xf32>
    %174 = arith.addf %173, %172 : vector<8x192xf32>
    %175 = arith.divf %173, %174 : vector<8x192xf32>
    %176 = vector.extract_strided_slice %169 {offsets = [0, 192], sizes = [8, 64], strides = [1, 1]} : vector<8x256xf32> to vector<8x64xf32>
    %177 = math.tanh %176 : vector<8x64xf32>
    %178 = vector.extract_strided_slice %175 {offsets = [0, 64], sizes = [8, 64], strides = [1, 1]} : vector<8x192xf32> to vector<8x64xf32>
    %179 = arith.mulf %178, %162 : vector<8x64xf32>
    %180 = vector.extract_strided_slice %175 {offsets = [0, 0], sizes = [8, 64], strides = [1, 1]} : vector<8x192xf32> to vector<8x64xf32>
    %181 = arith.mulf %180, %177 : vector<8x64xf32>
    %182 = arith.addf %179, %181 : vector<8x64xf32>
    %183 = vector.extract_strided_slice %175 {offsets = [0, 128], sizes = [8, 64], strides = [1, 1]} : vector<8x192xf32> to vector<8x64xf32>
    %184 = math.tanh %182 : vector<8x64xf32>
    %185 = arith.mulf %183, %184 : vector<8x64xf32>
    %c56_58 = arith.constant 56 : index
    %c0_59 = arith.constant 0 : index
    %186 = vector.load %arg6[%c56_58, %c0_59] : memref<128x64xf32, #tpu.memory_space<vmem>>, vector<8x64xf32>
    tpu.vector_store %arg6[%c56_58, %c0_59], %185 {strides = array<i32>} : memref<128x64xf32, #tpu.memory_space<vmem>>, vector<8x64xf32>,
    %c64_60 = arith.constant 64 : index
    %c0_61 = arith.constant 0 : index
    %187 = vector.load %arg5[%c64_60, %c0_61] : memref<128x256xf32, #tpu.memory_space<vmem>>, vector<8x256xf32>
    %cst_62 = arith.constant dense<0.000000e+00> : vector<8x256xf32>
    %188 = tpu.matmul %185, %24, %cst_62 {dimension_numbers = #tpu.dot_dimension_numbers<[1], [0], [0], [1], [0, 0, 1, 1], [], []>} : vector<8x64xf32>, vector<64x256xf32>, vector<8x256xf32> -> vector<8x256xf32>
    %189 = arith.addf %187, %188 : vector<8x256xf32>
    %190 = vector.extract_strided_slice %189 {offsets = [0, 0], sizes = [8, 192], strides = [1, 1]} : vector<8x256xf32> to vector<8x192xf32>
    %191 = arith.negf %190 : vector<8x192xf32>
    %192 = math.exp %191 : vector<8x192xf32>
    %cst_63 = arith.constant 1.000000e+00 : f32
    %193 = vector.broadcast %cst_63 : f32 to vector<8x192xf32>
    %194 = arith.addf %193, %192 : vector<8x192xf32>
    %195 = arith.divf %193, %194 : vector<8x192xf32>
    %196 = vector.extract_strided_slice %189 {offsets = [0, 192], sizes = [8, 64], strides = [1, 1]} : vector<8x256xf32> to vector<8x64xf32>
    %197 = math.tanh %196 : vector<8x64xf32>
    %198 = vector.extract_strided_slice %195 {offsets = [0, 64], sizes = [8, 64], strides = [1, 1]} : vector<8x192xf32> to vector<8x64xf32>
    %199 = arith.mulf %198, %182 : vector<8x64xf32>
    %200 = vector.extract_strided_slice %195 {offsets = [0, 0], sizes = [8, 64], strides = [1, 1]} : vector<8x192xf32> to vector<8x64xf32>
    %201 = arith.mulf %200, %197 : vector<8x64xf32>
    %202 = arith.addf %199, %201 : vector<8x64xf32>
    %203 = vector.extract_strided_slice %195 {offsets = [0, 128], sizes = [8, 64], strides = [1, 1]} : vector<8x192xf32> to vector<8x64xf32>
    %204 = math.tanh %202 : vector<8x64xf32>
    %205 = arith.mulf %203, %204 : vector<8x64xf32>
    %c64_64 = arith.constant 64 : index
    %c0_65 = arith.constant 0 : index
    %206 = vector.load %arg6[%c64_64, %c0_65] : memref<128x64xf32, #tpu.memory_space<vmem>>, vector<8x64xf32>
    tpu.vector_store %arg6[%c64_64, %c0_65], %205 {strides = array<i32>} : memref<128x64xf32, #tpu.memory_space<vmem>>, vector<8x64xf32>,
    %c72 = arith.constant 72 : index
    %c0_66 = arith.constant 0 : index
    %207 = vector.load %arg5[%c72, %c0_66] : memref<128x256xf32, #tpu.memory_space<vmem>>, vector<8x256xf32>
    %cst_67 = arith.constant dense<0.000000e+00> : vector<8x256xf32>
    %208 = tpu.matmul %205, %24, %cst_67 {dimension_numbers = #tpu.dot_dimension_numbers<[1], [0], [0], [1], [0, 0, 1, 1], [], []>} : vector<8x64xf32>, vector<64x256xf32>, vector<8x256xf32> -> vector<8x256xf32>
    %209 = arith.addf %207, %208 : vector<8x256xf32>
    %210 = vector.extract_strided_slice %209 {offsets = [0, 0], sizes = [8, 192], strides = [1, 1]} : vector<8x256xf32> to vector<8x192xf32>
    %211 = arith.negf %210 : vector<8x192xf32>
    %212 = math.exp %211 : vector<8x192xf32>
    %cst_68 = arith.constant 1.000000e+00 : f32
    %213 = vector.broadcast %cst_68 : f32 to vector<8x192xf32>
    %214 = arith.addf %213, %212 : vector<8x192xf32>
    %215 = arith.divf %213, %214 : vector<8x192xf32>
    %216 = vector.extract_strided_slice %209 {offsets = [0, 192], sizes = [8, 64], strides = [1, 1]} : vector<8x256xf32> to vector<8x64xf32>
    %217 = math.tanh %216 : vector<8x64xf32>
    %218 = vector.extract_strided_slice %215 {offsets = [0, 64], sizes = [8, 64], strides = [1, 1]} : vector<8x192xf32> to vector<8x64xf32>
    %219 = arith.mulf %218, %202 : vector<8x64xf32>
    %220 = vector.extract_strided_slice %215 {offsets = [0, 0], sizes = [8, 64], strides = [1, 1]} : vector<8x192xf32> to vector<8x64xf32>
    %221 = arith.mulf %220, %217 : vector<8x64xf32>
    %222 = arith.addf %219, %221 : vector<8x64xf32>
    %223 = vector.extract_strided_slice %215 {offsets = [0, 128], sizes = [8, 64], strides = [1, 1]} : vector<8x192xf32> to vector<8x64xf32>
    %224 = math.tanh %222 : vector<8x64xf32>
    %225 = arith.mulf %223, %224 : vector<8x64xf32>
    %c72_69 = arith.constant 72 : index
    %c0_70 = arith.constant 0 : index
    %226 = vector.load %arg6[%c72_69, %c0_70] : memref<128x64xf32, #tpu.memory_space<vmem>>, vector<8x64xf32>
    tpu.vector_store %arg6[%c72_69, %c0_70], %225 {strides = array<i32>} : memref<128x64xf32, #tpu.memory_space<vmem>>, vector<8x64xf32>,
    %c80 = arith.constant 80 : index
    %c0_71 = arith.constant 0 : index
    %227 = vector.load %arg5[%c80, %c0_71] : memref<128x256xf32, #tpu.memory_space<vmem>>, vector<8x256xf32>
    %cst_72 = arith.constant dense<0.000000e+00> : vector<8x256xf32>
    %228 = tpu.matmul %225, %24, %cst_72 {dimension_numbers = #tpu.dot_dimension_numbers<[1], [0], [0], [1], [0, 0, 1, 1], [], []>} : vector<8x64xf32>, vector<64x256xf32>, vector<8x256xf32> -> vector<8x256xf32>
    %229 = arith.addf %227, %228 : vector<8x256xf32>
    %230 = vector.extract_strided_slice %229 {offsets = [0, 0], sizes = [8, 192], strides = [1, 1]} : vector<8x256xf32> to vector<8x192xf32>
    %231 = arith.negf %230 : vector<8x192xf32>
    %232 = math.exp %231 : vector<8x192xf32>
    %cst_73 = arith.constant 1.000000e+00 : f32
    %233 = vector.broadcast %cst_73 : f32 to vector<8x192xf32>
    %234 = arith.addf %233, %232 : vector<8x192xf32>
    %235 = arith.divf %233, %234 : vector<8x192xf32>
    %236 = vector.extract_strided_slice %229 {offsets = [0, 192], sizes = [8, 64], strides = [1, 1]} : vector<8x256xf32> to vector<8x64xf32>
    %237 = math.tanh %236 : vector<8x64xf32>
    %238 = vector.extract_strided_slice %235 {offsets = [0, 64], sizes = [8, 64], strides = [1, 1]} : vector<8x192xf32> to vector<8x64xf32>
    %239 = arith.mulf %238, %222 : vector<8x64xf32>
    %240 = vector.extract_strided_slice %235 {offsets = [0, 0], sizes = [8, 64], strides = [1, 1]} : vector<8x192xf32> to vector<8x64xf32>
    %241 = arith.mulf %240, %237 : vector<8x64xf32>
    %242 = arith.addf %239, %241 : vector<8x64xf32>
    %243 = vector.extract_strided_slice %235 {offsets = [0, 128], sizes = [8, 64], strides = [1, 1]} : vector<8x192xf32> to vector<8x64xf32>
    %244 = math.tanh %242 : vector<8x64xf32>
    %245 = arith.mulf %243, %244 : vector<8x64xf32>
    %c80_74 = arith.constant 80 : index
    %c0_75 = arith.constant 0 : index
    %246 = vector.load %arg6[%c80_74, %c0_75] : memref<128x64xf32, #tpu.memory_space<vmem>>, vector<8x64xf32>
    tpu.vector_store %arg6[%c80_74, %c0_75], %245 {strides = array<i32>} : memref<128x64xf32, #tpu.memory_space<vmem>>, vector<8x64xf32>,
    %c88 = arith.constant 88 : index
    %c0_76 = arith.constant 0 : index
    %247 = vector.load %arg5[%c88, %c0_76] : memref<128x256xf32, #tpu.memory_space<vmem>>, vector<8x256xf32>
    %cst_77 = arith.constant dense<0.000000e+00> : vector<8x256xf32>
    %248 = tpu.matmul %245, %24, %cst_77 {dimension_numbers = #tpu.dot_dimension_numbers<[1], [0], [0], [1], [0, 0, 1, 1], [], []>} : vector<8x64xf32>, vector<64x256xf32>, vector<8x256xf32> -> vector<8x256xf32>
    %249 = arith.addf %247, %248 : vector<8x256xf32>
    %250 = vector.extract_strided_slice %249 {offsets = [0, 0], sizes = [8, 192], strides = [1, 1]} : vector<8x256xf32> to vector<8x192xf32>
    %251 = arith.negf %250 : vector<8x192xf32>
    %252 = math.exp %251 : vector<8x192xf32>
    %cst_78 = arith.constant 1.000000e+00 : f32
    %253 = vector.broadcast %cst_78 : f32 to vector<8x192xf32>
    %254 = arith.addf %253, %252 : vector<8x192xf32>
    %255 = arith.divf %253, %254 : vector<8x192xf32>
    %256 = vector.extract_strided_slice %249 {offsets = [0, 192], sizes = [8, 64], strides = [1, 1]} : vector<8x256xf32> to vector<8x64xf32>
    %257 = math.tanh %256 : vector<8x64xf32>
    %258 = vector.extract_strided_slice %255 {offsets = [0, 64], sizes = [8, 64], strides = [1, 1]} : vector<8x192xf32> to vector<8x64xf32>
    %259 = arith.mulf %258, %242 : vector<8x64xf32>
    %260 = vector.extract_strided_slice %255 {offsets = [0, 0], sizes = [8, 64], strides = [1, 1]} : vector<8x192xf32> to vector<8x64xf32>
    %261 = arith.mulf %260, %257 : vector<8x64xf32>
    %262 = arith.addf %259, %261 : vector<8x64xf32>
    %263 = vector.extract_strided_slice %255 {offsets = [0, 128], sizes = [8, 64], strides = [1, 1]} : vector<8x192xf32> to vector<8x64xf32>
    %264 = math.tanh %262 : vector<8x64xf32>
    %265 = arith.mulf %263, %264 : vector<8x64xf32>
    %c88_79 = arith.constant 88 : index
    %c0_80 = arith.constant 0 : index
    %266 = vector.load %arg6[%c88_79, %c0_80] : memref<128x64xf32, #tpu.memory_space<vmem>>, vector<8x64xf32>
    tpu.vector_store %arg6[%c88_79, %c0_80], %265 {strides = array<i32>} : memref<128x64xf32, #tpu.memory_space<vmem>>, vector<8x64xf32>,
    %c96 = arith.constant 96 : index
    %c0_81 = arith.constant 0 : index
    %267 = vector.load %arg5[%c96, %c0_81] : memref<128x256xf32, #tpu.memory_space<vmem>>, vector<8x256xf32>
    %cst_82 = arith.constant dense<0.000000e+00> : vector<8x256xf32>
    %268 = tpu.matmul %265, %24, %cst_82 {dimension_numbers = #tpu.dot_dimension_numbers<[1], [0], [0], [1], [0, 0, 1, 1], [], []>} : vector<8x64xf32>, vector<64x256xf32>, vector<8x256xf32> -> vector<8x256xf32>
    %269 = arith.addf %267, %268 : vector<8x256xf32>
    %270 = vector.extract_strided_slice %269 {offsets = [0, 0], sizes = [8, 192], strides = [1, 1]} : vector<8x256xf32> to vector<8x192xf32>
    %271 = arith.negf %270 : vector<8x192xf32>
    %272 = math.exp %271 : vector<8x192xf32>
    %cst_83 = arith.constant 1.000000e+00 : f32
    %273 = vector.broadcast %cst_83 : f32 to vector<8x192xf32>
    %274 = arith.addf %273, %272 : vector<8x192xf32>
    %275 = arith.divf %273, %274 : vector<8x192xf32>
    %276 = vector.extract_strided_slice %269 {offsets = [0, 192], sizes = [8, 64], strides = [1, 1]} : vector<8x256xf32> to vector<8x64xf32>
    %277 = math.tanh %276 : vector<8x64xf32>
    %278 = vector.extract_strided_slice %275 {offsets = [0, 64], sizes = [8, 64], strides = [1, 1]} : vector<8x192xf32> to vector<8x64xf32>
    %279 = arith.mulf %278, %262 : vector<8x64xf32>
    %280 = vector.extract_strided_slice %275 {offsets = [0, 0], sizes = [8, 64], strides = [1, 1]} : vector<8x192xf32> to vector<8x64xf32>
    %281 = arith.mulf %280, %277 : vector<8x64xf32>
    %282 = arith.addf %279, %281 : vector<8x64xf32>
    %283 = vector.extract_strided_slice %275 {offsets = [0, 128], sizes = [8, 64], strides = [1, 1]} : vector<8x192xf32> to vector<8x64xf32>
    %284 = math.tanh %282 : vector<8x64xf32>
    %285 = arith.mulf %283, %284 : vector<8x64xf32>
    %c96_84 = arith.constant 96 : index
    %c0_85 = arith.constant 0 : index
    %286 = vector.load %arg6[%c96_84, %c0_85] : memref<128x64xf32, #tpu.memory_space<vmem>>, vector<8x64xf32>
    tpu.vector_store %arg6[%c96_84, %c0_85], %285 {strides = array<i32>} : memref<128x64xf32, #tpu.memory_space<vmem>>, vector<8x64xf32>,
    %c104 = arith.constant 104 : index
    %c0_86 = arith.constant 0 : index
    %287 = vector.load %arg5[%c104, %c0_86] : memref<128x256xf32, #tpu.memory_space<vmem>>, vector<8x256xf32>
    %cst_87 = arith.constant dense<0.000000e+00> : vector<8x256xf32>
    %288 = tpu.matmul %285, %24, %cst_87 {dimension_numbers = #tpu.dot_dimension_numbers<[1], [0], [0], [1], [0, 0, 1, 1], [], []>} : vector<8x64xf32>, vector<64x256xf32>, vector<8x256xf32> -> vector<8x256xf32>
    %289 = arith.addf %287, %288 : vector<8x256xf32>
    %290 = vector.extract_strided_slice %289 {offsets = [0, 0], sizes = [8, 192], strides = [1, 1]} : vector<8x256xf32> to vector<8x192xf32>
    %291 = arith.negf %290 : vector<8x192xf32>
    %292 = math.exp %291 : vector<8x192xf32>
    %cst_88 = arith.constant 1.000000e+00 : f32
    %293 = vector.broadcast %cst_88 : f32 to vector<8x192xf32>
    %294 = arith.addf %293, %292 : vector<8x192xf32>
    %295 = arith.divf %293, %294 : vector<8x192xf32>
    %296 = vector.extract_strided_slice %289 {offsets = [0, 192], sizes = [8, 64], strides = [1, 1]} : vector<8x256xf32> to vector<8x64xf32>
    %297 = math.tanh %296 : vector<8x64xf32>
    %298 = vector.extract_strided_slice %295 {offsets = [0, 64], sizes = [8, 64], strides = [1, 1]} : vector<8x192xf32> to vector<8x64xf32>
    %299 = arith.mulf %298, %282 : vector<8x64xf32>
    %300 = vector.extract_strided_slice %295 {offsets = [0, 0], sizes = [8, 64], strides = [1, 1]} : vector<8x192xf32> to vector<8x64xf32>
    %301 = arith.mulf %300, %297 : vector<8x64xf32>
    %302 = arith.addf %299, %301 : vector<8x64xf32>
    %303 = vector.extract_strided_slice %295 {offsets = [0, 128], sizes = [8, 64], strides = [1, 1]} : vector<8x192xf32> to vector<8x64xf32>
    %304 = math.tanh %302 : vector<8x64xf32>
    %305 = arith.mulf %303, %304 : vector<8x64xf32>
    %c104_89 = arith.constant 104 : index
    %c0_90 = arith.constant 0 : index
    %306 = vector.load %arg6[%c104_89, %c0_90] : memref<128x64xf32, #tpu.memory_space<vmem>>, vector<8x64xf32>
    tpu.vector_store %arg6[%c104_89, %c0_90], %305 {strides = array<i32>} : memref<128x64xf32, #tpu.memory_space<vmem>>, vector<8x64xf32>,
    %c112 = arith.constant 112 : index
    %c0_91 = arith.constant 0 : index
    %307 = vector.load %arg5[%c112, %c0_91] : memref<128x256xf32, #tpu.memory_space<vmem>>, vector<8x256xf32>
    %cst_92 = arith.constant dense<0.000000e+00> : vector<8x256xf32>
    %308 = tpu.matmul %305, %24, %cst_92 {dimension_numbers = #tpu.dot_dimension_numbers<[1], [0], [0], [1], [0, 0, 1, 1], [], []>} : vector<8x64xf32>, vector<64x256xf32>, vector<8x256xf32> -> vector<8x256xf32>
    %309 = arith.addf %307, %308 : vector<8x256xf32>
    %310 = vector.extract_strided_slice %309 {offsets = [0, 0], sizes = [8, 192], strides = [1, 1]} : vector<8x256xf32> to vector<8x192xf32>
    %311 = arith.negf %310 : vector<8x192xf32>
    %312 = math.exp %311 : vector<8x192xf32>
    %cst_93 = arith.constant 1.000000e+00 : f32
    %313 = vector.broadcast %cst_93 : f32 to vector<8x192xf32>
    %314 = arith.addf %313, %312 : vector<8x192xf32>
    %315 = arith.divf %313, %314 : vector<8x192xf32>
    %316 = vector.extract_strided_slice %309 {offsets = [0, 192], sizes = [8, 64], strides = [1, 1]} : vector<8x256xf32> to vector<8x64xf32>
    %317 = math.tanh %316 : vector<8x64xf32>
    %318 = vector.extract_strided_slice %315 {offsets = [0, 64], sizes = [8, 64], strides = [1, 1]} : vector<8x192xf32> to vector<8x64xf32>
    %319 = arith.mulf %318, %302 : vector<8x64xf32>
    %320 = vector.extract_strided_slice %315 {offsets = [0, 0], sizes = [8, 64], strides = [1, 1]} : vector<8x192xf32> to vector<8x64xf32>
    %321 = arith.mulf %320, %317 : vector<8x64xf32>
    %322 = arith.addf %319, %321 : vector<8x64xf32>
    %323 = vector.extract_strided_slice %315 {offsets = [0, 128], sizes = [8, 64], strides = [1, 1]} : vector<8x192xf32> to vector<8x64xf32>
    %324 = math.tanh %322 : vector<8x64xf32>
    %325 = arith.mulf %323, %324 : vector<8x64xf32>
    %c112_94 = arith.constant 112 : index
    %c0_95 = arith.constant 0 : index
    %326 = vector.load %arg6[%c112_94, %c0_95] : memref<128x64xf32, #tpu.memory_space<vmem>>, vector<8x64xf32>
    tpu.vector_store %arg6[%c112_94, %c0_95], %325 {strides = array<i32>} : memref<128x64xf32, #tpu.memory_space<vmem>>, vector<8x64xf32>,
    %c120 = arith.constant 120 : index
    %c0_96 = arith.constant 0 : index
    %327 = vector.load %arg5[%c120, %c0_96] : memref<128x256xf32, #tpu.memory_space<vmem>>, vector<8x256xf32>
    %cst_97 = arith.constant dense<0.000000e+00> : vector<8x256xf32>
    %328 = tpu.matmul %325, %24, %cst_97 {dimension_numbers = #tpu.dot_dimension_numbers<[1], [0], [0], [1], [0, 0, 1, 1], [], []>} : vector<8x64xf32>, vector<64x256xf32>, vector<8x256xf32> -> vector<8x256xf32>
    %329 = arith.addf %327, %328 : vector<8x256xf32>
    %330 = vector.extract_strided_slice %329 {offsets = [0, 0], sizes = [8, 192], strides = [1, 1]} : vector<8x256xf32> to vector<8x192xf32>
    %331 = arith.negf %330 : vector<8x192xf32>
    %332 = math.exp %331 : vector<8x192xf32>
    %cst_98 = arith.constant 1.000000e+00 : f32
    %333 = vector.broadcast %cst_98 : f32 to vector<8x192xf32>
    %334 = arith.addf %333, %332 : vector<8x192xf32>
    %335 = arith.divf %333, %334 : vector<8x192xf32>
    %336 = vector.extract_strided_slice %329 {offsets = [0, 192], sizes = [8, 64], strides = [1, 1]} : vector<8x256xf32> to vector<8x64xf32>
    %337 = math.tanh %336 : vector<8x64xf32>
    %338 = vector.extract_strided_slice %335 {offsets = [0, 64], sizes = [8, 64], strides = [1, 1]} : vector<8x192xf32> to vector<8x64xf32>
    %339 = arith.mulf %338, %322 : vector<8x64xf32>
    %340 = vector.extract_strided_slice %335 {offsets = [0, 0], sizes = [8, 64], strides = [1, 1]} : vector<8x192xf32> to vector<8x64xf32>
    %341 = arith.mulf %340, %337 : vector<8x64xf32>
    %342 = arith.addf %339, %341 : vector<8x64xf32>
    %343 = vector.extract_strided_slice %335 {offsets = [0, 128], sizes = [8, 64], strides = [1, 1]} : vector<8x192xf32> to vector<8x64xf32>
    %344 = math.tanh %342 : vector<8x64xf32>
    %345 = arith.mulf %343, %344 : vector<8x64xf32>
    %c120_99 = arith.constant 120 : index
    %c0_100 = arith.constant 0 : index
    %346 = vector.load %arg6[%c120_99, %c0_100] : memref<128x64xf32, #tpu.memory_space<vmem>>, vector<8x64xf32>
    tpu.vector_store %arg6[%c120_99, %c0_100], %345 {strides = array<i32>} : memref<128x64xf32, #tpu.memory_space<vmem>>, vector<8x64xf32>,
    %cst_101 = arith.constant 0.000000e+00 : f32
    %347 = vector.broadcast %cst_101 : f32 to vector<160x64xf32>
    %c0_102 = arith.constant 0 : index
    %c0_103 = arith.constant 0 : index
    %348 = vector.load %arg7[%c0_102, %c0_103] : memref<160x64xf32, #tpu.memory_space<vmem>>, vector<160x64xf32>
    tpu.vector_store %arg7[%c0_102, %c0_103], %347 {strides = array<i32>} : memref<160x64xf32, #tpu.memory_space<vmem>>, vector<160x64xf32>,
    %c0_104 = arith.constant 0 : index
    %c0_105 = arith.constant 0 : index
    %349 = vector.load %arg6[%c0_104, %c0_105] : memref<128x64xf32, #tpu.memory_space<vmem>>, vector<128x64xf32>
    %c120_106 = arith.constant 120 : index
    %c0_107 = arith.constant 0 : index
    %350 = vector.load %arg6[%c120_106, %c0_107] : memref<128x64xf32, #tpu.memory_space<vmem>>, vector<8x64xf32>
    %c112_108 = arith.constant 112 : index
    %c0_109 = arith.constant 0 : index
    %351 = vector.load %arg6[%c112_108, %c0_109] : memref<128x64xf32, #tpu.memory_space<vmem>>, vector<8x64xf32>
    %c104_110 = arith.constant 104 : index
    %c0_111 = arith.constant 0 : index
    %352 = vector.load %arg6[%c104_110, %c0_111] : memref<128x64xf32, #tpu.memory_space<vmem>>, vector<8x64xf32>
    %c96_112 = arith.constant 96 : index
    %c0_113 = arith.constant 0 : index
    %353 = vector.load %arg6[%c96_112, %c0_113] : memref<128x64xf32, #tpu.memory_space<vmem>>, vector<8x64xf32>
    %c88_114 = arith.constant 88 : index
    %c0_115 = arith.constant 0 : index
    %354 = vector.load %arg6[%c88_114, %c0_115] : memref<128x64xf32, #tpu.memory_space<vmem>>, vector<8x64xf32>
    %c80_116 = arith.constant 80 : index
    %c0_117 = arith.constant 0 : index
    %355 = vector.load %arg6[%c80_116, %c0_117] : memref<128x64xf32, #tpu.memory_space<vmem>>, vector<8x64xf32>
    %c72_118 = arith.constant 72 : index
    %c0_119 = arith.constant 0 : index
    %356 = vector.load %arg6[%c72_118, %c0_119] : memref<128x64xf32, #tpu.memory_space<vmem>>, vector<8x64xf32>
    %c64_120 = arith.constant 64 : index
    %c0_121 = arith.constant 0 : index
    %357 = vector.load %arg6[%c64_120, %c0_121] : memref<128x64xf32, #tpu.memory_space<vmem>>, vector<8x64xf32>
    %c56_122 = arith.constant 56 : index
    %c0_123 = arith.constant 0 : index
    %358 = vector.load %arg6[%c56_122, %c0_123] : memref<128x64xf32, #tpu.memory_space<vmem>>, vector<8x64xf32>
    %c48_124 = arith.constant 48 : index
    %c0_125 = arith.constant 0 : index
    %359 = vector.load %arg6[%c48_124, %c0_125] : memref<128x64xf32, #tpu.memory_space<vmem>>, vector<8x64xf32>
    %c40_126 = arith.constant 40 : index
    %c0_127 = arith.constant 0 : index
    %360 = vector.load %arg6[%c40_126, %c0_127] : memref<128x64xf32, #tpu.memory_space<vmem>>, vector<8x64xf32>
    %c32_128 = arith.constant 32 : index
    %c0_129 = arith.constant 0 : index
    %361 = vector.load %arg6[%c32_128, %c0_129] : memref<128x64xf32, #tpu.memory_space<vmem>>, vector<8x64xf32>
    %c24_130 = arith.constant 24 : index
    %c0_131 = arith.constant 0 : index
    %362 = vector.load %arg6[%c24_130, %c0_131] : memref<128x64xf32, #tpu.memory_space<vmem>>, vector<8x64xf32>
    %c16_132 = arith.constant 16 : index
    %c0_133 = arith.constant 0 : index
    %363 = vector.load %arg6[%c16_132, %c0_133] : memref<128x64xf32, #tpu.memory_space<vmem>>, vector<8x64xf32>
    %c8_134 = arith.constant 8 : index
    %c0_135 = arith.constant 0 : index
    %364 = vector.load %arg6[%c8_134, %c0_135] : memref<128x64xf32, #tpu.memory_space<vmem>>, vector<8x64xf32>
    %c0_136 = arith.constant 0 : index
    %c0_137 = arith.constant 0 : index
    %365 = vector.load %arg6[%c0_136, %c0_137] : memref<128x64xf32, #tpu.memory_space<vmem>>, vector<8x64xf32>
    %366 = tpu.concatenate %350, %351, %352, %353, %354, %355, %356, %357, %358, %359, %360, %361, %362, %363, %364, %365 in 0 : vector<8x64xf32>, vector<8x64xf32>, vector<8x64xf32>, vector<8x64xf32>, vector<8x64xf32>, vector<8x64xf32>, vector<8x64xf32>, vector<8x64xf32>, vector<8x64xf32>, vector<8x64xf32>, vector<8x64xf32>, vector<8x64xf32>, vector<8x64xf32>, vector<8x64xf32>, vector<8x64xf32>, vector<8x64xf32> -> vector<128x64xf32>
    %367 = tpu.iota {dimensions = array<i32: 1>} : vector<128x64xi32>
    %c32_i32 = arith.constant 32 : i32
    %368 = vector.broadcast %c32_i32 : i32 to vector<128x64xi32>
    %369 = arith.cmpi slt, %367, %368 : vector<128x64xi32>
    %370 = arith.select %369, %349, %366 : vector<128x64xi1>, vector<128x64xf32>
    %c16_138 = arith.constant 16 : index
    %c0_139 = arith.constant 0 : index
    %371 = vector.load %arg7[%c16_138, %c0_139] : memref<160x64xf32, #tpu.memory_space<vmem>>, vector<128x64xf32>
    tpu.vector_store %arg7[%c16_138, %c0_139], %370 {strides = array<i32>} : memref<160x64xf32, #tpu.memory_space<vmem>>, vector<128x64xf32>,
    %c0_140 = arith.constant 0 : index
    %c0_141 = arith.constant 0 : index
    %372 = vector.load %arg3[%c0_140, %c0_141] : memref<368x16xf32, #tpu.memory_space<vmem>>, vector<320x16xf32>
    %c320 = arith.constant 320 : index
    %c0_142 = arith.constant 0 : index
    %373 = vector.load %arg3[%c320, %c0_142] : memref<368x16xf32, #tpu.memory_space<vmem>>, vector<1x16xf32>
    %c0_143 = arith.constant 0 : index
    %c0_144 = arith.constant 0 : index
    %374 = vector.load %arg7[%c0_143, %c0_144] : memref<160x64xf32, #tpu.memory_space<vmem>>, vector<128x64xf32>
    %c8_145 = arith.constant 8 : index
    %c0_146 = arith.constant 0 : index
    %375 = vector.load %arg7[%c8_145, %c0_146] : memref<160x64xf32, #tpu.memory_space<vmem>>, vector<128x64xf32>
    %c16_147 = arith.constant 16 : index
    %c0_148 = arith.constant 0 : index
    %376 = vector.load %arg7[%c16_147, %c0_148] : memref<160x64xf32, #tpu.memory_space<vmem>>, vector<128x64xf32>
    %c24_149 = arith.constant 24 : index
    %c0_150 = arith.constant 0 : index
    %377 = vector.load %arg7[%c24_149, %c0_150] : memref<160x64xf32, #tpu.memory_space<vmem>>, vector<128x64xf32>
    %c32_151 = arith.constant 32 : index
    %c0_152 = arith.constant 0 : index
    %378 = vector.load %arg7[%c32_151, %c0_152] : memref<160x64xf32, #tpu.memory_space<vmem>>, vector<128x64xf32>
    %379 = tpu.concatenate %374, %375, %376, %377, %378 in 1 : vector<128x64xf32>, vector<128x64xf32>, vector<128x64xf32>, vector<128x64xf32>, vector<128x64xf32> -> vector<128x320xf32>
    %cst_153 = arith.constant dense<0.000000e+00> : vector<128x16xf32>
    %380 = tpu.matmul %379, %372, %cst_153 {dimension_numbers = #tpu.dot_dimension_numbers<[1], [0], [0], [1], [0, 0, 1, 1], [], []>} : vector<128x320xf32>, vector<320x16xf32>, vector<128x16xf32> -> vector<128x16xf32>
    %381 = vector.broadcast %373 : vector<1x16xf32> to vector<128x16xf32>
    %382 = arith.addf %380, %381 : vector<128x16xf32>
    %383 = math.tanh %382 : vector<128x16xf32>
    %384 = vector.extract_strided_slice %383 {offsets = [0, 0], sizes = [64, 16], strides = [1, 1]} : vector<128x16xf32> to vector<64x16xf32>
    %385 = vector.extract_strided_slice %383 {offsets = [64, 0], sizes = [64, 16], strides = [1, 1]} : vector<128x16xf32> to vector<64x16xf32>
    %386 = arith.maximumf %384, %385 : vector<64x16xf32>
    %387 = vector.extract_strided_slice %386 {offsets = [0, 0], sizes = [32, 16], strides = [1, 1]} : vector<64x16xf32> to vector<32x16xf32>
    %388 = vector.extract_strided_slice %386 {offsets = [32, 0], sizes = [32, 16], strides = [1, 1]} : vector<64x16xf32> to vector<32x16xf32>
    %389 = arith.maximumf %387, %388 : vector<32x16xf32>
    %390 = vector.extract_strided_slice %389 {offsets = [0, 0], sizes = [16, 16], strides = [1, 1]} : vector<32x16xf32> to vector<16x16xf32>
    %391 = vector.extract_strided_slice %389 {offsets = [16, 0], sizes = [16, 16], strides = [1, 1]} : vector<32x16xf32> to vector<16x16xf32>
    %392 = arith.maximumf %390, %391 : vector<16x16xf32>
    %393 = vector.extract_strided_slice %392 {offsets = [0, 0], sizes = [8, 16], strides = [1, 1]} : vector<16x16xf32> to vector<8x16xf32>
    %394 = vector.extract_strided_slice %392 {offsets = [8, 0], sizes = [8, 16], strides = [1, 1]} : vector<16x16xf32> to vector<8x16xf32>
    %395 = arith.maximumf %393, %394 : vector<8x16xf32>
    %c328 = arith.constant 328 : index
    %c0_154 = arith.constant 0 : index
    %396 = vector.load %arg3[%c328, %c0_154] : memref<368x16xf32, #tpu.memory_space<vmem>>, vector<16x8xf32>
    %c344 = arith.constant 344 : index
    %c0_155 = arith.constant 0 : index
    %397 = vector.load %arg3[%c344, %c0_155] : memref<368x16xf32, #tpu.memory_space<vmem>>, vector<1x8xf32>
    %c352 = arith.constant 352 : index
    %c0_156 = arith.constant 0 : index
    %398 = vector.load %arg3[%c352, %c0_156] : memref<368x16xf32, #tpu.memory_space<vmem>>, vector<8x5xf32>
    %c360 = arith.constant 360 : index
    %c0_157 = arith.constant 0 : index
    %399 = vector.load %arg3[%c360, %c0_157] : memref<368x16xf32, #tpu.memory_space<vmem>>, vector<1x5xf32>
    %cst_158 = arith.constant 0.000000e+00 : f32
    %400 = vector.broadcast %cst_158 : f32 to vector<8x16xf32>
    %401 = arith.maximumf %395, %400 : vector<8x16xf32>
    %cst_159 = arith.constant dense<0.000000e+00> : vector<8x8xf32>
    %402 = tpu.matmul %401, %396, %cst_159 {dimension_numbers = #tpu.dot_dimension_numbers<[1], [0], [0], [1], [0, 0, 1, 1], [], []>} : vector<8x16xf32>, vector<16x8xf32>, vector<8x8xf32> -> vector<8x8xf32>
    %403 = vector.broadcast %397 : vector<1x8xf32> to vector<8x8xf32>
    %404 = arith.addf %402, %403 : vector<8x8xf32>
    %cst_160 = arith.constant 0.000000e+00 : f32
    %405 = vector.broadcast %cst_160 : f32 to vector<8x8xf32>
    %406 = arith.maximumf %404, %405 : vector<8x8xf32>
    %cst_161 = arith.constant dense<0.000000e+00> : vector<8x5xf32>
    %407 = tpu.matmul %406, %398, %cst_161 {dimension_numbers = #tpu.dot_dimension_numbers<[1], [0], [0], [1], [0, 0, 1, 1], [], []>} : vector<8x8xf32>, vector<8x5xf32>, vector<8x5xf32> -> vector<8x5xf32>
    %408 = vector.broadcast %399 : vector<1x5xf32> to vector<8x5xf32>
    %409 = arith.addf %407, %408 : vector<8x5xf32>
    %c0_162 = arith.constant 0 : index
    %c0_163 = arith.constant 0 : index
    %410 = vector.load %arg4[%c0_162, %c0_163] : memref<8x5xf32, #tpu.memory_space<vmem>>, vector<8x5xf32>
    tpu.vector_store %arg4[%c0_162, %c0_163], %409 {strides = array<i32>} : memref<8x5xf32, #tpu.memory_space<vmem>>, vector<8x5xf32>,
    return
  }
}

</mosaic_0001>

<bundles_post_ra>
// kernel: lstm_cnn_forward.1
= control target key start
LH: loop header
LB: loop body
LE: loop exit
PB: predicated region body
PF: predicated region fallthrough
CT: control target
= control target key end

     0   :  { %v3630_v0 = vmov 0   ;;  %v3631_v4 = vmov 1   ;;  %vm139_vm0 = vcmask 523264   ;;  %v3632_v26 = vmov 0.0   ;;  %s3633_s19 = smov 64   ;;  %s5162_s0 = inlined_call_operand.vmem [shape: s32[128,2], index: 0, kind: input, shape index: {}]   ;;  %s5163_s1 = inlined_call_operand.vmem [shape: f32[64,32], index: 1, kind: input, shape index: {}]   ;;  %s5164_s2 = inlined_call_operand.vmem [shape: f32[136,256], index: 2, kind: input, shape index: {}]   ;;  %s5165_s3 = inlined_call_operand.vmem [shape: f32[368,16], index: 3, kind: input, shape index: {}]   ;;  %s5166_s4 = inlined_call_operand.vmem [shape: f32[8,5], index: 4, kind: output, shape index: {}]  }
   0x1   :  { %3359 = vset.pattern.permute.xlu1 %v3630_v0  ;;  %3358 = vset.pattern.permute.xlu0 %v3630_v0  ;;  %v34_v1 = vld [vmem:[%s5162_s0 + $0x78] sm:$0xff]  ;;  %v32_v2 = vld [vmem:[%s5162_s0 + $0x68] sm:$0xff]  ;;  %v33_v5 = vld [vmem:[%s5162_s0 + $0x70] sm:$0xff]  ;;  %2586 = vst.msk [vmem:[#allocation4] sm:$0xff] %vm139_vm0, %v3632_v26  ;;  %v17_v29 = vlaneseq }
   0x2   :  { %81 = vperm.xlu1 %3359, %v34_v1   ;;  %75 = vperm.xlu0 %3358, %v32_v2   ;;  %v20_v3 = vld [vmem:[%s5162_s0 + $0x8] sm:$0xff]  ;;  %v19_v6 = vld [vmem:[%s5162_s0] sm:$0xff]  ;;  %v21_v7 = vld [vmem:[%s5162_s0 + $0x10] sm:$0xff]  ;;  %2587 = vst.msk [vmem:[#allocation4 + $0x8] sm:$0xff] %vm139_vm0, %v3632_v26 }
   0x3   :  { %3361 = vset.pattern.permute.xlu2 %v3631_v4  ;;  %v23_v8 = vld [vmem:[%s5162_s0 + $0x20] sm:$0xff]  ;;  %v22_v9 = vld [vmem:[%s5162_s0 + $0x18] sm:$0xff]  ;;  %v24_v10 = vld [vmem:[%s5162_s0 + $0x28] sm:$0xff]  ;;  %2588 = vst.msk [vmem:[#allocation4 + $0x10] sm:$0xff] %vm139_vm0, %v3632_v26  ;;  %v3775_v31 = vand.u32 127, %v17_v29 }
   0x4   :  { %257 = vperm.xlu2 %3361, %v20_v3   ;;  %v25_v11 = vld [vmem:[%s5162_s0 + $0x30] sm:$0xff]  ;;  %v27_v12 = vld [vmem:[%s5162_s0 + $0x40] sm:$0xff]  ;;  %v26_v13 = vld [vmem:[%s5162_s0 + $0x38] sm:$0xff]  ;;  %2589 = vst.msk [vmem:[#allocation4 + $0x18] sm:$0xff] %vm139_vm0, %v3632_v26 }
   0x5   :  { %v28_v14 = vld [vmem:[%s5162_s0 + $0x48] sm:$0xff]  ;;  %v30_v15 = vld [vmem:[%s5162_s0 + $0x58] sm:$0xff]  ;;  %v29_v16 = vld [vmem:[%s5162_s0 + $0x50] sm:$0xff]  ;;  %2590 = vst.msk [vmem:[#allocation4 + $0x20] sm:$0xff] %vm139_vm0, %v3632_v26 }
   0x6   :  { %v138_v17 = vld [vmem:[%s5163_s1 + $0x38] sm:$0xff]  ;;  %v137_v18 = vld [vmem:[%s5163_s1 + $0x30] sm:$0xff]  ;;  %v136_v19 = vld [vmem:[%s5163_s1 + $0x28] sm:$0xff]  ;;  %2591 = vst.msk [vmem:[#allocation4 + $0x28] sm:$0xff] %vm139_vm0, %v3632_v26 }
   0x7   :  { %3338 = vmatpush.msra.mxu1 %v138_v17  ;;  %196 = vmatpush.msra.mxu0 %v138_v17  ;;  %v31_v20 = vld [vmem:[%s5162_s0 + $0x60] sm:$0xff]  ;;  %v134_v22 = vld [vmem:[%s5163_s1 + $0x18] sm:$0xff]  ;;  %v133_v23 = vld [vmem:[%s5163_s1 + $0x10] sm:$0xff]  ;;  %2592 = vst.msk [vmem:[#allocation4 + $0x30] sm:$0xff] %vm139_vm0, %v3632_v26 }
   0x8   :  { %v135_v21 = vld [vmem:[%s5163_s1 + $0x20] sm:$0xff]  ;;  %v132_v24 = vld [vmem:[%s5163_s1 + $0x8] sm:$0xff]  ;;  %2593 = vst.msk [vmem:[#allocation4 + $0x38] sm:$0xff] %vm139_vm0, %v3632_v26 }
   0x9   :  { %3339 = vmatpush.msra.mxu1 %v137_v18  ;;  %197 = vmatpush.msra.mxu0 %v137_v18  ;;  %v131_v25 = vld [vmem:[%s5163_s1] sm:$0xff]  ;;  %2594 = vst.msk [vmem:[#allocation4 + $0x40] sm:$0xff] %vm139_vm0, %v3632_v26 }
   0xa   :  { %3360 = vset.pattern.permute.xlu1 %v3631_v4  ;;  %78 = vperm.xlu0 %3358, %v33_v5   ;;  %2595 = vst.msk [vmem:[#allocation4 + $0x48] sm:$0xff] %vm139_vm0, %v3632_v26 }
   0xb   :  { %254 = vperm.xlu1 %3360, %v19_v6   ;;  %3340 = vmatpush.msra.mxu1 %v136_v19  ;;  %2596 = vst.msk [vmem:[#allocation4 + $0x50] sm:$0xff] %vm139_vm0, %v3632_v26 }
   0xc   :  { %260 = vperm.xlu2 %3361, %v21_v7   ;;  %198 = vmatpush.msra.mxu0 %v136_v19  ;;  %2597 = vst.msk [vmem:[#allocation4 + $0x58] sm:$0xff] %vm139_vm0, %v3632_v26 }
   0xd   :  { %3341 = vmatpush.msra.mxu1 %v135_v21  ;;  %2598 = vst.msk [vmem:[#allocation4 + $0x60] sm:$0xff] %vm139_vm0, %v3632_v26 }
   0xe   :  { %199 = vmatpush.msra.mxu0 %v135_v21  ;;  %2599 = vst.msk [vmem:[#allocation4 + $0x68] sm:$0xff] %vm139_vm0, %v3632_v26 }
   0xf   :  { %3342 = vmatpush.msra.mxu1 %v134_v22  ;;  %2600 = vst.msk [vmem:[#allocation4 + $0x70] sm:$0xff] %vm139_vm0, %v3632_v26 }
  0x10   :  { %200 = vmatpush.msra.mxu0 %v134_v22  ;;  %2601 = vst.msk [vmem:[#allocation4 + $0x78] sm:$0xff] %vm139_vm0, %v3632_v26 }
  0x11   :  { %3343 = vmatpush.msra.mxu1 %v133_v23  ;;  %2602 = vst.msk [vmem:[#allocation4 + $0x80] sm:$0xff] %vm139_vm0, %v3632_v26 }
  0x12   :  { %3362 = vset.pattern.permute.xlu0 %v3631_v4  ;;  %201 = vmatpush.msra.mxu0 %v133_v23  ;;  %2603 = vst.msk [vmem:[#allocation4 + $0x88] sm:$0xff] %vm139_vm0, %v3632_v26 }
  0x13   :  { %266 = vperm.xlu1 %3360, %v23_v8   ;;  %263 = vperm.xlu0 %3362, %v22_v9   ;;  %2604 = vst.msk [vmem:[#allocation4 + $0x90] sm:$0xff] %vm139_vm0, %v3632_v26 }
  0x14   :  { %269 = vperm.xlu2 %3361, %v24_v10   ;;  %3344 = vmatpush.msra.mxu1 %v132_v24  ;;  %2605 = vst.msk [vmem:[#allocation4 + $0x98] sm:$0xff] %vm139_vm0, %v3632_v26 }
  0x15   :  { %202 = vmatpush.msra.mxu0 %v132_v24 }
  0x16   :  { %3345 = vmatpush.msra.mxu1 %v131_v25 }
  0x17   :  { %203 = vmatpush.msra.mxu0 %v131_v25 }
  0x18   :  { %405 = vmatpush.msrb.mxu1 %v138_v17 }
  0x1a   :  { %406 = vmatpush.msrb.mxu1 %v137_v18 }
  0x1b   :  { %272 = vperm.xlu1 %3360, %v25_v11   ;;  %278 = vperm.xlu0 %3362, %v27_v12  }
  0x1c   :  { %275 = vperm.xlu2 %3361, %v26_v13   ;;  %407 = vmatpush.msrb.mxu1 %v136_v19 }
  0x1e   :  { %408 = vmatpush.msrb.mxu1 %v135_v21  ;;  %v472_v21 = vld [vmem:[%s5164_s2 + $0x50] sm:$0xff] }
  0x20   :  { %409 = vmatpush.msrb.mxu1 %v134_v22 }
  0x22   :  { %410 = vmatpush.msrb.mxu1 %v133_v23  ;;  %v470_v23 = vld [vmem:[%s5164_s2 + $0x40] sm:$0xff] }
  0x23   :  { %281 = vperm.xlu1 %3360, %v28_v14   ;;  %287 = vperm.xlu0 %3362, %v30_v15  }
  0x24   :  { %284 = vperm.xlu2 %3361, %v29_v16   ;;  %411 = vmatpush.msrb.mxu1 %v132_v24 }
  0x26   :  { %412 = vmatpush.msrb.mxu1 %v131_v25 }
  0x2b   :  { %290 = vperm.xlu1 %3360, %v31_v20   ;;  %296 = vperm.xlu0 %3362, %v33_v5  }
  0x2c   :  { %293 = vperm.xlu2 %3361, %v32_v2  }
  0x33   :  { %299 = vperm.xlu1 %3360, %v34_v1   ;;  %3364 = vset.pattern.permute.xlu0 %v3630_v0  ;;  %v476_v1 = vld [vmem:[%s5164_s2 + $0x70] sm:$0xff] }
  0x34   :  { %39 = vperm.xlu0 %3364, %v20_v3   ;;  %3363 = vset.pattern.permute.xlu2 %v3630_v0 }
  0x35   :  { %36 = vperm.xlu2 %3363, %v19_v6   ;;  %3346 = vmatpush.msra.mxu2 %v476_v1 }
  0x3b   :  { %3365 = vset.pattern.permute.xlu1 %v3630_v0 }
  0x3c   :  { %42 = vperm.xlu1 %3365, %v21_v7   ;;  %54 = vperm.xlu0 %3364, %v25_v11  }
  0x3d   :  { %45 = vperm.xlu2 %3363, %v22_v9  }
  0x44   :  { %48 = vperm.xlu1 %3365, %v23_v8   ;;  %63 = vperm.xlu0 %3364, %v28_v14   ;;  %v474_v14 = vld [vmem:[%s5164_s2 + $0x60] sm:$0xff] }
  0x45   :  { %51 = vperm.xlu2 %3363, %v24_v10   ;;  %3347 = vmatpush.msra.mxu2 %v474_v14 }
  0x47   :  { %3348 = vmatpush.msra.mxu2 %v472_v21 }
  0x49   :  { %3349 = vmatpush.msra.mxu2 %v470_v23 }
  0x4c   :  { %57 = vperm.xlu1 %3365, %v26_v13   ;;  %72 = vperm.xlu0 %3364, %v31_v20  }
  0x4d   :  { %60 = vperm.xlu2 %3363, %v27_v12  }
  0x54   :  { %66 = vperm.xlu1 %3365, %v29_v16   ;;  %3376 = vset.pattern.permute.xlu0 %v3631_v4 }
  0x55   :  { %69 = vperm.xlu2 %3363, %v30_v15  }
  0x5e   :  { %v258_v27 = vpop.permute.xlu2 %257 }
  0x5f   :  { %vm302_vm6 = vcmp.eq.s32.totalorder %v3775_v31, %v258_v27 }
  0x60   :  { %v3162_v49 = vsel %vm302_vm6, 1.0, %v3632_v26 }
  0x66   :  { %v261_v28 = vpop.permute.xlu2 %260 }
  0x67   :  { %vm303_vm7 = vcmp.eq.s32.totalorder %v3775_v31, %v261_v28 }
  0x68   :  { %v3163_v53 = vsel %vm303_vm7, 1.0, %v3632_v26 }
  0x6e   :  { %v270_v30 = vpop.permute.xlu2 %269 }
  0x6f   :  { %vm306_vm12 = vcmp.eq.s32.totalorder %v3775_v31, %v270_v30 }
  0x70   :  { %v3166_v63 = vsel %vm306_vm12, 1.0, %v3632_v26 }
  0x74   :  { %v76_v32 = vpop.permute.xlu0 %75  ;;  %v82_v33 = vpop.permute.xlu1 %81 }
  0x75   :  { %vm96_vm1 = vcmp.eq.s32.totalorder %v3775_v31, %v76_v32  ;;  %vm98_vm3 = vcmp.eq.s32.totalorder %v3775_v31, %v82_v33 }
  0x76   :  { %v3142_v34 = vsel %vm96_vm1, 1.0, %v3632_v26  ;;  %v3779_v35 = vpop.permute.xlu2 %275  ;;  %v3144_v40 = vsel %vm98_vm3, 1.0, %v3632_v26 }
  0x77   :  { %3158 = vmatmul.msk.f32.vlgmr.msra.gmra.mxu1 %vm139_vm0, %v3142_v34  ;;  %vm308_vm1 = vcmp.eq.s32.totalorder %v3775_v31, %v3779_v35  ;;  %v477_v35 = vld [vmem:[%s5164_s2 + $0x78] sm:$0xff] }
  0x78   :  { %541 = vmatpush.msra.mxu1 %v476_v1  ;;  %v3168_v6 = vsel %vm308_vm1, 1.0, %v3632_v26  ;;  %3350 = vmatpush.msra.mxu3 %v477_v35  ;;  %v4003_v1 = vld [vmem:[%s5164_s2 + $0xf0] sm:$0xff] }
  0x79   :  { %935 = vmatpush.msrb.mxu0 %v4003_v1 }
  0x7a   :  { %542 = vmatpush.msra.mxu1 %v474_v14  ;;  %v4072_v14 = vld [vmem:[%s5164_s2 + $0x90] sm:$0xff] }
  0x7c   :  { %v79_v36 = vpop.permute.xlu0 %78  ;;  %543 = vmatpush.msra.mxu1 %v472_v21 }
  0x7d   :  { %vm97_vm2 = vcmp.eq.s32.totalorder %v3775_v31, %v79_v36  ;;  %v255_v37 = vpop.permute.xlu1 %254 }
  0x7e   :  { %v3143_v38 = vsel %vm97_vm2, 1.0, %v3632_v26  ;;  %v3784_v39 = vpop.permute.xlu2 %284  ;;  %vm301_vm4 = vcmp.eq.s32.totalorder %v3775_v31, %v255_v37  ;;  %544 = vmatpush.msra.mxu1 %v470_v23  ;;  %v475_v37 = vld [vmem:[%s5164_s2 + $0x68] sm:$0xff] }
  0x7f   :  { %3159 = vmatmul.msk.f32.gmra.mxu1 %vm139_vm0, %v3143_v38  ;;  %v3161_v44 = vsel %vm301_vm4, 1.0, %v3632_v26  ;;  %vm311_vm7 = vcmp.eq.s32.totalorder %v3775_v31, %v3784_v39  ;;  %v473_v38 = vld [vmem:[%s5164_s2 + $0x58] sm:$0xff]  ;;  %3351 = vmatpush.msra.mxu3 %v475_v37  ;;  %v471_v39 = vld [vmem:[%s5164_s2 + $0x48] sm:$0xff] }
  0x80   :  { %v3171_v16 = vsel %vm311_vm7, 1.0, %v3632_v26 }
  0x81   :  { %3352 = vmatpush.msra.mxu3 %v473_v38 }
  0x83   :  { %3353 = vmatpush.msra.mxu3 %v471_v39 }
  0x85   :  { %v267_v41 = vpop.permute.xlu1 %266  ;;  %v264_v42 = vpop.permute.xlu0 %263 }
  0x86   :  { %v3790_v43 = vpop.permute.xlu2 %293  ;;  %vm304_vm8 = vcmp.eq.s32.totalorder %v3775_v31, %v264_v42  ;;  %vm305_vm10 = vcmp.eq.s32.totalorder %v3775_v31, %v267_v41  ;;  %v469_v41 = vld [vmem:[%s5164_s2 + $0x38] sm:$0xff] }
  0x87   :  { %3160 = vmatmul.msk.f32.gmra.mxu1 %vm139_vm0, %v3144_v40  ;;  %v3164_v55 = vsel %vm304_vm8, 1.0, %v3632_v26  ;;  %v3165_v59 = vsel %vm305_vm10, 1.0, %v3632_v26  ;;  %784 = vmatpush.msrb.mxu3 %v469_v41 }
  0x8d   :  { %v273_v45 = vpop.permute.xlu1 %272  ;;  %v279_v46 = vpop.permute.xlu0 %278 }
  0x8e   :  { %vm307_vm14 = vcmp.eq.s32.totalorder %v3775_v31, %v273_v45  ;;  %vm309_vm3 = vcmp.eq.s32.totalorder %v3775_v31, %v279_v46  ;;  %v467_v45 = vld [vmem:[%s5164_s2 + $0x28] sm:$0xff] }
  0x8f   :  { %3177 = vmatmul.msk.f32.vlgmr.msrb.gmra.mxu1 %vm139_vm0, %v3161_v44  ;;  %v37_v47 = vpop.permute.xlu2 %36  ;;  %v3167_v3 = vsel %vm307_vm14, 1.0, %v3632_v26  ;;  %v3169_v9 = vsel %vm309_vm3, 1.0, %v3632_v26  ;;  %785 = vmatpush.msrb.mxu3 %v467_v45 }
  0x90   :  { %vm83_vm5 = vcmp.eq.s32.totalorder %v3775_v31, %v37_v47  ;;  %606 = vmatpush.msrb.mxu1 %v477_v35 }
  0x91   :  { %v3129_v48 = vsel %vm83_vm5, 1.0, %v3632_v26 }
  0x92   :  { %3145 = vmatmul.msk.f32.vlgmr.msra.gmra.mxu0 %vm139_vm0, %v3129_v48  ;;  %607 = vmatpush.msrb.mxu1 %v475_v37 }
  0x94   :  { %608 = vmatpush.msrb.mxu1 %v473_v38 }
  0x95   :  { %v282_v50 = vpop.permute.xlu1 %281  ;;  %v3800_v51 = vpop.permute.xlu0 %287 }
  0x96   :  { %vm310_vm5 = vcmp.eq.s32.totalorder %v3775_v31, %v282_v50  ;;  %609 = vmatpush.msrb.mxu1 %v471_v39 }
  0x97   :  { %3178 = vmatmul.msk.f32.gmra.mxu1 %vm139_vm0, %v3162_v49  ;;  %v46_v62 = vpop.permute.xlu2 %45  ;;  %v3170_v12 = vsel %vm310_vm5, 1.0, %v3632_v26  ;;  %v465_v49 = vld [vmem:[%s5164_s2 + $0x18] sm:$0xff] }
  0x98   :  { %vm86_vm13 = vcmp.eq.s32.totalorder %v3775_v31, %v46_v62  ;;  %786 = vmatpush.msrb.mxu3 %v465_v49  ;;  %v468_v62 = vld [vmem:[%s5164_s2 + $0x30] sm:$0xff] }
  0x99   :  { %v3132_v0 = vsel %vm86_vm13, 1.0, %v3632_v26  ;;  %vm314_vm13 = vcmp.eq.s32.totalorder %v3775_v31, %v3790_v43  ;;  %719 = vmatpush.msrb.mxu2 %v468_v62 }
  0x9a   :  { %v3174_v29 = vsel %vm314_vm13, 1.0, %v3632_v26 }
  0x9d   :  { %v3804_v52 = vpop.permute.xlu1 %290  ;;  %v3807_v54 = vpop.permute.xlu0 %296 }
  0x9f   :  { %3179 = vmatmul.msk.f32.gmra.mxu1 %vm139_vm0, %v3163_v53  ;;  %v52_v5 = vpop.permute.xlu2 %51 }
  0xa0   :  { %vm88_vm2 = vcmp.eq.s32.totalorder %v3775_v31, %v52_v5  ;;  %v462_v5 = vld [vmem:[%s5164_s2] sm:$0xff] }
  0xa1   :  { %v3134_v7 = vsel %vm88_vm2, 1.0, %v3632_v26  ;;  %vm480_vm2 = vcmask 261120  }
  0xa5   :  { %v3812_v56 = vpop.permute.xlu1 %299 }
  0xa6   :  { %v40_v57 = vpop.permute.xlu0 %39  ;;  %vm316_vm1 = vcmp.eq.s32.totalorder %v3775_v31, %v3812_v56  ;;  %v3959_v56 = vld [vmem:[%s5164_s2 + $0xf8] sm:$0xff] }
  0xa7   :  { %3180 = vmatmul.msk.f32.gmra.mxu1 %vm139_vm0, %v3164_v55  ;;  %vm84_vm9 = vcmp.eq.s32.totalorder %v3775_v31, %v40_v57  ;;  %v61_v15 = vpop.permute.xlu2 %60  ;;  %v3176_v36 = vsel %vm316_vm1, 1.0, %v3632_v26  ;;  %v463_v55 = vld [vmem:[%s5164_s2 + $0x8] sm:$0xff] }
  0xa8   :  { %v3130_v58 = vsel %vm84_vm9, 1.0, %v3632_v26  ;;  %vm91_vm8 = vcmp.eq.s32.totalorder %v3775_v31, %v61_v15  ;;  %vm312_vm9 = vcmp.eq.s32.totalorder %v3775_v31, %v3800_v51  ;;  %v3964_v57 = vld [vmem:[%s5164_s2 + $0xe8] sm:$0xff]  ;;  %787 = vmatpush.msrb.mxu3 %v463_v55 }
  0xa9   :  { %3146 = vmatmul.msk.f32.gmra.mxu0 %vm139_vm0, %v3130_v58  ;;  %v3137_v17 = vsel %vm91_vm8, 1.0, %v3632_v26  ;;  %v3172_v19 = vsel %vm312_vm9, 1.0, %v3632_v26 }
  0xae   :  { %v43_v60 = vpop.permute.xlu1 %42  ;;  %v55_v8 = vpop.permute.xlu0 %54 }
  0xaf   :  { %3181 = vmatmul.msk.f32.gmra.mxu1 %vm139_vm0, %v3165_v59  ;;  %vm85_vm11 = vcmp.eq.s32.totalorder %v3775_v31, %v43_v60  ;;  %vm89_vm4 = vcmp.eq.s32.totalorder %v3775_v31, %v55_v8  ;;  %v70_v27 = vpop.permute.xlu2 %69  ;;  %v3975_v59 = vld [vmem:[%s5164_s2 + $0xd8] sm:$0xff]  ;;  %v3980_v60 = vld [vmem:[%s5164_s2 + $0xc8] sm:$0xff]  ;;  %v4037_v8 = vld [vmem:[%s5164_s2 + $0xc0] sm:$0xff] }
  0xb0   :  { %v3131_v61 = vsel %vm85_vm11, 1.0, %v3632_v26  ;;  %v3135_v10 = vsel %vm89_vm4, 1.0, %v3632_v26  ;;  %vm313_vm11 = vcmp.eq.s32.totalorder %v3775_v31, %v3804_v52  ;;  %vm94_vm14 = vcmp.eq.s32.totalorder %v3775_v31, %v70_v27 }
  0xb1   :  { %3147 = vmatmul.msk.f32.gmra.mxu0 %vm139_vm0, %v3131_v61  ;;  %v3173_v24 = vsel %vm313_vm11, 1.0, %v3632_v26  ;;  %v3140_v30 = vsel %vm94_vm14, 1.0, %v3632_v26 }
  0xb6   :  { %v49_v2 = vpop.permute.xlu1 %48  ;;  %v64_v18 = vpop.permute.xlu0 %63 }
  0xb7   :  { %3182 = vmatmul.msk.f32.gmra.mxu1 %vm139_vm0, %v3166_v63  ;;  %vm87_vm15 = vcmp.eq.s32.totalorder %v3775_v31, %v49_v2  ;;  %vm92_vm10 = vcmp.eq.s32.totalorder %v3775_v31, %v64_v18  ;;  %v3994_v63 = vld [vmem:[%s5164_s2 + $0xb8] sm:$0xff]  ;;  %v4008_v2 = vld [vmem:[%s5164_s2 + $0xe0] sm:$0xff] }
  0xb8   :  { %v3133_v4 = vsel %vm87_vm15, 1.0, %v3632_v26  ;;  %v3138_v20 = vsel %vm92_vm10, 1.0, %v3632_v26  ;;  %vm315_vm15 = vcmp.eq.s32.totalorder %v3775_v31, %v3807_v54  ;;  %936 = vmatpush.msrb.mxu0 %v4008_v2 }
  0xb9   :  { %3148 = vmatmul.msk.f32.gmra.mxu0 %vm139_vm0, %v3132_v0  ;;  %v3175_v33 = vsel %vm315_vm15, 1.0, %v3632_v26  ;;  %v466_v0 = vld [vmem:[%s5164_s2 + $0x20] sm:$0xff] }
  0xba   :  { %720 = vmatpush.msrb.mxu2 %v466_v0 }
  0xbe   :  { %v58_v11 = vpop.permute.xlu1 %57  ;;  %v73_v51 = vpop.permute.xlu0 %72 }
  0xbf   :  { %3183 = vmatmul.msk.f32.gmra.mxu1 %vm139_vm0, %v3167_v3  ;;  %vm90_vm6 = vcmp.eq.s32.totalorder %v3775_v31, %v58_v11  ;;  %vm95_vm3 = vcmp.eq.s32.totalorder %v3775_v31, %v73_v51  ;;  %v464_v3 = vld [vmem:[%s5164_s2 + $0x10] sm:$0xff]  ;;  %v4054_v11 = vld [vmem:[%s5164_s2 + $0x88] sm:$0xff] }
  0xc0   :  { %v3136_v13 = vsel %vm90_vm6, 1.0, %v3632_v26  ;;  %v3141_v52 = vsel %vm95_vm3, 1.0, %v3632_v26  ;;  %721 = vmatpush.msrb.mxu2 %v464_v3 }
  0xc1   :  { %3149 = vmatmul.msk.f32.gmra.mxu0 %vm139_vm0, %v3133_v4  ;;  %v4017_v4 = vld [vmem:[%s5164_s2 + $0xa8] sm:$0xff] }
  0xc2   :  { %722 = vmatpush.msrb.mxu2 %v462_v5 }
  0xc6   :  { %v67_v22 = vpop.permute.xlu1 %66 }
  0xc7   :  { %3184 = vmatmul.msk.f32.gmra.mxu1 %vm139_vm0, %v3168_v6  ;;  %vm93_vm12 = vcmp.eq.s32.totalorder %v3775_v31, %v67_v22  ;;  %v4029_v6 = vld [vmem:[%s5164_s2 + $0xd0] sm:$0xff] }
  0xc8   :  { %v3139_v25 = vsel %vm93_vm12, 1.0, %v3632_v26  ;;  %937 = vmatpush.msrb.mxu0 %v4029_v6 }
  0xc9   :  { %3150 = vmatmul.msk.f32.gmra.mxu0 %vm139_vm0, %v3134_v7 }
  0xca   :  { %938 = vmatpush.msrb.mxu0 %v4037_v8 }
  0xcf   :  { %3185 = vmatmul.msk.f32.gmra.mxu1 %vm139_vm0, %v3169_v9  ;;  %v4042_v9 = vld [vmem:[%s5164_s2 + $0x98] sm:$0xff] }
  0xd1   :  { %3151 = vmatmul.msk.f32.gmra.mxu0 %vm139_vm0, %v3135_v10  ;;  %v4047_v10 = vld [vmem:[%s5164_s2 + $0xb0] sm:$0xff] }
  0xd2   :  { %939 = vmatpush.msrb.mxu0 %v4047_v10 }
  0xd7   :  { %3186 = vmatmul.msk.f32.gmra.mxu1 %vm139_vm0, %v3170_v12  ;;  %v4059_v12 = vld [vmem:[%s5164_s2 + $0xa0] sm:$0xff] }
  0xd8   :  { %940 = vmatpush.msrb.mxu0 %v4059_v12 }
  0xd9   :  { %3152 = vmatmul.msk.f32.gmra.mxu0 %vm139_vm0, %v3136_v13 }
  0xda   :  { %941 = vmatpush.msrb.mxu0 %v4072_v14 }
  0xdf   :  { %3187 = vmatmul.msk.f32.gmra.mxu1 %vm139_vm0, %v3171_v16  ;;  %v4083_v16 = vld [vmem:[%s5164_s2 + $0x80] sm:$0xff] }
  0xe0   :  { %942 = vmatpush.msrb.mxu0 %v4083_v16 }
  0xe1   :  { %3153 = vmatmul.msk.f32.gmra.mxu0 %vm139_vm0, %v3137_v17 }
  0xe2   :  { %1039 = vmatpush.msra.mxu0 %v4003_v1 }
  0xe4   :  { %1040 = vmatpush.msra.mxu0 %v4008_v2 }
  0xe6   :  { %1041 = vmatpush.msra.mxu0 %v4029_v6 }
  0xe7   :  { %3188 = vmatmul.msk.f32.gmra.mxu1 %vm139_vm0, %v3172_v19 }
  0xe8   :  { %1042 = vmatpush.msra.mxu0 %v4037_v8 }
  0xe9   :  { %3154 = vmatmul.msk.f32.gmra.mxu0 %vm139_vm0, %v3138_v20 }
  0xea   :  { %1043 = vmatpush.msra.mxu0 %v4047_v10 }
  0xec   :  { %1044 = vmatpush.msra.mxu0 %v4059_v12 }
  0xee   :  { %1045 = vmatpush.msra.mxu0 %v4072_v14 }
  0xef   :  { %3189 = vmatmul.msk.f32.gmra.mxu1 %vm139_vm0, %v3173_v24 }
  0xf0   :  { %1046 = vmatpush.msra.mxu0 %v4083_v16 }
  0xf1   :  { %3155 = vmatmul.msk.f32.gmra.mxu0 %vm139_vm0, %v3139_v25 }
  0xf4   :  { %v3891_v28 = vpop.f32.mrf.mxu1 }
  0xf7   :  { %3190 = vmatmul.msk.f32.gmra.mxu1 %vm139_vm0, %v3174_v29 }
  0xf9   :  { %3156 = vmatmul.msk.f32.gmra.mxu0 %vm139_vm0, %v3140_v30 }
  0xfc   :  { %v3899_v32 = vpop.f32.mrf.mxu1 }
  0xff   :  { %3191 = vmatmul.msk.f32.gmra.mxu1 %vm139_vm0, %v3175_v33 }
 0x101   :  { %3157 = vmatmul.msk.f32.gmra.mxu0 %vm139_vm0, %v3141_v52 }
 0x104   :  { %v3905_v34 = vpop.f32.mrf.mxu1 }
 0x107   :  { %3192 = vmatmul.msk.f32.gmra.mxu1 %vm139_vm0, %v3176_v36 }
 0x109   :  { %943 = vmatmul.f32.vlgmr.msrb.gmra.mxu0 %v3632_v26 }
 0x10a   :  { %1143 = vmatpush.msrb.mxu0 %v4003_v1 }
 0x10c   :  { %v414_v40 = vpop.f32.mrf.mxu1  ;;  %1144 = vmatpush.msrb.mxu0 %v4008_v2 }
 0x10e   :  { %1145 = vmatpush.msrb.mxu0 %v4029_v6 }
 0x10f   :  { %3194 = vmatmul.msk.f32.vlgmr.msra.gmra.mxu1 %vm480_vm2, %v414_v40  ;;  %v205_v13 = vpop.f32.mrf.mxu0 }
 0x110   :  { %955 = vmatpush.msra.mxu1 %v3959_v56  ;;  %1146 = vmatpush.msrb.mxu0 %v4037_v8 }
 0x112   :  { %956 = vmatpush.msra.mxu1 %v3964_v57  ;;  %1147 = vmatpush.msrb.mxu0 %v4047_v10 }
 0x114   :  { %v417_v42 = vpop.f32.mrf.mxu1  ;;  %957 = vmatpush.msra.mxu1 %v3975_v59  ;;  %1148 = vmatpush.msrb.mxu0 %v4059_v12 }
 0x116   :  { %958 = vmatpush.msra.mxu1 %v3980_v60  ;;  %1149 = vmatpush.msrb.mxu0 %v4072_v14 }
 0x117   :  { %3195 = vmatmul.msk.f32.gmra.mxu1 %vm480_vm2, %v417_v42 }
 0x118   :  { %959 = vmatpush.msra.mxu1 %v3994_v63  ;;  %1150 = vmatpush.msrb.mxu0 %v4083_v16 }
 0x11a   :  { %960 = vmatpush.msra.mxu1 %v4017_v4 }
 0x11c   :  { %v420_v43 = vpop.f32.mrf.mxu1  ;;  %961 = vmatpush.msra.mxu1 %v4042_v9 }
 0x11e   :  { %962 = vmatpush.msra.mxu1 %v4054_v11 }
 0x11f   :  { %3196 = vmatmul.msk.f32.gmra.mxu1 %vm480_vm2, %v420_v43 }
 0x124   :  { %v423_v44 = vpop.f32.mrf.mxu1 }
 0x127   :  { %3197 = vmatmul.msk.f32.gmra.mxu1 %vm480_vm2, %v423_v44 }
 0x12c   :  { %v426_v46 = vpop.f32.mrf.mxu1 }
 0x12d   :  { %3198 = vmatmul.msk.f32.vlgmr.msra.gmra.mxu2 %vm480_vm2, %v426_v46  ;;  %3214 = vmatmul.msk.f32.vlgmr.msra.gmra.mxu3 %vm480_vm2, %v426_v46 }
 0x12e   :  { %1787 = vmatpush.msra.mxu3 %v3959_v56  ;;  %1767 = vmatpush.msra.mxu2 %v4003_v1 }
 0x12f   :  { %3210 = vmatmul.msk.f32.vlgmr.msrb.gmra.mxu1 %vm480_vm2, %v414_v40 }
 0x130   :  { %1788 = vmatpush.msra.mxu3 %v3964_v57  ;;  %1768 = vmatpush.msra.mxu2 %v4008_v2 }
 0x131   :  { %1059 = vmatpush.msrb.mxu1 %v3959_v56 }
 0x132   :  { %1789 = vmatpush.msra.mxu3 %v3975_v59  ;;  %1769 = vmatpush.msra.mxu2 %v4029_v6 }
 0x133   :  { %1060 = vmatpush.msrb.mxu1 %v3964_v57 }
 0x134   :  { %v429_v47 = vpop.f32.mrf.mxu1  ;;  %1790 = vmatpush.msra.mxu3 %v3980_v60  ;;  %1770 = vmatpush.msra.mxu2 %v4037_v8 }
 0x135   :  { %3199 = vmatmul.msk.f32.gmra.mxu2 %vm480_vm2, %v429_v47  ;;  %3215 = vmatmul.msk.f32.gmra.mxu3 %vm480_vm2, %v429_v47 }
 0x136   :  { %1791 = vmatpush.msra.mxu3 %v3994_v63  ;;  %1061 = vmatpush.msrb.mxu1 %v3975_v59 }
 0x137   :  { %3211 = vmatmul.msk.f32.gmra.mxu1 %vm480_vm2, %v417_v42  ;;  %1771 = vmatpush.msra.mxu2 %v4047_v10 }
 0x138   :  { %1792 = vmatpush.msra.mxu3 %v4017_v4  ;;  %1062 = vmatpush.msrb.mxu1 %v3980_v60 }
 0x139   :  { %1772 = vmatpush.msra.mxu2 %v4059_v12 }
 0x13a   :  { %1793 = vmatpush.msra.mxu3 %v4042_v9  ;;  %1063 = vmatpush.msrb.mxu1 %v3994_v63 }
 0x13b   :  { %1773 = vmatpush.msra.mxu2 %v4072_v14 }
 0x13c   :  { %v432_v48 = vpop.f32.mrf.mxu1  ;;  %1794 = vmatpush.msra.mxu3 %v4054_v11  ;;  %1064 = vmatpush.msrb.mxu1 %v4017_v4 }
 0x13d   :  { %3200 = vmatmul.msk.f32.gmra.mxu2 %vm480_vm2, %v432_v48  ;;  %3216 = vmatmul.msk.f32.gmra.mxu3 %vm480_vm2, %v432_v48 }
 0x13e   :  { %1065 = vmatpush.msrb.mxu1 %v4042_v9  ;;  %1774 = vmatpush.msra.mxu2 %v4083_v16 }
 0x13f   :  { %3212 = vmatmul.msk.f32.gmra.mxu1 %vm480_vm2, %v420_v43 }
 0x140   :  { %1066 = vmatpush.msrb.mxu1 %v4054_v11 }
 0x144   :  { %v435_v50 = vpop.f32.mrf.mxu1 }
 0x145   :  { %3201 = vmatmul.msk.f32.gmra.mxu2 %vm480_vm2, %v435_v50  ;;  %3217 = vmatmul.msk.f32.gmra.mxu3 %vm480_vm2, %v435_v50 }
 0x147   :  { %3213 = vmatmul.msk.f32.gmra.mxu1 %vm480_vm2, %v423_v44 }
 0x14c   :  { %v438_v53 = vpop.f32.mrf.mxu1 }
 0x14d   :  { %3202 = vmatmul.msk.f32.gmra.mxu2 %vm480_vm2, %v438_v53  ;;  %3218 = vmatmul.msk.f32.gmra.mxu3 %vm480_vm2, %v438_v53 }
 0x14f   :  { %963 = vmatmul.f32.vlgmr.msra.gmra.mxu1 %v3632_v26  ;;  %v208_v26 = vpop.f32.mrf.mxu0 }
 0x150   :  { %1163 = vmatpush.msra.mxu1 %v3959_v56 }
 0x152   :  { %1164 = vmatpush.msra.mxu1 %v3964_v57 }
 0x154   :  { %v441_v54 = vpop.f32.mrf.mxu1  ;;  %1165 = vmatpush.msra.mxu1 %v3975_v59 }
 0x155   :  { %3203 = vmatmul.msk.f32.gmra.mxu2 %vm480_vm2, %v441_v54  ;;  %3219 = vmatmul.msk.f32.gmra.mxu3 %vm480_vm2, %v441_v54 }
 0x156   :  { %1166 = vmatpush.msra.mxu1 %v3980_v60 }
 0x157   :  { %v211_v19 = vpop.f32.mrf.mxu0 }
 0x158   :  { %1167 = vmatpush.msra.mxu1 %v3994_v63 }
 0x15a   :  { %1168 = vmatpush.msra.mxu1 %v4017_v4 }
 0x15c   :  { %v444_v58 = vpop.f32.mrf.mxu1  ;;  %1169 = vmatpush.msra.mxu1 %v4042_v9 }
 0x15d   :  { %3204 = vmatmul.msk.f32.gmra.mxu2 %vm480_vm2, %v444_v58  ;;  %3220 = vmatmul.msk.f32.gmra.mxu3 %vm480_vm2, %v444_v58 }
 0x15e   :  { %1170 = vmatpush.msra.mxu1 %v4054_v11 }
 0x15f   :  { %v214_v20 = vpop.f32.mrf.mxu0 }
 0x164   :  { %v447_v61 = vpop.f32.mrf.mxu1 }
 0x165   :  { %3205 = vmatmul.msk.f32.gmra.mxu2 %vm480_vm2, %v447_v61  ;;  %3221 = vmatmul.msk.f32.gmra.mxu3 %vm480_vm2, %v447_v61 }
 0x167   :  { %v217_v21 = vpop.f32.mrf.mxu0 }
 0x16c   :  { %v450_v7 = vpop.f32.mrf.mxu1 }
 0x16d   :  { %3206 = vmatmul.msk.f32.gmra.mxu2 %vm480_vm2, %v450_v7  ;;  %3222 = vmatmul.msk.f32.gmra.mxu3 %vm480_vm2, %v450_v7 }
 0x16f   :  { %v220_v22 = vpop.f32.mrf.mxu0 }
 0x174   :  { %v453_v15 = vpop.f32.mrf.mxu1 }
 0x175   :  { %3207 = vmatmul.msk.f32.gmra.mxu2 %vm480_vm2, %v453_v15  ;;  %3223 = vmatmul.msk.f32.gmra.mxu3 %vm480_vm2, %v453_v15 }
 0x177   :  { %v223_v23 = vpop.f32.mrf.mxu0 }
 0x17c   :  { %v456_v17 = vpop.f32.mrf.mxu1 }
 0x17d   :  { %3208 = vmatmul.msk.f32.gmra.mxu2 %vm480_vm2, %v456_v17  ;;  %3224 = vmatmul.msk.f32.gmra.mxu3 %vm480_vm2, %v456_v17 }
 0x17f   :  { %v226_v27 = vpop.f32.mrf.mxu0 }
 0x184   :  { %v459_v18 = vpop.f32.mrf.mxu1 }
 0x185   :  { %3209 = vmatmul.msk.f32.gmra.mxu2 %vm480_vm2, %v459_v18  ;;  %3225 = vmatmul.msk.f32.gmra.mxu3 %vm480_vm2, %v459_v18 }
 0x187   :  { %v229_v30 = vpop.f32.mrf.mxu0 }
 0x18c   :  { %v4162_v33 = vpop.f32.mrf.mxu1 }
 0x18d   :  { %3226 = vmatmul.msk.f32.vlgmr.msrb.gmra.mxu2 %vm480_vm2, %v205_v13  ;;  %3242 = vmatmul.msk.f32.vlgmr.msrb.gmra.mxu3 %vm480_vm2, %v205_v13 }
 0x18e   :  { %1975 = vmatpush.msrb.mxu2 %v4003_v1  ;;  %1995 = vmatpush.msrb.mxu3 %v3959_v56 }
 0x18f   :  { %v232_v36 = vpop.f32.mrf.mxu0 }
 0x190   :  { %1976 = vmatpush.msrb.mxu2 %v4008_v2  ;;  %1996 = vmatpush.msrb.mxu3 %v3964_v57 }
 0x192   :  { %1977 = vmatpush.msrb.mxu2 %v4029_v6  ;;  %1997 = vmatpush.msrb.mxu3 %v3975_v59 }
 0x194   :  { %1978 = vmatpush.msrb.mxu2 %v4037_v8  ;;  %1998 = vmatpush.msrb.mxu3 %v3980_v60  ;;  %v4170_v37 = vpop.f32.mrf.mxu1 }
 0x195   :  { %3227 = vmatmul.msk.f32.gmra.mxu2 %vm480_vm2, %v208_v26  ;;  %3243 = vmatmul.msk.f32.gmra.mxu3 %vm480_vm2, %v208_v26 }
 0x196   :  { %1979 = vmatpush.msrb.mxu2 %v4047_v10  ;;  %1999 = vmatpush.msrb.mxu3 %v3994_v63 }
 0x197   :  { %v235_v39 = vpop.f32.mrf.mxu0 }
 0x198   :  { %1980 = vmatpush.msrb.mxu2 %v4059_v12  ;;  %2000 = vmatpush.msrb.mxu3 %v4017_v4 }
 0x19a   :  { %1981 = vmatpush.msrb.mxu2 %v4072_v14  ;;  %2001 = vmatpush.msrb.mxu3 %v4042_v9 }
 0x19c   :  { %1982 = vmatpush.msrb.mxu2 %v4083_v16  ;;  %2002 = vmatpush.msrb.mxu3 %v4054_v11  ;;  %v4176_v40 = vpop.f32.mrf.mxu1 }
 0x19d   :  { %3228 = vmatmul.msk.f32.gmra.mxu2 %vm480_vm2, %v211_v19  ;;  %3244 = vmatmul.msk.f32.gmra.mxu3 %vm480_vm2, %v211_v19 }
 0x19f   :  { %v238_v44 = vpop.f32.mrf.mxu0 }
 0x1a4   :  { %v4186_v45 = vpop.f32.mrf.mxu1 }
 0x1a5   :  { %3229 = vmatmul.msk.f32.gmra.mxu2 %vm480_vm2, %v214_v20  ;;  %3245 = vmatmul.msk.f32.gmra.mxu3 %vm480_vm2, %v214_v20 }
 0x1a7   :  { %v241_v48 = vpop.f32.mrf.mxu0 }
 0x1ac   :  { %v611_v49 = vpop.f32.mrf.mxu1 }
 0x1ad   :  { %3230 = vmatmul.msk.f32.gmra.mxu2 %vm480_vm2, %v217_v21  ;;  %3246 = vmatmul.msk.f32.gmra.mxu3 %vm480_vm2, %v217_v21 }
 0x1b0   :  { %v4152_v24 = vpop.f32.mrf.mxu3  ;;  %v4180_v42 = vpop.f32.mrf.mxu2 }
 0x1b4   :  { %v4204_v52 = vpop.f32.mrf.mxu1 }
 0x1b5   :  { %3231 = vmatmul.msk.f32.gmra.mxu2 %vm480_vm2, %v220_v22  ;;  %3247 = vmatmul.msk.f32.gmra.mxu3 %vm480_vm2, %v220_v22 }
 0x1b8   :  { %v4156_v25 = vpop.f32.mrf.mxu3  ;;  %v4190_v46 = vpop.f32.mrf.mxu2 }
 0x1bc   :  { %v4214_v55 = vpop.f32.mrf.mxu1 }
 0x1bd   :  { %3232 = vmatmul.msk.f32.gmra.mxu2 %vm480_vm2, %v223_v23  ;;  %3248 = vmatmul.msk.f32.gmra.mxu3 %vm480_vm2, %v223_v23 }
 0x1c0   :  { %v4160_v29 = vpop.f32.mrf.mxu3  ;;  %v4196_v50 = vpop.f32.mrf.mxu2 }
 0x1c4   :  { %v4226_v62 = vpop.f32.mrf.mxu1 }
 0x1c5   :  { %3233 = vmatmul.msk.f32.gmra.mxu2 %vm480_vm2, %v226_v27  ;;  %3249 = vmatmul.msk.f32.gmra.mxu3 %vm480_vm2, %v226_v27 }
 0x1c8   :  { %v4166_v35 = vpop.f32.mrf.mxu3  ;;  %v4208_v54 = vpop.f32.mrf.mxu2 }
 0x1cc   :  { %v964_v13 = vpop.f32.mrf.mxu1 }
 0x1cd   :  { %3234 = vmatmul.msk.f32.gmra.mxu2 %vm480_vm2, %v229_v30  ;;  %3250 = vmatmul.msk.f32.gmra.mxu3 %vm480_vm2, %v229_v30 }
 0x1d0   :  { %v4172_v38 = vpop.f32.mrf.mxu3  ;;  %v4218_v61 = vpop.f32.mrf.mxu2 }
 0x1d5   :  { %3235 = vmatmul.msk.f32.gmra.mxu2 %vm480_vm2, %v232_v36  ;;  %3251 = vmatmul.msk.f32.gmra.mxu3 %vm480_vm2, %v232_v36 }
 0x1d8   :  { %v4178_v41 = vpop.f32.mrf.mxu3  ;;  %v4231_v0 = vpop.f32.mrf.mxu2 }
 0x1dd   :  { %3236 = vmatmul.msk.f32.gmra.mxu2 %vm480_vm2, %v235_v39  ;;  %3252 = vmatmul.msk.f32.gmra.mxu3 %vm480_vm2, %v235_v39  ;;  %v944_v39 = vpop.f32.mrf.mxu0 }
 0x1e0   :  { %v4184_v43 = vpop.f32.mrf.mxu3 }
 0x1e5   :  { %3237 = vmatmul.msk.f32.gmra.mxu2 %vm480_vm2, %v238_v44  ;;  %3253 = vmatmul.msk.f32.gmra.mxu3 %vm480_vm2, %v238_v44 }
 0x1e8   :  { %v4192_v47 = vpop.f32.mrf.mxu3 }
 0x1ed   :  { %3238 = vmatmul.msk.f32.gmra.mxu2 %vm480_vm2, %v241_v48  ;;  %3254 = vmatmul.msk.f32.gmra.mxu3 %vm480_vm2, %v241_v48 }
 0x1f0   :  { %v4198_v51 = vpop.f32.mrf.mxu3 }
 0x1f5   :  { %3239 = vmatmul.msk.f32.gmra.mxu2 %vm480_vm2, %v3891_v28  ;;  %3255 = vmatmul.msk.f32.gmra.mxu3 %vm480_vm2, %v3891_v28 }
 0x1f8   :  { %v4206_v53 = vpop.f32.mrf.mxu3 }
 0x1fd   :  { %3240 = vmatmul.msk.f32.gmra.mxu2 %vm480_vm2, %v3899_v32  ;;  %3256 = vmatmul.msk.f32.gmra.mxu3 %vm480_vm2, %v3899_v32  ;;  %v3193_v32 = vld [vmem:[%s5164_s2 + $0x100] ss:$8 sm:$0x3] }
 0x1fe   :  { %v4233_v3 = vperm.slane %v3193_v32, 1  ;;  %v4250_v30 = vperm.slane %v3193_v32, 0 }
 0x200   :  { %v4216_v58 = vpop.f32.mrf.mxu3 }
 0x205   :  { %3241 = vmatmul.msk.f32.gmra.mxu2 %vm480_vm2, %v3905_v34  ;;  %3257 = vmatmul.msk.f32.gmra.mxu3 %vm480_vm2, %v3905_v34  ;;  %v4236_v34 = vpop.f32.mrf.mxu2 }
 0x208   :  { %v4224_v28 = vpop.f32.mrf.mxu3 }
 0x209   :  { %5167 = vst [vmem:[#allocation5_spill] sm:$0xff] %v4224_v28 }
 0x20d   :  { %v4239_v18 = vpop.f32.mrf.mxu2 }
 0x210   :  { %v789_v5 = vpop.f32.mrf.mxu3 }
 0x211   :  { %v790_v7 = vadd.f32 %v789_v5, %v611_v49 }
 0x213   :  { %v843_v15 = vadd.f32 %v4233_v3, %v790_v7 }
 0x215   :  { %v968_v17 = vadd.f32 %v964_v13, %v843_v15  ;;  %v4241_v19 = vpop.f32.mrf.mxu2 }
 0x217   :  { %3380 = vtanh.f32 %v968_v17 }
 0x21d   :  { %v3381_v26 = vpop.eup %3380  ;;  %v4243_v20 = vpop.f32.mrf.mxu2 }
 0x21e   :  { %1010 = vrot.lane.b32.xlu1 %v3381_v26, %s3633_s19 }
 0x225   :  { %v4245_v21 = vpop.f32.mrf.mxu2 }
 0x22d   :  { %v4247_v22 = vpop.f32.mrf.mxu2 }
 0x22e   :  { %5168 = vst [vmem:[#allocation6_spill] sm:$0xff] %v4247_v22 }
 0x235   :  { %v724_v23 = vpop.f32.mrf.mxu2 }
 0x236   :  { %v725_v27 = vadd.f32 %v724_v23, %v4162_v33 }
 0x238   :  { %v842_v36 = vadd.f32 %v4250_v30, %v725_v27 }
 0x23a   :  { %v967_v44 = vadd.f32 %v944_v39, %v842_v36 }
 0x23c   :  { %v3258_v48 = vmul.f32 -1.442695, %v967_v44 }
 0x23e   :  { %3382 = vpow2.f32 %v3258_v48 }
 0x244   :  { %v3383_v49 = vpop.eup %3382 }
 0x245   :  { %v975_v5 = vadd.f32 1.0, %v3383_v49 }
 0x247   :  { %3384 = vrcp.f32 %v975_v5  ;;  %v988_v22 = vand.u32 2147483648, %v975_v5  ;;  %vm982_vm5 = vweird.f32 %v975_v5  ;;  %v986_v33 = vand.u32 2147483647, %v975_v5 }
 0x249   :  { %v989_v23 = vor.u32 1.1754944e-38, %v988_v22  ;;  %vm987_vm7 = vcmp.eq.f32.partialorder %v986_v33, 8.507059e+37 }
 0x24d   :  { %v3385_v7 = vpop.eup %3384 }
 0x24e   :  { %v978_v13 = vmul.f32 %v3385_v7, %v975_v5  ;;  %vm983_vm4 = vweird.f32 %v3385_v7 }
 0x24f   :  { %vm984_vm6 = vmor %vm982_vm5, %vm983_vm4 }
 0x250   :  { %v979_v15 = vsub.f32 1.0, %v978_v13 }
 0x252   :  { %v980_v26 = vmul.f32 %v3385_v7, %v979_v15  ;;  %v3259_v15 = vmul.f32 -1.442695, %v968_v17 }
 0x254   :  { %v981_v28 = vadd.f32 %v3385_v7, %v980_v26 }
 0x256   :  { %v985_v32 = vsel %vm984_vm6, %v3385_v7, %v981_v28 }
 0x257   :  { %v990_v27 = vsel %vm987_vm7, %v989_v23, %v985_v32 }
 0x258   :  { %v1008_v44 = vmul.f32 0.0, %v990_v27 }
 0x290   :  { %v1011_v36 = vpop.permute.xlu1 %1010 }
 0x291   :  { %v1013_v39 = vmul.f32 %v1011_v36, %v990_v27 }
 0x293   :  { %1015 = vrot.lane.b32.xlu2 %v1013_v39, %s3633_s19 }
 0x2ed   :  { %v1016_v48 = vpop.permute.xlu2 %1015 }
 0x2ee   :  { %v4254_v49 = vadd.f32 %v1016_v48, %v1008_v44 }
 0x2f0   :  { %3386 = vtanh.f32 %v4254_v49 }
 0x2f1   :  { %3388 = vpow2.f32 %v3259_v15 }
 0x2f6   :  { %v3387_v13 = vpop.eup %3386 }
 0x2f7   :  { %1021 = vrot.lane.b32.xlu0 %v3387_v13, %s3633_s19  ;;  %v3389_v5 = vpop.eup %3388  ;;  %v792_v13 = vpop.f32.mrf.mxu3 }
 0x2f8   :  { %v976_v28 = vadd.f32 1.0, %v3389_v5  ;;  %v793_v15 = vadd.f32 %v792_v13, %v4204_v52 }
 0x2fa   :  { %3390 = vrcp.f32 %v976_v28  ;;  %v1003_v23 = vand.u32 2147483648, %v976_v28  ;;  %vm997_vm9 = vweird.f32 %v976_v28  ;;  %v1001_v27 = vand.u32 2147483647, %v976_v28 }
 0x2fb   :  { %v845_v5 = vadd.f32 %v4233_v3, %v793_v15 }
 0x2fc   :  { %v1004_v39 = vor.u32 1.1754944e-38, %v1003_v23  ;;  %vm1002_vm11 = vcmp.eq.f32.partialorder %v1001_v27, 8.507059e+37 }
 0x300   :  { %v3391_v22 = vpop.eup %3390 }
 0x301   :  { %v993_v7 = vmul.f32 %v3391_v22, %v976_v28  ;;  %vm998_vm8 = vweird.f32 %v3391_v22 }
 0x302   :  { %vm999_vm10 = vmor %vm997_vm9, %vm998_vm8 }
 0x303   :  { %v994_v26 = vsub.f32 1.0, %v993_v7 }
 0x305   :  { %v995_v33 = vmul.f32 %v3391_v22, %v994_v26  ;;  %v727_v26 = vpop.f32.mrf.mxu2 }
 0x307   :  { %v996_v32 = vadd.f32 %v3391_v22, %v995_v33  ;;  %v728_v33 = vadd.f32 %v727_v26, %v4170_v37 }
 0x309   :  { %v1000_v36 = vsel %vm999_vm10, %v3391_v22, %v996_v32  ;;  %v844_v23 = vadd.f32 %v4250_v30, %v728_v33 }
 0x30a   :  { %v1005_v44 = vsel %vm1002_vm11, %v1004_v39, %v1000_v36 }
 0x369   :  { %v1022_v48 = vpop.permute.xlu0 %1021 }
 0x36a   :  { %v1024_v17 = vmul.f32 %v1022_v48, %v1005_v44 }
 0x36c   :  { %1025 = vst.msk [vmem:[#allocation3] sm:$0xff] %vm139_vm0, %v1024_v17  ;;  %3260 = vmatmul.msk.f32.vlgmr.msra.gmra.mxu0 %vm139_vm0, %v1024_v17  ;;  %3261 = vmatmul.msk.f32.vlgmr.msrb.gmra.mxu1 %vm139_vm0, %v1024_v17 }
 0x36d   :  { %1247 = vmatpush.msra.mxu0 %v4003_v1  ;;  %1267 = vmatpush.msrb.mxu1 %v3959_v56 }
 0x36f   :  { %1248 = vmatpush.msra.mxu0 %v4008_v2  ;;  %1268 = vmatpush.msrb.mxu1 %v3964_v57 }
 0x371   :  { %1249 = vmatpush.msra.mxu0 %v4029_v6  ;;  %1269 = vmatpush.msrb.mxu1 %v3975_v59 }
 0x373   :  { %1250 = vmatpush.msra.mxu0 %v4037_v8  ;;  %1270 = vmatpush.msrb.mxu1 %v3980_v60 }
 0x375   :  { %1251 = vmatpush.msra.mxu0 %v4047_v10  ;;  %1271 = vmatpush.msrb.mxu1 %v3994_v63 }
 0x377   :  { %1252 = vmatpush.msra.mxu0 %v4059_v12  ;;  %1272 = vmatpush.msrb.mxu1 %v4017_v4 }
 0x379   :  { %1253 = vmatpush.msra.mxu0 %v4072_v14  ;;  %1273 = vmatpush.msrb.mxu1 %v4042_v9 }
 0x37b   :  { %1254 = vmatpush.msra.mxu0 %v4083_v16  ;;  %1274 = vmatpush.msrb.mxu1 %v4054_v11 }
 0x3e9   :  { %v1068_v28 = vpop.f32.mrf.mxu1  ;;  %v1048_v32 = vpop.f32.mrf.mxu0 }
 0x3ea   :  { %v1072_v22 = vadd.f32 %v1068_v28, %v845_v5  ;;  %v1071_v27 = vadd.f32 %v1048_v32, %v844_v23 }
 0x3ec   :  { %3392 = vtanh.f32 %v1072_v22  ;;  %v3262_v36 = vmul.f32 -1.442695, %v1071_v27 }
 0x3ee   :  { %3394 = vpow2.f32 %v3262_v36 }
 0x3f2   :  { %v3393_v7 = vpop.eup %3392 }
 0x3f3   :  { %1114 = vrot.lane.b32.xlu1 %v3393_v7, %s3633_s19 }
 0x3f4   :  { %v3395_v39 = vpop.eup %3394 }
 0x3f5   :  { %v1079_v44 = vadd.f32 1.0, %v3395_v39 }
 0x3f7   :  { %3396 = vrcp.f32 %v1079_v44  ;;  %v1092_v5 = vand.u32 2147483648, %v1079_v44  ;;  %vm1086_vm13 = vweird.f32 %v1079_v44  ;;  %v1090_v28 = vand.u32 2147483647, %v1079_v44 }
 0x3f9   :  { %v1093_v7 = vor.u32 1.1754944e-38, %v1092_v5  ;;  %vm1091_vm15 = vcmp.eq.f32.partialorder %v1090_v28, 8.507059e+37 }
 0x3fd   :  { %v3397_v52 = vpop.eup %3396 }
 0x3fe   :  { %v1082_v48 = vmul.f32 %v3397_v52, %v1079_v44  ;;  %vm1087_vm12 = vweird.f32 %v3397_v52  ;;  %v3263_v44 = vmul.f32 -1.442695, %v1072_v22 }
 0x3ff   :  { %vm1088_vm14 = vmor %vm1086_vm13, %vm1087_vm12 }
 0x400   :  { %v1083_v17 = vsub.f32 1.0, %v1082_v48 }
 0x402   :  { %v1084_v13 = vmul.f32 %v3397_v52, %v1083_v17 }
 0x404   :  { %v1085_v15 = vadd.f32 %v3397_v52, %v1084_v13 }
 0x406   :  { %v1089_v37 = vsel %vm1088_vm14, %v3397_v52, %v1085_v15 }
 0x407   :  { %v1094_v33 = vsel %vm1091_vm15, %v1093_v7, %v1089_v37 }
 0x408   :  { %v1112_v23 = vmul.f32 %v1094_v33, %v4254_v49 }
 0x465   :  { %v1115_v26 = vpop.permute.xlu1 %1114 }
 0x466   :  { %v1117_v32 = vmul.f32 %v1115_v26, %v1094_v33 }
 0x468   :  { %1119 = vrot.lane.b32.xlu2 %v1117_v32, %s3633_s19 }
 0x4c2   :  { %v1120_v27 = vpop.permute.xlu2 %1119 }
 0x4c3   :  { %v4284_v36 = vadd.f32 %v1120_v27, %v1112_v23  ;;  %v795_v23 = vpop.f32.mrf.mxu3 }
 0x4c4   :  { %v796_v27 = vadd.f32 %v795_v23, %v4214_v55 }
 0x4c5   :  { %3398 = vtanh.f32 %v4284_v36 }
 0x4c6   :  { %3400 = vpow2.f32 %v3263_v44 }
 0x4cb   :  { %v3399_v39 = vpop.eup %3398 }
 0x4cc   :  { %1125 = vrot.lane.b32.xlu0 %v3399_v39, %s3633_s19  ;;  %v3401_v52 = vpop.eup %3400  ;;  %v847_v39 = vadd.f32 %v4233_v3, %v796_v27 }
 0x4cd   :  { %v1080_v48 = vadd.f32 1.0, %v3401_v52 }
 0x4cf   :  { %3402 = vrcp.f32 %v1080_v48  ;;  %v1107_v49 = vand.u32 2147483648, %v1080_v48  ;;  %vm1101_vm2 = vweird.f32 %v1080_v48  ;;  %v1105_v37 = vand.u32 2147483647, %v1080_v48 }
 0x4d1   :  { %v1108_v26 = vor.u32 1.1754944e-38, %v1107_v49  ;;  %vm1106_vm4 = vcmp.eq.f32.partialorder %v1105_v37, 8.507059e+37 }
 0x4d5   :  { %v3403_v17 = vpop.eup %3402 }
 0x4d6   :  { %v1097_v13 = vmul.f32 %v3403_v17, %v1080_v48  ;;  %vm1102_vm1 = vweird.f32 %v3403_v17 }
 0x4d7   :  { %vm1103_vm3 = vmor %vm1101_vm2, %vm1102_vm1 }
 0x4d8   :  { %v1098_v15 = vsub.f32 1.0, %v1097_v13 }
 0x4da   :  { %v1099_v5 = vmul.f32 %v3403_v17, %v1098_v15 }
 0x4dc   :  { %v1100_v28 = vadd.f32 %v3403_v17, %v1099_v5 }
 0x4de   :  { %v1104_v7 = vsel %vm1103_vm3, %v3403_v17, %v1100_v28  ;;  %v730_v17 = vpop.f32.mrf.mxu2 }
 0x4df   :  { %v1109_v33 = vsel %vm1106_vm4, %v1108_v26, %v1104_v7  ;;  %v731_v13 = vadd.f32 %v730_v17, %v4176_v40 }
 0x4e1   :  { %v846_v5 = vadd.f32 %v4250_v30, %v731_v13 }
 0x53e   :  { %v1126_v32 = vpop.permute.xlu0 %1125 }
 0x53f   :  { %v1128_v22 = vmul.f32 %v1126_v32, %v1109_v33 }
 0x541   :  { %1129 = vst.msk [vmem:[#allocation3 + $0x8] sm:$0xff] %vm139_vm0, %v1128_v22  ;;  %3264 = vmatmul.msk.f32.vlgmr.msrb.gmra.mxu0 %vm139_vm0, %v1128_v22  ;;  %3265 = vmatmul.msk.f32.vlgmr.msra.gmra.mxu1 %vm139_vm0, %v1128_v22 }
 0x542   :  { %1351 = vmatpush.msrb.mxu0 %v4003_v1  ;;  %1371 = vmatpush.msra.mxu1 %v3959_v56 }
 0x544   :  { %1352 = vmatpush.msrb.mxu0 %v4008_v2  ;;  %1372 = vmatpush.msra.mxu1 %v3964_v57 }
 0x546   :  { %1353 = vmatpush.msrb.mxu0 %v4029_v6  ;;  %1373 = vmatpush.msra.mxu1 %v3975_v59 }
 0x548   :  { %1354 = vmatpush.msrb.mxu0 %v4037_v8  ;;  %1374 = vmatpush.msra.mxu1 %v3980_v60 }
 0x54a   :  { %1355 = vmatpush.msrb.mxu0 %v4047_v10  ;;  %1375 = vmatpush.msra.mxu1 %v3994_v63 }
 0x54c   :  { %1356 = vmatpush.msrb.mxu0 %v4059_v12  ;;  %1376 = vmatpush.msra.mxu1 %v4017_v4 }
 0x54e   :  { %1357 = vmatpush.msrb.mxu0 %v4072_v14  ;;  %1377 = vmatpush.msra.mxu1 %v4042_v9 }
 0x550   :  { %1358 = vmatpush.msrb.mxu0 %v4083_v16  ;;  %1378 = vmatpush.msra.mxu1 %v4054_v11 }
 0x5be   :  { %v1172_v44 = vpop.f32.mrf.mxu1  ;;  %v1152_v15 = vpop.f32.mrf.mxu0 }
 0x5bf   :  { %v1176_v52 = vadd.f32 %v1172_v44, %v847_v39  ;;  %v1175_v28 = vadd.f32 %v1152_v15, %v846_v5 }
 0x5c1   :  { %3404 = vtanh.f32 %v1176_v52  ;;  %v3266_v49 = vmul.f32 -1.442695, %v1175_v28 }
 0x5c3   :  { %3406 = vpow2.f32 %v3266_v49  ;;  %v3267_v49 = vmul.f32 -1.442695, %v1176_v52 }
 0x5c7   :  { %v3405_v48 = vpop.eup %3404 }
 0x5c8   :  { %1218 = vrot.lane.b32.xlu1 %v3405_v48, %s3633_s19 }
 0x5c9   :  { %v3407_v37 = vpop.eup %3406 }
 0x5ca   :  { %v1183_v7 = vadd.f32 1.0, %v3407_v37 }
 0x5cc   :  { %3408 = vrcp.f32 %v1183_v7  ;;  %v1196_v23 = vand.u32 2147483648, %v1183_v7  ;;  %vm1190_vm6 = vweird.f32 %v1183_v7  ;;  %v1194_v27 = vand.u32 2147483647, %v1183_v7 }
 0x5ce   :  { %v1197_v39 = vor.u32 1.1754944e-38, %v1196_v23  ;;  %vm1195_vm8 = vcmp.eq.f32.partialorder %v1194_v27, 8.507059e+37 }
 0x5d2   :  { %v3409_v55 = vpop.eup %3408 }
 0x5d3   :  { %v1186_v26 = vmul.f32 %v3409_v55, %v1183_v7  ;;  %vm1191_vm5 = vweird.f32 %v3409_v55 }
 0x5d4   :  { %vm1192_vm7 = vmor %vm1190_vm6, %vm1191_vm5 }
 0x5d5   :  { %v1187_v33 = vsub.f32 1.0, %v1186_v26 }
 0x5d7   :  { %v1188_v32 = vmul.f32 %v3409_v55, %v1187_v33 }
 0x5d9   :  { %v1189_v22 = vadd.f32 %v3409_v55, %v1188_v32 }
 0x5db   :  { %v1193_v40 = vsel %vm1192_vm7, %v3409_v55, %v1189_v22 }
 0x5dc   :  { %v1198_v48 = vsel %vm1195_vm8, %v1197_v39, %v1193_v40 }
 0x5dd   :  { %v1216_v13 = vmul.f32 %v1198_v48, %v4284_v36 }
 0x63a   :  { %v1219_v44 = vpop.permute.xlu1 %1218 }
 0x63b   :  { %v1221_v17 = vmul.f32 %v1219_v44, %v1198_v48 }
 0x63d   :  { %1223 = vrot.lane.b32.xlu2 %v1221_v17, %s3633_s19 }
 0x697   :  { %v1224_v15 = vpop.permute.xlu2 %1223 }
 0x698   :  { %v4314_v5 = vadd.f32 %v1224_v15, %v1216_v13 }
 0x69a   :  { %3410 = vtanh.f32 %v4314_v5 }
 0x69b   :  { %3412 = vpow2.f32 %v3267_v49 }
 0x6a0   :  { %v3411_v28 = vpop.eup %3410 }
 0x6a1   :  { %1229 = vrot.lane.b32.xlu0 %v3411_v28, %s3633_s19  ;;  %v3413_v37 = vpop.eup %3412  ;;  %v733_v28 = vpop.f32.mrf.mxu2 }
 0x6a2   :  { %v1184_v7 = vadd.f32 1.0, %v3413_v37  ;;  %v734_v49 = vadd.f32 %v733_v28, %v4186_v45 }
 0x6a4   :  { %3414 = vrcp.f32 %v1184_v7  ;;  %v1211_v36 = vand.u32 2147483648, %v1184_v7  ;;  %vm1205_vm10 = vweird.f32 %v1184_v7  ;;  %v1209_v23 = vand.u32 2147483647, %v1184_v7 }
 0x6a6   :  { %v1212_v40 = vor.u32 1.1754944e-38, %v1211_v36  ;;  %vm1210_vm12 = vcmp.eq.f32.partialorder %v1209_v23, 8.507059e+37 }
 0x6aa   :  { %v3415_v55 = vpop.eup %3414 }
 0x6ab   :  { %v1201_v26 = vmul.f32 %v3415_v55, %v1184_v7  ;;  %vm1206_vm9 = vweird.f32 %v3415_v55  ;;  %v848_v7 = vadd.f32 %v4250_v30, %v734_v49 }
 0x6ac   :  { %vm1207_vm11 = vmor %vm1205_vm10, %vm1206_vm9 }
 0x6ad   :  { %v1202_v33 = vsub.f32 1.0, %v1201_v26 }
 0x6af   :  { %v1203_v32 = vmul.f32 %v3415_v55, %v1202_v33 }
 0x6b1   :  { %v1204_v22 = vadd.f32 %v3415_v55, %v1203_v32 }
 0x6b3   :  { %v1208_v27 = vsel %vm1207_vm11, %v3415_v55, %v1204_v22 }
 0x6b4   :  { %v1213_v39 = vsel %vm1210_vm12, %v1212_v40, %v1208_v27 }
 0x713   :  { %v1230_v44 = vpop.permute.xlu0 %1229 }
 0x714   :  { %v1232_v52 = vmul.f32 %v1230_v44, %v1213_v39 }
 0x716   :  { %1233 = vst.msk [vmem:[#allocation3 + $0x10] sm:$0xff] %vm139_vm0, %v1232_v52  ;;  %3268 = vmatmul.msk.f32.vlgmr.msra.gmra.mxu0 %vm139_vm0, %v1232_v52  ;;  %3269 = vmatmul.msk.f32.vlgmr.msrb.gmra.mxu1 %vm139_vm0, %v1232_v52 }
 0x717   :  { %1455 = vmatpush.msra.mxu0 %v4003_v1  ;;  %1475 = vmatpush.msrb.mxu1 %v3959_v56  ;;  %v798_v56 = vpop.f32.mrf.mxu3 }
 0x719   :  { %1456 = vmatpush.msra.mxu0 %v4008_v2  ;;  %1476 = vmatpush.msrb.mxu1 %v3964_v57  ;;  %v799_v57 = vadd.f32 %v798_v56, %v4226_v62 }
 0x71b   :  { %1457 = vmatpush.msra.mxu0 %v4029_v6  ;;  %1477 = vmatpush.msrb.mxu1 %v3975_v59  ;;  %v849_v48 = vadd.f32 %v4233_v3, %v799_v57 }
 0x71d   :  { %1458 = vmatpush.msra.mxu0 %v4037_v8  ;;  %1478 = vmatpush.msrb.mxu1 %v3980_v60 }
 0x71f   :  { %1459 = vmatpush.msra.mxu0 %v4047_v10  ;;  %1479 = vmatpush.msrb.mxu1 %v3994_v63 }
 0x721   :  { %1460 = vmatpush.msra.mxu0 %v4059_v12  ;;  %1480 = vmatpush.msrb.mxu1 %v4017_v4 }
 0x723   :  { %1461 = vmatpush.msra.mxu0 %v4072_v14  ;;  %1481 = vmatpush.msrb.mxu1 %v4042_v9 }
 0x725   :  { %1462 = vmatpush.msra.mxu0 %v4083_v16  ;;  %1482 = vmatpush.msrb.mxu1 %v4054_v11 }
 0x793   :  { %v1276_v17 = vpop.f32.mrf.mxu1  ;;  %v1256_v37 = vpop.f32.mrf.mxu0 }
 0x794   :  { %v1280_v13 = vadd.f32 %v1276_v17, %v849_v48  ;;  %v1279_v55 = vadd.f32 %v1256_v37, %v848_v7 }
 0x796   :  { %3416 = vtanh.f32 %v1280_v13  ;;  %v3270_v26 = vmul.f32 -1.442695, %v1279_v55  ;;  %v3271_v49 = vmul.f32 -1.442695, %v1280_v13 }
 0x798   :  { %3418 = vpow2.f32 %v3270_v26 }
 0x79c   :  { %v3417_v15 = vpop.eup %3416 }
 0x79d   :  { %1322 = vrot.lane.b32.xlu1 %v3417_v15, %s3633_s19 }
 0x79e   :  { %v3419_v33 = vpop.eup %3418 }
 0x79f   :  { %v1287_v32 = vadd.f32 1.0, %v3419_v33 }
 0x7a1   :  { %3420 = vrcp.f32 %v1287_v32  ;;  %v1300_v40 = vand.u32 2147483648, %v1287_v32  ;;  %vm1294_vm14 = vweird.f32 %v1287_v32  ;;  %v1298_v39 = vand.u32 2147483647, %v1287_v32 }
 0x7a3   :  { %v1301_v44 = vor.u32 1.1754944e-38, %v1300_v40  ;;  %vm1299_vm1 = vcmp.eq.f32.partialorder %v1298_v39, 8.507059e+37  ;;  %v4355_v39 = vld [vmem:[%s5164_s2 + $0xf8] sm:$0xff] }
 0x7a7   :  { %v3421_v62 = vpop.eup %3420 }
 0x7a8   :  { %v1290_v22 = vmul.f32 %v3421_v62, %v1287_v32  ;;  %vm1295_vm13 = vweird.f32 %v3421_v62 }
 0x7a9   :  { %vm1296_vm15 = vmor %vm1294_vm14, %vm1295_vm13 }
 0x7aa   :  { %v1291_v36 = vsub.f32 1.0, %v1290_v22 }
 0x7ac   :  { %v1292_v23 = vmul.f32 %v3421_v62, %v1291_v36 }
 0x7ae   :  { %v1293_v27 = vadd.f32 %v3421_v62, %v1292_v23 }
 0x7b0   :  { %v1297_v45 = vsel %vm1296_vm15, %v3421_v62, %v1293_v27 }
 0x7b1   :  { %v1302_v56 = vsel %vm1299_vm1, %v1301_v44, %v1297_v45  ;;  %v4362_v45 = vld [vmem:[%s5164_s2 + $0xe8] sm:$0xff] }
 0x7b2   :  { %v1320_v48 = vmul.f32 %v1302_v56, %v4314_v5 }
 0x80f   :  { %v1323_v52 = vpop.permute.xlu1 %1322 }
 0x810   :  { %v1325_v57 = vmul.f32 %v1323_v52, %v1302_v56 }
 0x812   :  { %1327 = vrot.lane.b32.xlu2 %v1325_v57, %s3633_s19 }
 0x86c   :  { %v1328_v17 = vpop.permute.xlu2 %1327 }
 0x86d   :  { %v4344_v15 = vadd.f32 %v1328_v17, %v1320_v48 }
 0x86f   :  { %3422 = vtanh.f32 %v4344_v15 }
 0x870   :  { %3424 = vpow2.f32 %v3271_v49 }
 0x875   :  { %v3423_v28 = vpop.eup %3422 }
 0x876   :  { %1333 = vrot.lane.b32.xlu0 %v3423_v28, %s3633_s19  ;;  %v3425_v37 = vpop.eup %3424 }
 0x877   :  { %v1288_v7 = vadd.f32 1.0, %v3425_v37 }
 0x879   :  { %3426 = vrcp.f32 %v1288_v7  ;;  %v1315_v5 = vand.u32 2147483648, %v1288_v7  ;;  %vm1309_vm3 = vweird.f32 %v1288_v7  ;;  %v1313_v22 = vand.u32 2147483647, %v1288_v7 }
 0x87b   :  { %v1316_v23 = vor.u32 1.1754944e-38, %v1315_v5  ;;  %vm1314_vm5 = vcmp.eq.f32.partialorder %v1313_v22, 8.507059e+37 }
 0x87f   :  { %v3427_v55 = vpop.eup %3426 }
 0x880   :  { %v1305_v26 = vmul.f32 %v3427_v55, %v1288_v7  ;;  %vm1310_vm2 = vweird.f32 %v3427_v55 }
 0x881   :  { %vm1311_vm4 = vmor %vm1309_vm3, %vm1310_vm2 }
 0x882   :  { %v1306_v33 = vsub.f32 1.0, %v1305_v26 }
 0x884   :  { %v1307_v32 = vmul.f32 %v3427_v55, %v1306_v33 }
 0x886   :  { %v1308_v62 = vadd.f32 %v3427_v55, %v1307_v32 }
 0x888   :  { %v1312_v36 = vsel %vm1311_vm4, %v3427_v55, %v1308_v62 }
 0x889   :  { %v1317_v27 = vsel %vm1314_vm5, %v1316_v23, %v1312_v36 }
 0x8e8   :  { %v1334_v40 = vpop.permute.xlu0 %1333 }
 0x8e9   :  { %v1336_v13 = vmul.f32 %v1334_v40, %v1317_v27 }
 0x8eb   :  { %1337 = vst.msk [vmem:[#allocation3 + $0x18] sm:$0xff] %vm139_vm0, %v1336_v13  ;;  %3272 = vmatmul.msk.f32.vlgmr.msrb.gmra.mxu0 %vm139_vm0, %v1336_v13  ;;  %3273 = vmatmul.msk.f32.vlgmr.msra.gmra.mxu1 %vm139_vm0, %v1336_v13 }
 0x8ec   :  { %1559 = vmatpush.msrb.mxu0 %v4003_v1  ;;  %1579 = vmatpush.msra.mxu1 %v4355_v39 }
 0x8ee   :  { %1560 = vmatpush.msrb.mxu0 %v4008_v2  ;;  %1580 = vmatpush.msra.mxu1 %v4362_v45 }
 0x8f0   :  { %1561 = vmatpush.msrb.mxu0 %v4029_v6  ;;  %1581 = vmatpush.msra.mxu1 %v3975_v59  ;;  %v801_v59 = vpop.f32.mrf.mxu3 }
 0x8f1   :  { %v802_v1 = vadd.f32 %v801_v59, %v4152_v24 }
 0x8f2   :  { %1562 = vmatpush.msrb.mxu0 %v4037_v8  ;;  %1582 = vmatpush.msra.mxu1 %v3980_v60 }
 0x8f3   :  { %v851_v60 = vadd.f32 %v4233_v3, %v802_v1 }
 0x8f4   :  { %1563 = vmatpush.msrb.mxu0 %v4047_v10  ;;  %1583 = vmatpush.msra.mxu1 %v3994_v63 }
 0x8f6   :  { %1564 = vmatpush.msrb.mxu0 %v4059_v12  ;;  %1584 = vmatpush.msra.mxu1 %v4017_v4  ;;  %v736_v4 = vpop.f32.mrf.mxu2 }
 0x8f7   :  { %v737_v8 = vadd.f32 %v736_v4, %v4180_v42  ;;  %v4394_v4 = vld [vmem:[%s5164_s2 + $0xf0] sm:$0xff] }
 0x8f8   :  { %1565 = vmatpush.msrb.mxu0 %v4072_v14  ;;  %1585 = vmatpush.msra.mxu1 %v4042_v9 }
 0x8f9   :  { %v850_v9 = vadd.f32 %v4250_v30, %v737_v8  ;;  %v4401_v8 = vld [vmem:[%s5164_s2 + $0xe0] sm:$0xff] }
 0x8fa   :  { %1566 = vmatpush.msrb.mxu0 %v4083_v16  ;;  %1586 = vmatpush.msra.mxu1 %v4054_v11 }
 0x968   :  { %v1380_v2 = vpop.f32.mrf.mxu1  ;;  %v1360_v10 = vpop.f32.mrf.mxu0 }
 0x969   :  { %v1384_v6 = vadd.f32 %v1380_v2, %v851_v60  ;;  %v1383_v12 = vadd.f32 %v1360_v10, %v850_v9  ;;  %v4408_v10 = vld [vmem:[%s5164_s2 + $0xd0] sm:$0xff]  ;;  %v4414_v9 = vld [vmem:[%s5164_s2 + $0xd8] sm:$0xff] }
 0x96b   :  { %3428 = vtanh.f32 %v1384_v6  ;;  %v3274_v14 = vmul.f32 -1.442695, %v1383_v12  ;;  %v3275_v62 = vmul.f32 -1.442695, %v1384_v6  ;;  %v4420_v12 = vld [vmem:[%s5164_s2 + $0xc0] sm:$0xff] }
 0x96d   :  { %3430 = vpow2.f32 %v3274_v14  ;;  %v4426_v14 = vld [vmem:[%s5164_s2 + $0xc8] sm:$0xff] }
 0x971   :  { %v3429_v63 = vpop.eup %3428 }
 0x972   :  { %1426 = vrot.lane.b32.xlu1 %v3429_v63, %s3633_s19 }
 0x973   :  { %v3431_v11 = vpop.eup %3430 }
 0x974   :  { %v1391_v16 = vadd.f32 1.0, %v3431_v11  ;;  %v4432_v11 = vld [vmem:[%s5164_s2 + $0xb0] sm:$0xff] }
 0x976   :  { %3432 = vrcp.f32 %v1391_v16  ;;  %v1404_v48 = vand.u32 2147483648, %v1391_v16  ;;  %vm1398_vm7 = vweird.f32 %v1391_v16  ;;  %v1402_v17 = vand.u32 2147483647, %v1391_v16 }
 0x978   :  { %v1405_v28 = vor.u32 1.1754944e-38, %v1404_v48  ;;  %vm1403_vm9 = vcmp.eq.f32.partialorder %v1402_v17, 8.507059e+37  ;;  %v4474_v48 = vld [vmem:[%s5164_s2 + $0x88] sm:$0xff]  ;;  %v804_v17 = vpop.f32.mrf.mxu3 }
 0x97c   :  { %v3433_v24 = vpop.eup %3432 }
 0x97d   :  { %v1394_v44 = vmul.f32 %v3433_v24, %v1391_v16  ;;  %vm1399_vm6 = vweird.f32 %v3433_v24  ;;  %v4438_v16 = vld [vmem:[%s5164_s2 + $0xb8] sm:$0xff] }
 0x97e   :  { %vm1400_vm8 = vmor %vm1398_vm7, %vm1399_vm6 }
 0x97f   :  { %v1395_v52 = vsub.f32 1.0, %v1394_v44  ;;  %v4450_v44 = vld [vmem:[%s5164_s2 + $0xa8] sm:$0xff] }
 0x981   :  { %v1396_v56 = vmul.f32 %v3433_v24, %v1395_v52  ;;  %v4456_v52 = vld [vmem:[%s5164_s2 + $0x90] sm:$0xff] }
 0x983   :  { %v1397_v57 = vadd.f32 %v3433_v24, %v1396_v56  ;;  %v4462_v56 = vld [vmem:[%s5164_s2 + $0x98] sm:$0xff] }
 0x985   :  { %v1401_v42 = vsel %vm1400_vm8, %v3433_v24, %v1397_v57  ;;  %v4444_v24 = vld [vmem:[%s5164_s2 + $0xa0] sm:$0xff] }
 0x986   :  { %v1406_v37 = vsel %vm1403_vm9, %v1405_v28, %v1401_v42  ;;  %v4468_v57 = vld [vmem:[%s5164_s2 + $0x80] sm:$0xff]  ;;  %v805_v42 = vadd.f32 %v804_v17, %v4156_v25 }
 0x987   :  { %v1424_v55 = vmul.f32 %v1406_v37, %v4344_v15 }
 0x988   :  { %v853_v28 = vadd.f32 %v4233_v3, %v805_v42 }
 0x9e4   :  { %v1427_v49 = vpop.permute.xlu1 %1426 }
 0x9e5   :  { %v1429_v7 = vmul.f32 %v1427_v49, %v1406_v37 }
 0x9e7   :  { %1431 = vrot.lane.b32.xlu2 %v1429_v7, %s3633_s19 }
 0xa41   :  { %v1432_v26 = vpop.permute.xlu2 %1431 }
 0xa42   :  { %v4384_v33 = vadd.f32 %v1432_v26, %v1424_v55  ;;  %v739_v55 = vpop.f32.mrf.mxu2 }
 0xa43   :  { %v740_v26 = vadd.f32 %v739_v55, %v4190_v46 }
 0xa44   :  { %3434 = vtanh.f32 %v4384_v33 }
 0xa45   :  { %3436 = vpow2.f32 %v3275_v62  ;;  %v852_v62 = vadd.f32 %v4250_v30, %v740_v26 }
 0xa4a   :  { %v3435_v32 = vpop.eup %3434 }
 0xa4b   :  { %1437 = vrot.lane.b32.xlu0 %v3435_v32, %s3633_s19  ;;  %v3437_v5 = vpop.eup %3436 }
 0xa4c   :  { %v1392_v22 = vadd.f32 1.0, %v3437_v5 }
 0xa4e   :  { %3438 = vrcp.f32 %v1392_v22  ;;  %v1419_v15 = vand.u32 2147483648, %v1392_v22  ;;  %vm1413_vm11 = vweird.f32 %v1392_v22  ;;  %v1417_v59 = vand.u32 2147483647, %v1392_v22 }
 0xa50   :  { %v1420_v60 = vor.u32 1.1754944e-38, %v1419_v15  ;;  %vm1418_vm13 = vcmp.eq.f32.partialorder %v1417_v59, 8.507059e+37 }
 0xa54   :  { %v3439_v36 = vpop.eup %3438 }
 0xa55   :  { %v1409_v23 = vmul.f32 %v3439_v36, %v1392_v22  ;;  %vm1414_vm10 = vweird.f32 %v3439_v36 }
 0xa56   :  { %vm1415_vm12 = vmor %vm1413_vm11, %vm1414_vm10 }
 0xa57   :  { %v1410_v27 = vsub.f32 1.0, %v1409_v23 }
 0xa59   :  { %v1411_v40 = vmul.f32 %v3439_v36, %v1410_v27 }
 0xa5b   :  { %v1412_v13 = vadd.f32 %v3439_v36, %v1411_v40 }
 0xa5d   :  { %v1416_v1 = vsel %vm1415_vm12, %v3439_v36, %v1412_v13 }
 0xa5e   :  { %v1421_v2 = vsel %vm1418_vm13, %v1420_v60, %v1416_v1 }
 0xabd   :  { %v1438_v63 = vpop.permute.xlu0 %1437 }
 0xabe   :  { %v1440_v6 = vmul.f32 %v1438_v63, %v1421_v2 }
 0xac0   :  { %1441 = vst.msk [vmem:[#allocation3 + $0x20] sm:$0xff] %vm139_vm0, %v1440_v6  ;;  %3276 = vmatmul.msk.f32.vlgmr.msra.gmra.mxu0 %vm139_vm0, %v1440_v6  ;;  %3277 = vmatmul.msk.f32.vlgmr.msrb.gmra.mxu1 %vm139_vm0, %v1440_v6 }
 0xac1   :  { %1663 = vmatpush.msra.mxu0 %v4394_v4  ;;  %1683 = vmatpush.msrb.mxu1 %v4355_v39 }
 0xac3   :  { %1664 = vmatpush.msra.mxu0 %v4401_v8  ;;  %1684 = vmatpush.msrb.mxu1 %v4362_v45 }
 0xac5   :  { %1665 = vmatpush.msra.mxu0 %v4408_v10  ;;  %1685 = vmatpush.msrb.mxu1 %v4414_v9 }
 0xac7   :  { %1666 = vmatpush.msra.mxu0 %v4420_v12  ;;  %1686 = vmatpush.msrb.mxu1 %v4426_v14 }
 0xac9   :  { %1667 = vmatpush.msra.mxu0 %v4432_v11  ;;  %1687 = vmatpush.msrb.mxu1 %v4438_v16 }
 0xacb   :  { %1668 = vmatpush.msra.mxu0 %v4444_v24  ;;  %1688 = vmatpush.msrb.mxu1 %v4450_v44 }
 0xacd   :  { %1669 = vmatpush.msra.mxu0 %v4456_v52  ;;  %1689 = vmatpush.msrb.mxu1 %v4462_v56 }
 0xacf   :  { %1670 = vmatpush.msra.mxu0 %v4468_v57  ;;  %1690 = vmatpush.msrb.mxu1 %v4474_v48 }
 0xb3d   :  { %v1484_v49 = vpop.f32.mrf.mxu1  ;;  %v1464_v32 = vpop.f32.mrf.mxu0 }
 0xb3e   :  { %v1488_v37 = vadd.f32 %v1484_v49, %v853_v28  ;;  %v1487_v5 = vadd.f32 %v1464_v32, %v852_v62 }
 0xb40   :  { %3440 = vtanh.f32 %v1488_v37  ;;  %v3278_v22 = vmul.f32 -1.442695, %v1487_v5 }
 0xb42   :  { %3442 = vpow2.f32 %v3278_v22 }
 0xb46   :  { %v3441_v7 = vpop.eup %3440 }
 0xb47   :  { %1530 = vrot.lane.b32.xlu1 %v3441_v7, %s3633_s19  ;;  %v3279_v7 = vmul.f32 -1.442695, %v1488_v37 }
 0xb48   :  { %v3443_v36 = vpop.eup %3442 }
 0xb49   :  { %v1495_v23 = vadd.f32 1.0, %v3443_v36 }
 0xb4b   :  { %3444 = vrcp.f32 %v1495_v23  ;;  %v1508_v59 = vand.u32 2147483648, %v1495_v23  ;;  %vm1502_vm15 = vweird.f32 %v1495_v23  ;;  %v1506_v1 = vand.u32 2147483647, %v1495_v23 }
 0xb4d   :  { %v1509_v60 = vor.u32 1.1754944e-38, %v1508_v59  ;;  %vm1507_vm2 = vcmp.eq.f32.partialorder %v1506_v1, 8.507059e+37 }
 0xb51   :  { %v3445_v25 = vpop.eup %3444 }
 0xb52   :  { %v1498_v27 = vmul.f32 %v3445_v25, %v1495_v23  ;;  %vm1503_vm14 = vweird.f32 %v3445_v25 }
 0xb53   :  { %vm1504_vm1 = vmor %vm1502_vm15, %vm1503_vm14 }
 0xb54   :  { %v1499_v40 = vsub.f32 1.0, %v1498_v27 }
 0xb56   :  { %v1500_v13 = vmul.f32 %v3445_v25, %v1499_v40 }
 0xb58   :  { %v1501_v15 = vadd.f32 %v3445_v25, %v1500_v13 }
 0xb5a   :  { %v1505_v46 = vsel %vm1504_vm1, %v3445_v25, %v1501_v15  ;;  %v807_v15 = vpop.f32.mrf.mxu3 }
 0xb5b   :  { %v1510_v63 = vsel %vm1507_vm2, %v1509_v60, %v1505_v46  ;;  %v808_v59 = vadd.f32 %v807_v15, %v4160_v29 }
 0xb5c   :  { %v1528_v17 = vmul.f32 %v1510_v63, %v4384_v33 }
 0xb5d   :  { %v855_v1 = vadd.f32 %v4233_v3, %v808_v59 }
 0xbb9   :  { %v1531_v2 = vpop.permute.xlu1 %1530 }
 0xbba   :  { %v1533_v6 = vmul.f32 %v1531_v2, %v1510_v63  ;;  %v742_v63 = vpop.f32.mrf.mxu2 }
 0xbbc   :  { %1535 = vrot.lane.b32.xlu2 %v1533_v6, %s3633_s19  ;;  %v743_v6 = vadd.f32 %v742_v63, %v4196_v50 }
 0xc16   :  { %v1536_v42 = vpop.permute.xlu2 %1535 }
 0xc17   :  { %v4484_v28 = vadd.f32 %v1536_v42, %v1528_v17  ;;  %v854_v42 = vadd.f32 %v4250_v30, %v743_v6 }
 0xc19   :  { %3446 = vtanh.f32 %v4484_v28 }
 0xc1a   :  { %3448 = vpow2.f32 %v3279_v7 }
 0xc1f   :  { %v3447_v49 = vpop.eup %3446 }
 0xc20   :  { %1541 = vrot.lane.b32.xlu0 %v3447_v49, %s3633_s19  ;;  %v3449_v55 = vpop.eup %3448 }
 0xc21   :  { %v1496_v26 = vadd.f32 1.0, %v3449_v55 }
 0xc23   :  { %3450 = vrcp.f32 %v1496_v26  ;;  %v1523_v33 = vand.u32 2147483648, %v1496_v26  ;;  %vm1517_vm4 = vweird.f32 %v1496_v26  ;;  %v1521_v23 = vand.u32 2147483647, %v1496_v26 }
 0xc25   :  { %v1524_v27 = vor.u32 1.1754944e-38, %v1523_v33  ;;  %vm1522_vm6 = vcmp.eq.f32.partialorder %v1521_v23, 8.507059e+37 }
 0xc29   :  { %v3451_v32 = vpop.eup %3450 }
 0xc2a   :  { %v1513_v62 = vmul.f32 %v3451_v32, %v1496_v26  ;;  %vm1518_vm3 = vweird.f32 %v3451_v32 }
 0xc2b   :  { %vm1519_vm5 = vmor %vm1517_vm4, %vm1518_vm3 }
 0xc2c   :  { %v1514_v5 = vsub.f32 1.0, %v1513_v62 }
 0xc2e   :  { %v1515_v22 = vmul.f32 %v3451_v32, %v1514_v5 }
 0xc30   :  { %v1516_v36 = vadd.f32 %v3451_v32, %v1515_v22 }
 0xc32   :  { %v1520_v25 = vsel %vm1519_vm5, %v3451_v32, %v1516_v36 }
 0xc33   :  { %v1525_v40 = vsel %vm1522_vm6, %v1524_v27, %v1520_v25 }
 0xc92   :  { %v1542_v13 = vpop.permute.xlu0 %1541 }
 0xc93   :  { %v1544_v37 = vmul.f32 %v1542_v13, %v1525_v40 }
 0xc95   :  { %1545 = vst.msk [vmem:[#allocation3 + $0x28] sm:$0xff] %vm139_vm0, %v1544_v37  ;;  %3280 = vmatmul.msk.f32.vlgmr.msrb.gmra.mxu0 %vm139_vm0, %v1544_v37  ;;  %3281 = vmatmul.msk.f32.vlgmr.msra.gmra.mxu1 %vm139_vm0, %v1544_v37 }
 0xc96   :  { %1871 = vmatpush.msrb.mxu0 %v4394_v4  ;;  %1891 = vmatpush.msra.mxu1 %v4355_v39 }
 0xc98   :  { %1872 = vmatpush.msrb.mxu0 %v4401_v8  ;;  %1892 = vmatpush.msra.mxu1 %v4362_v45 }
 0xc9a   :  { %1873 = vmatpush.msrb.mxu0 %v4408_v10  ;;  %1893 = vmatpush.msra.mxu1 %v4414_v9 }
 0xc9c   :  { %1874 = vmatpush.msrb.mxu0 %v4420_v12  ;;  %1894 = vmatpush.msra.mxu1 %v4426_v14 }
 0xc9e   :  { %1875 = vmatpush.msrb.mxu0 %v4432_v11  ;;  %1895 = vmatpush.msra.mxu1 %v4438_v16 }
 0xca0   :  { %1876 = vmatpush.msrb.mxu0 %v4444_v24  ;;  %1896 = vmatpush.msra.mxu1 %v4450_v44 }
 0xca2   :  { %1877 = vmatpush.msrb.mxu0 %v4456_v52  ;;  %1897 = vmatpush.msra.mxu1 %v4462_v56 }
 0xca4   :  { %1878 = vmatpush.msrb.mxu0 %v4468_v57  ;;  %1898 = vmatpush.msra.mxu1 %v4474_v48 }
 0xd12   :  { %v1588_v46 = vpop.f32.mrf.mxu1  ;;  %v1568_v17 = vpop.f32.mrf.mxu0 }
 0xd13   :  { %v1592_v60 = vadd.f32 %v1588_v46, %v855_v1  ;;  %v1591_v49 = vadd.f32 %v1568_v17, %v854_v42 }
 0xd15   :  { %3452 = vtanh.f32 %v1592_v60  ;;  %v3282_v7 = vmul.f32 -1.442695, %v1591_v49  ;;  %v3283_v1 = vmul.f32 -1.442695, %v1592_v60 }
 0xd17   :  { %3454 = vpow2.f32 %v3282_v7 }
 0xd1b   :  { %v3453_v2 = vpop.eup %3452 }
 0xd1c   :  { %1634 = vrot.lane.b32.xlu1 %v3453_v2, %s3633_s19 }
 0xd1d   :  { %v3455_v55 = vpop.eup %3454 }
 0xd1e   :  { %v1599_v26 = vadd.f32 1.0, %v3455_v55 }
 0xd20   :  { %3456 = vrcp.f32 %v1599_v26  ;;  %v1612_v36 = vand.u32 2147483648, %v1599_v26  ;;  %vm1606_vm8 = vweird.f32 %v1599_v26  ;;  %v1610_v33 = vand.u32 2147483647, %v1599_v26 }
 0xd22   :  { %v1613_v23 = vor.u32 1.1754944e-38, %v1612_v36  ;;  %vm1611_vm10 = vcmp.eq.f32.partialorder %v1610_v33, 8.507059e+37 }
 0xd26   :  { %v3457_v29 = vpop.eup %3456 }
 0xd27   :  { %v1602_v32 = vmul.f32 %v3457_v29, %v1599_v26  ;;  %vm1607_vm7 = vweird.f32 %v3457_v29 }
 0xd28   :  { %vm1608_vm9 = vmor %vm1606_vm8, %vm1607_vm7 }
 0xd29   :  { %v1603_v62 = vsub.f32 1.0, %v1602_v32 }
 0xd2b   :  { %v1604_v5 = vmul.f32 %v3457_v29, %v1603_v62  ;;  %v810_v62 = vpop.f32.mrf.mxu3 }
 0xd2d   :  { %v1605_v22 = vadd.f32 %v3457_v29, %v1604_v5  ;;  %v811_v5 = vadd.f32 %v810_v62, %v4166_v35 }
 0xd2f   :  { %v1609_v50 = vsel %vm1608_vm9, %v3457_v29, %v1605_v22  ;;  %v857_v22 = vadd.f32 %v4233_v3, %v811_v5 }
 0xd30   :  { %v1614_v27 = vsel %vm1611_vm10, %v1613_v23, %v1609_v50  ;;  %v745_v23 = vpop.f32.mrf.mxu2 }
 0xd31   :  { %v1632_v13 = vmul.f32 %v1614_v27, %v4484_v28 }
 0xd8e   :  { %v1635_v25 = vpop.permute.xlu1 %1634 }
 0xd8f   :  { %v1637_v40 = vmul.f32 %v1635_v25, %v1614_v27  ;;  %v746_v25 = vadd.f32 %v745_v23, %v4208_v54 }
 0xd91   :  { %1639 = vrot.lane.b32.xlu2 %v1637_v40, %s3633_s19  ;;  %v856_v40 = vadd.f32 %v4250_v30, %v746_v25 }
 0xdeb   :  { %v1640_v37 = vpop.permute.xlu2 %1639 }
 0xdec   :  { %v4514_v15 = vadd.f32 %v1640_v37, %v1632_v13 }
 0xdee   :  { %3458 = vtanh.f32 %v4514_v15 }
 0xdef   :  { %3460 = vpow2.f32 %v3283_v1 }
 0xdf4   :  { %v3459_v59 = vpop.eup %3458 }
 0xdf5   :  { %1645 = vrot.lane.b32.xlu0 %v3459_v59, %s3633_s19  ;;  %v3461_v46 = vpop.eup %3460 }
 0xdf6   :  { %v1600_v2 = vadd.f32 1.0, %v3461_v46 }
 0xdf8   :  { %3462 = vrcp.f32 %v1600_v2  ;;  %v1627_v28 = vand.u32 2147483648, %v1600_v2  ;;  %vm1621_vm12 = vweird.f32 %v1600_v2  ;;  %v1625_v7 = vand.u32 2147483647, %v1600_v2 }
 0xdfa   :  { %v1628_v26 = vor.u32 1.1754944e-38, %v1627_v28  ;;  %vm1626_vm14 = vcmp.eq.f32.partialorder %v1625_v7, 8.507059e+37 }
 0xdfe   :  { %v3463_v63 = vpop.eup %3462 }
 0xdff   :  { %v1617_v6 = vmul.f32 %v3463_v63, %v1600_v2  ;;  %vm1622_vm11 = vweird.f32 %v3463_v63 }
 0xe00   :  { %vm1623_vm13 = vmor %vm1621_vm12, %vm1622_vm11 }
 0xe01   :  { %v1618_v17 = vsub.f32 1.0, %v1617_v6 }
 0xe03   :  { %v1619_v42 = vmul.f32 %v3463_v63, %v1618_v17 }
 0xe05   :  { %v1620_v49 = vadd.f32 %v3463_v63, %v1619_v42 }
 0xe07   :  { %v1624_v55 = vsel %vm1623_vm13, %v3463_v63, %v1620_v49 }
 0xe08   :  { %v1629_v29 = vsel %vm1626_vm14, %v1628_v26, %v1624_v55 }
 0xe67   :  { %v1646_v32 = vpop.permute.xlu0 %1645 }
 0xe68   :  { %v1648_v60 = vmul.f32 %v1646_v32, %v1629_v29 }
 0xe6a   :  { %1649 = vst.msk [vmem:[#allocation3 + $0x30] sm:$0xff] %vm139_vm0, %v1648_v60  ;;  %3284 = vmatmul.msk.f32.vlgmr.msra.gmra.mxu0 %vm139_vm0, %v1648_v60  ;;  %3285 = vmatmul.msk.f32.vlgmr.msrb.gmra.mxu1 %vm139_vm0, %v1648_v60 }
 0xe6b   :  { %2079 = vmatpush.msra.mxu0 %v4394_v4  ;;  %2099 = vmatpush.msrb.mxu1 %v4355_v39 }
 0xe6d   :  { %2080 = vmatpush.msra.mxu0 %v4401_v8  ;;  %2100 = vmatpush.msrb.mxu1 %v4362_v45 }
 0xe6f   :  { %2081 = vmatpush.msra.mxu0 %v4408_v10  ;;  %2101 = vmatpush.msrb.mxu1 %v4414_v9 }
 0xe71   :  { %2082 = vmatpush.msra.mxu0 %v4420_v12  ;;  %2102 = vmatpush.msrb.mxu1 %v4426_v14 }
 0xe73   :  { %2083 = vmatpush.msra.mxu0 %v4432_v11  ;;  %2103 = vmatpush.msrb.mxu1 %v4438_v16 }
 0xe75   :  { %2084 = vmatpush.msra.mxu0 %v4444_v24  ;;  %2104 = vmatpush.msrb.mxu1 %v4450_v44 }
 0xe77   :  { %2085 = vmatpush.msra.mxu0 %v4456_v52  ;;  %2105 = vmatpush.msrb.mxu1 %v4462_v56 }
 0xe79   :  { %2086 = vmatpush.msra.mxu0 %v4468_v57  ;;  %2106 = vmatpush.msrb.mxu1 %v4474_v48 }
 0xee7   :  { %v1692_v36 = vpop.f32.mrf.mxu1  ;;  %v1672_v27 = vpop.f32.mrf.mxu0 }
 0xee8   :  { %v1696_v33 = vadd.f32 %v1692_v36, %v857_v22  ;;  %v1695_v13 = vadd.f32 %v1672_v27, %v856_v40 }
 0xeea   :  { %3464 = vtanh.f32 %v1696_v33  ;;  %v3286_v37 = vmul.f32 -1.442695, %v1695_v13  ;;  %v3287_v62 = vmul.f32 -1.442695, %v1696_v33 }
 0xeec   :  { %3466 = vpow2.f32 %v3286_v37 }
 0xef0   :  { %v3465_v50 = vpop.eup %3464 }
 0xef1   :  { %1738 = vrot.lane.b32.xlu1 %v3465_v50, %s3633_s19 }
 0xef2   :  { %v3467_v59 = vpop.eup %3466 }
 0xef3   :  { %v1703_v1 = vadd.f32 1.0, %v3467_v59 }
 0xef5   :  { %3468 = vrcp.f32 %v1703_v1  ;;  %v1716_v17 = vand.u32 2147483648, %v1703_v1  ;;  %vm1710_vm1 = vweird.f32 %v1703_v1  ;;  %v1714_v42 = vand.u32 2147483647, %v1703_v1 }
 0xef7   :  { %v1717_v49 = vor.u32 1.1754944e-38, %v1716_v17  ;;  %vm1715_vm3 = vcmp.eq.f32.partialorder %v1714_v42, 8.507059e+37 }
 0xefb   :  { %v3469_v35 = vpop.eup %3468 }
 0xefc   :  { %v1706_v46 = vmul.f32 %v3469_v35, %v1703_v1  ;;  %vm1711_vm15 = vweird.f32 %v3469_v35 }
 0xefd   :  { %vm1712_vm2 = vmor %vm1710_vm1, %vm1711_vm15  ;;  %vm2622_vm1 = vcmp.lt.s32.totalorder %v3775_v31, 32 }
 0xefe   :  { %v1707_v2 = vsub.f32 1.0, %v1706_v46 }
 0xf00   :  { %v1708_v63 = vmul.f32 %v3469_v35, %v1707_v2 }
 0xf02   :  { %v1709_v6 = vadd.f32 %v3469_v35, %v1708_v63 }
 0xf04   :  { %v1713_v54 = vsel %vm1712_vm2, %v3469_v35, %v1709_v6  ;;  %v813_v35 = vpop.f32.mrf.mxu3 }
 0xf05   :  { %v1718_v7 = vsel %vm1715_vm3, %v1717_v49, %v1713_v54  ;;  %v748_v49 = vpop.f32.mrf.mxu2 }
 0xf06   :  { %v1736_v26 = vmul.f32 %v1718_v7, %v4514_v15 }
 0xf0c   :  { %v4567_v46 = vpop.f32.mrf.mxu3 }
 0xf14   :  { %v4569_v2 = vpop.f32.mrf.mxu3 }
 0xf1c   :  { %v4571_v63 = vpop.f32.mrf.mxu3 }
 0xf24   :  { %v4573_v6 = vpop.f32.mrf.mxu3 }
 0xf2c   :  { %v4575_v17 = vpop.f32.mrf.mxu3 }
 0xf34   :  { %v4577_v42 = vpop.f32.mrf.mxu3 }
 0xf3c   :  { %v4579_v54 = vpop.f32.mrf.mxu3 }
 0xf63   :  { %v1739_v28 = vpop.permute.xlu1 %1738 }
 0xf64   :  { %v1741_v55 = vmul.f32 %v1739_v28, %v1718_v7  ;;  %v814_v28 = vadd.f32 %v813_v35, %v4172_v38 }
 0xf66   :  { %1743 = vrot.lane.b32.xlu2 %v1741_v55, %s3633_s19  ;;  %v859_v7 = vadd.f32 %v4233_v3, %v814_v28 }
 0xfc0   :  { %v1744_v29 = vpop.permute.xlu2 %1743 }
 0xfc1   :  { %v4544_v32 = vadd.f32 %v1744_v29, %v1736_v26  ;;  %v4583_v29 = vpop.f32.mrf.mxu2 }
 0xfc3   :  { %3470 = vtanh.f32 %v4544_v32 }
 0xfc4   :  { %3472 = vpow2.f32 %v3287_v62 }
 0xfc9   :  { %v3471_v60 = vpop.eup %3470  ;;  %v4586_v62 = vpop.f32.mrf.mxu2 }
 0xfca   :  { %1749 = vrot.lane.b32.xlu0 %v3471_v60, %s3633_s19  ;;  %v3473_v5 = vpop.eup %3472 }
 0xfcb   :  { %v1704_v22 = vadd.f32 1.0, %v3473_v5 }
 0xfcd   :  { %3474 = vrcp.f32 %v1704_v22  ;;  %v1731_v15 = vand.u32 2147483648, %v1704_v22  ;;  %vm1725_vm5 = vweird.f32 %v1704_v22  ;;  %v1729_v40 = vand.u32 2147483647, %v1704_v22 }
 0xfcf   :  { %v1732_v37 = vor.u32 1.1754944e-38, %v1731_v15  ;;  %vm1730_vm7 = vcmp.eq.f32.partialorder %v1729_v40, 8.507059e+37 }
 0xfd1   :  { %v4588_v5 = vpop.f32.mrf.mxu2 }
 0xfd3   :  { %v3475_v36 = vpop.eup %3474 }
 0xfd4   :  { %v1721_v50 = vmul.f32 %v3475_v36, %v1704_v22  ;;  %vm1726_vm4 = vweird.f32 %v3475_v36 }
 0xfd5   :  { %vm1727_vm6 = vmor %vm1725_vm5, %vm1726_vm4 }
 0xfd6   :  { %v1722_v23 = vsub.f32 1.0, %v1721_v50 }
 0xfd8   :  { %v1723_v25 = vmul.f32 %v3475_v36, %v1722_v23  ;;  %v749_v23 = vadd.f32 %v748_v49, %v4218_v61 }
 0xfd9   :  { %v4590_v22 = vpop.f32.mrf.mxu2 }
 0xfda   :  { %v1724_v27 = vadd.f32 %v3475_v36, %v1723_v25 }
 0xfdc   :  { %v1728_v13 = vsel %vm1727_vm6, %v3475_v36, %v1724_v27  ;;  %v858_v27 = vadd.f32 %v4250_v30, %v749_v23 }
 0xfdd   :  { %v1733_v59 = vsel %vm1730_vm7, %v1732_v37, %v1728_v13 }
 0xfe1   :  { %v4592_v36 = vpop.f32.mrf.mxu2 }
 0xfe9   :  { %v4594_v50 = vpop.f32.mrf.mxu2 }
 0xff1   :  { %v4596_v38 = vpop.f32.mrf.mxu2 }
0x103c   :  { %v1750_v1 = vpop.permute.xlu0 %1749 }
0x103d   :  { %v1752_v33 = vmul.f32 %v1750_v1, %v1733_v59 }
0x103f   :  { %1753 = vst.msk [vmem:[#allocation3 + $0x38] sm:$0xff] %vm139_vm0, %v1752_v33  ;;  %3288 = vmatmul.msk.f32.vlgmr.msra.gmra.mxu2 %vm139_vm0, %v1752_v33  ;;  %3289 = vmatmul.msk.f32.vlgmr.msra.gmra.mxu3 %vm139_vm0, %v1752_v33 }
0x1040   :  { %2183 = vmatpush.msra.mxu2 %v4394_v4  ;;  %2203 = vmatpush.msra.mxu3 %v4355_v39 }
0x1042   :  { %2184 = vmatpush.msra.mxu2 %v4401_v8  ;;  %2204 = vmatpush.msra.mxu3 %v4362_v45 }
0x1044   :  { %2185 = vmatpush.msra.mxu2 %v4408_v10  ;;  %2205 = vmatpush.msra.mxu3 %v4414_v9 }
0x1046   :  { %2186 = vmatpush.msra.mxu2 %v4420_v12  ;;  %2206 = vmatpush.msra.mxu3 %v4426_v14 }
0x1048   :  { %2187 = vmatpush.msra.mxu2 %v4432_v11  ;;  %2207 = vmatpush.msra.mxu3 %v4438_v16 }
0x104a   :  { %2188 = vmatpush.msra.mxu2 %v4444_v24  ;;  %2208 = vmatpush.msra.mxu3 %v4450_v44 }
0x104c   :  { %2189 = vmatpush.msra.mxu2 %v4456_v52  ;;  %2209 = vmatpush.msra.mxu3 %v4462_v56 }
0x104e   :  { %2190 = vmatpush.msra.mxu2 %v4468_v57  ;;  %2210 = vmatpush.msra.mxu3 %v4474_v48 }
0x10c2   :  { %v1796_v55 = vpop.f32.mrf.mxu3  ;;  %v1776_v25 = vpop.f32.mrf.mxu2 }
0x10c3   :  { %v1800_v26 = vadd.f32 %v1796_v55, %v859_v7  ;;  %v1799_v15 = vadd.f32 %v1776_v25, %v858_v27 }
0x10c5   :  { %3476 = vtanh.f32 %v1800_v26  ;;  %v3290_v40 = vmul.f32 -1.442695, %v1799_v15 }
0x10c7   :  { %3478 = vpow2.f32 %v3290_v40 }
0x10cb   :  { %v3477_v60 = vpop.eup %3476 }
0x10cc   :  { %1842 = vrot.lane.b32.xlu1 %v3477_v60, %s3633_s19 }
0x10cd   :  { %v3479_v13 = vpop.eup %3478 }
0x10ce   :  { %v1807_v37 = vadd.f32 1.0, %v3479_v13 }
0x10d0   :  { %3480 = vrcp.f32 %v1807_v37  ;;  %v1820_v7 = vand.u32 2147483648, %v1807_v37  ;;  %vm1814_vm9 = vweird.f32 %v1807_v37  ;;  %v1818_v55 = vand.u32 2147483647, %v1807_v37 }
0x10d2   :  { %v1821_v49 = vor.u32 1.1754944e-38, %v1820_v7  ;;  %vm1819_vm11 = vcmp.eq.f32.partialorder %v1818_v55, 8.507059e+37 }
0x10d6   :  { %v3481_v59 = vpop.eup %3480 }
0x10d7   :  { %v1810_v1 = vmul.f32 %v3481_v59, %v1807_v37  ;;  %vm1815_vm8 = vweird.f32 %v3481_v59  ;;  %v3291_v37 = vmul.f32 -1.442695, %v1800_v26 }
0x10d8   :  { %vm1816_vm10 = vmor %vm1814_vm9, %vm1815_vm8 }
0x10d9   :  { %v1811_v33 = vsub.f32 1.0, %v1810_v1 }
0x10db   :  { %v1812_v35 = vmul.f32 %v3481_v59, %v1811_v33 }
0x10dd   :  { %v1813_v28 = vadd.f32 %v3481_v59, %v1812_v35 }
0x10df   :  { %v1817_v61 = vsel %vm1816_vm10, %v3481_v59, %v1813_v28 }
0x10e0   :  { %v1822_v23 = vsel %vm1819_vm11, %v1821_v49, %v1817_v61 }
0x10e1   :  { %v1840_v27 = vmul.f32 %v1822_v23, %v4544_v32 }
0x113e   :  { %v1843_v60 = vpop.permute.xlu1 %1842 }
0x113f   :  { %v1845_v25 = vmul.f32 %v1843_v60, %v1822_v23 }
0x1141   :  { %1847 = vrot.lane.b32.xlu2 %v1845_v25, %s3633_s19 }
0x119b   :  { %v1848_v15 = vpop.permute.xlu2 %1847 }
0x119c   :  { %v4602_v40 = vadd.f32 %v1848_v15, %v1840_v27  ;;  %v2613_v27 = vld [vmem:[#allocation3 + $0x38] sm:$0xff] }
0x119e   :  { %3482 = vtanh.f32 %v4602_v40 }
0x119f   :  { %3484 = vpow2.f32 %v3291_v37 }
0x11a4   :  { %v3483_v13 = vpop.eup %3482 }
0x11a5   :  { %1853 = vrot.lane.b32.xlu0 %v3483_v13, %s3633_s19  ;;  %v3485_v59 = vpop.eup %3484 }
0x11a6   :  { %v1808_v1 = vadd.f32 1.0, %v3485_v59  ;;  %v817_v59 = vadd.f32 %v4567_v46, %v4178_v41 }
0x11a8   :  { %3486 = vrcp.f32 %v1808_v1  ;;  %v1835_v32 = vand.u32 2147483648, %v1808_v1  ;;  %vm1829_vm13 = vweird.f32 %v1808_v1  ;;  %v1833_v61 = vand.u32 2147483647, %v1808_v1 }
0x11aa   :  { %v1836_v60 = vor.u32 1.1754944e-38, %v1835_v32  ;;  %vm1834_vm15 = vcmp.eq.f32.partialorder %v1833_v61, 8.507059e+37 }
0x11ae   :  { %v3487_v33 = vpop.eup %3486 }
0x11af   :  { %v1825_v35 = vmul.f32 %v3487_v33, %v1808_v1  ;;  %vm1830_vm12 = vweird.f32 %v3487_v33  ;;  %v861_v1 = vadd.f32 %v4233_v3, %v817_v59 }
0x11b0   :  { %vm1831_vm14 = vmor %vm1829_vm13, %vm1830_vm12 }
0x11b1   :  { %v1826_v28 = vsub.f32 1.0, %v1825_v35 }
0x11b3   :  { %v1827_v7 = vmul.f32 %v3487_v33, %v1826_v28 }
0x11b5   :  { %v1828_v55 = vadd.f32 %v3487_v33, %v1827_v7  ;;  %v752_v7 = vadd.f32 %v4583_v29, %v4231_v0 }
0x11b7   :  { %v1832_v49 = vsel %vm1831_vm14, %v3487_v33, %v1828_v55  ;;  %v860_v32 = vadd.f32 %v4250_v30, %v752_v7 }
0x11b8   :  { %v1837_v23 = vsel %vm1834_vm15, %v1836_v60, %v1832_v49 }
0x1217   :  { %v1854_v25 = vpop.permute.xlu0 %1853 }
0x1218   :  { %v1856_v26 = vmul.f32 %v1854_v25, %v1837_v23 }
0x121a   :  { %1857 = vst.msk [vmem:[#allocation3 + $0x40] sm:$0xff] %vm139_vm0, %v1856_v26  ;;  %3292 = vmatmul.msk.f32.vlgmr.msrb.gmra.mxu0 %vm139_vm0, %v1856_v26  ;;  %3293 = vmatmul.msk.f32.vlgmr.msra.gmra.mxu1 %vm139_vm0, %v1856_v26 }
0x121b   :  { %2287 = vmatpush.msrb.mxu0 %v4394_v4  ;;  %2307 = vmatpush.msra.mxu1 %v4355_v39 }
0x121d   :  { %2288 = vmatpush.msrb.mxu0 %v4401_v8  ;;  %2308 = vmatpush.msra.mxu1 %v4362_v45 }
0x121f   :  { %2289 = vmatpush.msrb.mxu0 %v4408_v10  ;;  %2309 = vmatpush.msra.mxu1 %v4414_v9 }
0x1221   :  { %v2614_v15 = vld [vmem:[#allocation3 + $0x40] sm:$0xff]  ;;  %2290 = vmatpush.msrb.mxu0 %v4420_v12  ;;  %2310 = vmatpush.msra.mxu1 %v4426_v14 }
0x1222   :  { %v2630_v13 = vsel %vm2622_vm1, %v2613_v27, %v2614_v15  ;;  %v2631_v37 = vsel %vm2622_vm1, %v2614_v15, %v2613_v27 }
0x1223   :  { %2291 = vmatpush.msrb.mxu0 %v4432_v11  ;;  %2311 = vmatpush.msra.mxu1 %v4438_v16  ;;  %2646 = vst.msk [vmem:[#allocation4 + $0x48] sm:$0xff] %vm139_vm0, %v2630_v13 }
0x1224   :  { %2647 = vst.msk [vmem:[#allocation4 + $0x50] sm:$0xff] %vm139_vm0, %v2631_v37 }
0x1225   :  { %2292 = vmatpush.msrb.mxu0 %v4444_v24  ;;  %2312 = vmatpush.msra.mxu1 %v4450_v44 }
0x1227   :  { %2293 = vmatpush.msrb.mxu0 %v4456_v52  ;;  %2313 = vmatpush.msra.mxu1 %v4462_v56 }
0x1229   :  { %2294 = vmatpush.msrb.mxu0 %v4468_v57  ;;  %2314 = vmatpush.msra.mxu1 %v4474_v48 }
0x1297   :  { %v1900_v33 = vpop.f32.mrf.mxu1  ;;  %v1880_v55 = vpop.f32.mrf.mxu0 }
0x1298   :  { %v1904_v35 = vadd.f32 %v1900_v33, %v861_v1  ;;  %v1903_v61 = vadd.f32 %v1880_v55, %v860_v32 }
0x129a   :  { %3488 = vtanh.f32 %v1904_v35  ;;  %v3294_v49 = vmul.f32 -1.442695, %v1903_v61  ;;  %v3295_v32 = vmul.f32 -1.442695, %v1904_v35 }
0x129c   :  { %3490 = vpow2.f32 %v3294_v49 }
0x12a0   :  { %v3489_v28 = vpop.eup %3488 }
0x12a1   :  { %1946 = vrot.lane.b32.xlu1 %v3489_v28, %s3633_s19 }
0x12a2   :  { %v3491_v60 = vpop.eup %3490 }
0x12a3   :  { %v1911_v23 = vadd.f32 1.0, %v3491_v60 }
0x12a5   :  { %3492 = vrcp.f32 %v1911_v23  ;;  %v1924_v15 = vand.u32 2147483648, %v1911_v23  ;;  %vm1918_vm3 = vweird.f32 %v1911_v23  ;;  %v1922_v13 = vand.u32 2147483647, %v1911_v23 }
0x12a7   :  { %v1925_v29 = vor.u32 1.1754944e-38, %v1924_v15  ;;  %vm1923_vm5 = vcmp.eq.f32.partialorder %v1922_v13, 8.507059e+37 }
0x12ab   :  { %v3493_v41 = vpop.eup %3492 }
0x12ac   :  { %v1914_v46 = vmul.f32 %v3493_v41, %v1911_v23  ;;  %vm1919_vm2 = vweird.f32 %v3493_v41 }
0x12ad   :  { %vm1920_vm4 = vmor %vm1918_vm3, %vm1919_vm2 }
0x12ae   :  { %v1915_v25 = vsub.f32 1.0, %v1914_v46 }
0x12b0   :  { %v1916_v26 = vmul.f32 %v3493_v41, %v1915_v25 }
0x12b2   :  { %v1917_v27 = vadd.f32 %v3493_v41, %v1916_v26 }
0x12b4   :  { %v1921_v0 = vsel %vm1920_vm4, %v3493_v41, %v1917_v27 }
0x12b5   :  { %v1926_v59 = vsel %vm1923_vm5, %v1925_v29, %v1921_v0  ;;  %v2612_v29 = vld [vmem:[#allocation3 + $0x30] sm:$0xff] }
0x12b6   :  { %v1944_v33 = vmul.f32 %v1926_v59, %v4602_v40 }
0x1313   :  { %v1947_v37 = vpop.permute.xlu1 %1946 }
0x1314   :  { %v1949_v1 = vmul.f32 %v1947_v37, %v1926_v59 }
0x1316   :  { %1951 = vrot.lane.b32.xlu2 %v1949_v1, %s3633_s19 }
0x1370   :  { %v1952_v28 = vpop.permute.xlu2 %1951 }
0x1371   :  { %v4641_v7 = vadd.f32 %v1952_v28, %v1944_v33 }
0x1373   :  { %3494 = vtanh.f32 %v4641_v7 }
0x1374   :  { %3496 = vpow2.f32 %v3295_v32 }
0x1379   :  { %v3495_v55 = vpop.eup %3494 }
0x137a   :  { %1957 = vrot.lane.b32.xlu0 %v3495_v55, %s3633_s19  ;;  %v3497_v61 = vpop.eup %3496 }
0x137b   :  { %v1912_v49 = vadd.f32 1.0, %v3497_v61 }
0x137d   :  { %3498 = vrcp.f32 %v1912_v49  ;;  %v1939_v40 = vand.u32 2147483648, %v1912_v49  ;;  %vm1933_vm7 = vweird.f32 %v1912_v49  ;;  %v1937_v26 = vand.u32 2147483647, %v1912_v49 }
0x137f   :  { %v1940_v15 = vor.u32 1.1754944e-38, %v1939_v40  ;;  %vm1938_vm9 = vcmp.eq.f32.partialorder %v1937_v26, 8.507059e+37 }
0x1383   :  { %v3499_v60 = vpop.eup %3498 }
0x1384   :  { %v1929_v23 = vmul.f32 %v3499_v60, %v1912_v49  ;;  %vm1934_vm6 = vweird.f32 %v3499_v60 }
0x1385   :  { %vm1935_vm8 = vmor %vm1933_vm7, %vm1934_vm6 }
0x1386   :  { %v1930_v41 = vsub.f32 1.0, %v1929_v23 }
0x1388   :  { %v1931_v46 = vmul.f32 %v3499_v60, %v1930_v41 }
0x138a   :  { %v1932_v25 = vadd.f32 %v3499_v60, %v1931_v46 }
0x138c   :  { %v1936_v27 = vsel %vm1935_vm8, %v3499_v60, %v1932_v25 }
0x138d   :  { %v1941_v13 = vsel %vm1938_vm9, %v1940_v15, %v1936_v27 }
0x13ec   :  { %v1958_v0 = vpop.permute.xlu0 %1957 }
0x13ed   :  { %v1960_v35 = vmul.f32 %v1958_v0, %v1941_v13 }
0x13ef   :  { %1961 = vst.msk [vmem:[#allocation3 + $0x48] sm:$0xff] %vm139_vm0, %v1960_v35  ;;  %3296 = vmatmul.msk.f32.vlgmr.msrb.gmra.mxu2 %vm139_vm0, %v1960_v35  ;;  %3297 = vmatmul.msk.f32.vlgmr.msrb.gmra.mxu3 %vm139_vm0, %v1960_v35 }
0x13f0   :  { %2391 = vmatpush.msrb.mxu2 %v4394_v4  ;;  %2411 = vmatpush.msrb.mxu3 %v4355_v39 }
0x13f2   :  { %2392 = vmatpush.msrb.mxu2 %v4401_v8  ;;  %2412 = vmatpush.msrb.mxu3 %v4362_v45  ;;  %v820_v45 = vadd.f32 %v4569_v2, %v4184_v43 }
0x13f4   :  { %2393 = vmatpush.msrb.mxu2 %v4408_v10  ;;  %2413 = vmatpush.msrb.mxu3 %v4414_v9 }
0x13f6   :  { %v2615_v37 = vld [vmem:[#allocation3 + $0x48] sm:$0xff]  ;;  %2394 = vmatpush.msrb.mxu2 %v4420_v12  ;;  %2414 = vmatpush.msrb.mxu3 %v4426_v14 }
0x13f7   :  { %v2629_v59 = vsel %vm2622_vm1, %v2612_v29, %v2615_v37  ;;  %v2632_v39 = vsel %vm2622_vm1, %v2615_v37, %v2612_v29 }
0x13f8   :  { %2395 = vmatpush.msrb.mxu2 %v4432_v11  ;;  %2415 = vmatpush.msrb.mxu3 %v4438_v16  ;;  %2645 = vst.msk [vmem:[#allocation4 + $0x40] sm:$0xff] %vm139_vm0, %v2629_v59  ;;  %v863_v11 = vadd.f32 %v4233_v3, %v820_v45 }
0x13f9   :  { %2648 = vst.msk [vmem:[#allocation4 + $0x58] sm:$0xff] %vm139_vm0, %v2632_v39 }
0x13fa   :  { %2396 = vmatpush.msrb.mxu2 %v4444_v24  ;;  %2416 = vmatpush.msrb.mxu3 %v4450_v44  ;;  %v755_v24 = vadd.f32 %v4586_v62, %v4236_v34 }
0x13fc   :  { %2397 = vmatpush.msrb.mxu2 %v4456_v52  ;;  %2417 = vmatpush.msrb.mxu3 %v4462_v56  ;;  %v862_v52 = vadd.f32 %v4250_v30, %v755_v24 }
0x13fe   :  { %2398 = vmatpush.msrb.mxu2 %v4468_v57  ;;  %2418 = vmatpush.msrb.mxu3 %v4474_v48 }
0x1472   :  { %v2004_v16 = vpop.f32.mrf.mxu3  ;;  %v1984_v44 = vpop.f32.mrf.mxu2 }
0x1473   :  { %v2008_v1 = vadd.f32 %v2004_v16, %v863_v11  ;;  %v2007_v56 = vadd.f32 %v1984_v44, %v862_v52  ;;  %v3620_v44 = vld [vmem:[%s5164_s2 + $0xf8] sm:$0xff]  ;;  %v3621_v52 = vld [vmem:[%s5164_s2 + $0xe8] sm:$0xff] }
0x1475   :  { %3500 = vtanh.f32 %v2008_v1  ;;  %v3298_v57 = vmul.f32 -1.442695, %v2007_v56  ;;  %v3299_v15 = vmul.f32 -1.442695, %v2008_v1  ;;  %v2611_v56 = vld [vmem:[#allocation3 + $0x28] sm:$0xff] }
0x1477   :  { %3502 = vpow2.f32 %v3298_v57 }
0x147b   :  { %v3501_v33 = vpop.eup %3500 }
0x147c   :  { %2050 = vrot.lane.b32.xlu1 %v3501_v33, %s3633_s19 }
0x147d   :  { %v3503_v48 = vpop.eup %3502 }
0x147e   :  { %v2015_v28 = vadd.f32 1.0, %v3503_v48  ;;  %v3622_v48 = vld [vmem:[%s5164_s2 + $0xb0] sm:$0xff] }
0x1480   :  { %3504 = vrcp.f32 %v2015_v28  ;;  %v2028_v49 = vand.u32 2147483648, %v2015_v28  ;;  %vm2022_vm11 = vweird.f32 %v2015_v28  ;;  %v2026_v60 = vand.u32 2147483647, %v2015_v28 }
0x1482   :  { %v2029_v62 = vor.u32 1.1754944e-38, %v2028_v49  ;;  %vm2027_vm13 = vcmp.eq.f32.partialorder %v2026_v60, 8.507059e+37 }
0x1486   :  { %v3505_v43 = vpop.eup %3504 }
0x1487   :  { %v2018_v2 = vmul.f32 %v3505_v43, %v2015_v28  ;;  %vm2023_vm10 = vweird.f32 %v3505_v43  ;;  %v3627_v28 = vld [vmem:[%s5164_s2 + $0x98] sm:$0xff] }
0x1488   :  { %vm2024_vm12 = vmor %vm2022_vm11, %vm2023_vm10 }
0x1489   :  { %v2019_v55 = vsub.f32 1.0, %v2018_v2  ;;  %v3629_v2 = vld [vmem:[%s5164_s2 + $0x88] sm:$0xff] }
0x148b   :  { %v2020_v32 = vmul.f32 %v3505_v43, %v2019_v55  ;;  %v823_v55 = vadd.f32 %v4571_v63, %v4192_v47 }
0x148d   :  { %v2021_v61 = vadd.f32 %v3505_v43, %v2020_v32  ;;  %v865_v32 = vadd.f32 %v4233_v3, %v823_v55  ;;  %v826_v55 = vadd.f32 %v4573_v6, %v4198_v51 }
0x148f   :  { %v2025_v34 = vsel %vm2024_vm12, %v3505_v43, %v2021_v61  ;;  %v3628_v43 = vld [vmem:[%s5164_s2 + $0x80] sm:$0xff] }
0x1490   :  { %v2030_v41 = vsel %vm2027_vm13, %v2029_v62, %v2025_v34  ;;  %v758_v34 = vadd.f32 %v4588_v5, %v4239_v18 }
0x1491   :  { %v2048_v25 = vmul.f32 %v2030_v41, %v4641_v7 }
0x14ee   :  { %v2051_v23 = vpop.permute.xlu1 %2050 }
0x14ef   :  { %v2053_v46 = vmul.f32 %v2051_v23, %v2030_v41  ;;  %v864_v23 = vadd.f32 %v4250_v30, %v758_v34  ;;  %v761_v34 = vadd.f32 %v4590_v22, %v4241_v19 }
0x14f1   :  { %2055 = vrot.lane.b32.xlu2 %v2053_v46, %s3633_s19 }
0x154b   :  { %v2056_v40 = vpop.permute.xlu2 %2055 }
0x154c   :  { %v4679_v26 = vadd.f32 %v2056_v40, %v2048_v25 }
0x154e   :  { %3506 = vtanh.f32 %v4679_v26 }
0x154f   :  { %3508 = vpow2.f32 %v3299_v15 }
0x1554   :  { %v3507_v27 = vpop.eup %3506 }
0x1555   :  { %2061 = vrot.lane.b32.xlu0 %v3507_v27, %s3633_s19  ;;  %v3509_v13 = vpop.eup %3508 }
0x1556   :  { %v2016_v0 = vadd.f32 1.0, %v3509_v13 }
0x1558   :  { %3510 = vrcp.f32 %v2016_v0  ;;  %v2043_v7 = vand.u32 2147483648, %v2016_v0  ;;  %vm2037_vm15 = vweird.f32 %v2016_v0  ;;  %v2041_v45 = vand.u32 2147483647, %v2016_v0 }
0x155a   :  { %v2044_v16 = vor.u32 1.1754944e-38, %v2043_v7  ;;  %vm2042_vm3 = vcmp.eq.f32.partialorder %v2041_v45, 8.507059e+37 }
0x155e   :  { %v3511_v35 = vpop.eup %3510 }
0x155f   :  { %v2033_v29 = vmul.f32 %v3511_v35, %v2016_v0  ;;  %vm2038_vm14 = vweird.f32 %v3511_v35 }
0x1560   :  { %vm2039_vm2 = vmor %vm2037_vm15, %vm2038_vm14 }
0x1561   :  { %v2034_v37 = vsub.f32 1.0, %v2033_v29 }
0x1563   :  { %v2035_v59 = vmul.f32 %v3511_v35, %v2034_v37 }
0x1565   :  { %v2036_v39 = vadd.f32 %v3511_v35, %v2035_v59 }
0x1567   :  { %v2040_v11 = vsel %vm2039_vm2, %v3511_v35, %v2036_v39 }
0x1568   :  { %v2045_v33 = vsel %vm2042_vm3, %v2044_v16, %v2040_v11 }
0x15c7   :  { %v2062_v24 = vpop.permute.xlu0 %2061 }
0x15c8   :  { %v2064_v1 = vmul.f32 %v2062_v24, %v2045_v33 }
0x15ca   :  { %2065 = vst.msk [vmem:[#allocation3 + $0x50] sm:$0xff] %vm139_vm0, %v2064_v1  ;;  %3300 = vmatmul.msk.f32.vlgmr.msra.gmra.mxu0 %vm139_vm0, %v2064_v1  ;;  %3301 = vmatmul.msk.f32.vlgmr.msrb.gmra.mxu1 %vm139_vm0, %v2064_v1 }
0x15cb   :  { %2495 = vmatpush.msra.mxu0 %v4394_v4  ;;  %2515 = vmatpush.msrb.mxu1 %v3620_v44 }
0x15cd   :  { %2496 = vmatpush.msra.mxu0 %v4401_v8  ;;  %2516 = vmatpush.msrb.mxu1 %v3621_v52 }
0x15cf   :  { %2497 = vmatpush.msra.mxu0 %v4408_v10  ;;  %2517 = vmatpush.msrb.mxu1 %v4414_v9  ;;  %v3623_v10 = vld [vmem:[%s5164_s2 + $0xb8] sm:$0xff]  ;;  %v3624_v9 = vld [vmem:[%s5164_s2 + $0xa0] sm:$0xff] }
0x15d1   :  { %v2616_v57 = vld [vmem:[#allocation3 + $0x50] sm:$0xff]  ;;  %2498 = vmatpush.msra.mxu0 %v4420_v12  ;;  %2518 = vmatpush.msrb.mxu1 %v4426_v14  ;;  %v3625_v12 = vld [vmem:[%s5164_s2 + $0xa8] sm:$0xff] }
0x15d2   :  { %v2628_v4 = vsel %vm2622_vm1, %v2611_v56, %v2616_v57  ;;  %v2633_v8 = vsel %vm2622_vm1, %v2616_v57, %v2611_v56  ;;  %v3626_v14 = vld [vmem:[%s5164_s2 + $0x90] sm:$0xff] }
0x15d3   :  { %2499 = vmatpush.msra.mxu0 %v3622_v48  ;;  %2519 = vmatpush.msrb.mxu1 %v3623_v10  ;;  %2644 = vst.msk [vmem:[#allocation4 + $0x38] sm:$0xff] %vm139_vm0, %v2628_v4 }
0x15d4   :  { %2649 = vst.msk [vmem:[#allocation4 + $0x60] sm:$0xff] %vm139_vm0, %v2633_v8 }
0x15d5   :  { %2500 = vmatpush.msra.mxu0 %v3624_v9  ;;  %2520 = vmatpush.msrb.mxu1 %v3625_v12 }
0x15d7   :  { %2501 = vmatpush.msra.mxu0 %v3626_v14  ;;  %2521 = vmatpush.msrb.mxu1 %v3627_v28  ;;  %v2610_v14 = vld [vmem:[#allocation3 + $0x20] sm:$0xff] }
0x15d9   :  { %2502 = vmatpush.msra.mxu0 %v3628_v43  ;;  %2522 = vmatpush.msrb.mxu1 %v3629_v2 }
0x1647   :  { %v2108_v61 = vpop.f32.mrf.mxu1  ;;  %v2088_v62 = vpop.f32.mrf.mxu0 }
0x1648   :  { %v2112_v49 = vadd.f32 %v2108_v61, %v865_v32  ;;  %v2111_v41 = vadd.f32 %v2088_v62, %v864_v23  ;;  %v867_v32 = vadd.f32 %v4233_v3, %v826_v55  ;;  %v866_v23 = vadd.f32 %v4250_v30, %v761_v34 }
0x164a   :  { %3512 = vtanh.f32 %v2112_v49  ;;  %v3302_v46 = vmul.f32 -1.442695, %v2111_v41  ;;  %v3303_v16 = vmul.f32 -1.442695, %v2112_v49 }
0x164c   :  { %3514 = vpow2.f32 %v3302_v46 }
0x1650   :  { %v3513_v60 = vpop.eup %3512 }
0x1651   :  { %2154 = vrot.lane.b32.xlu1 %v3513_v60, %s3633_s19 }
0x1652   :  { %v3515_v25 = vpop.eup %3514 }
0x1653   :  { %v2119_v40 = vadd.f32 1.0, %v3515_v25 }
0x1655   :  { %3516 = vrcp.f32 %v2119_v40  ;;  %v2132_v0 = vand.u32 2147483648, %v2119_v40  ;;  %vm2126_vm5 = vweird.f32 %v2119_v40  ;;  %v2130_v35 = vand.u32 2147483647, %v2119_v40 }
0x1657   :  { %v2133_v5 = vor.u32 1.1754944e-38, %v2132_v0  ;;  %vm2131_vm7 = vcmp.eq.f32.partialorder %v2130_v35, 8.507059e+37 }
0x165b   :  { %v3517_v47 = vpop.eup %3516 }
0x165c   :  { %v2122_v63 = vmul.f32 %v3517_v47, %v2119_v40  ;;  %vm2127_vm4 = vweird.f32 %v3517_v47 }
0x165d   :  { %vm2128_vm6 = vmor %vm2126_vm5, %vm2127_vm4 }
0x165e   :  { %v2123_v27 = vsub.f32 1.0, %v2122_v63 }
0x1660   :  { %v2124_v15 = vmul.f32 %v3517_v47, %v2123_v27 }
0x1662   :  { %v2125_v13 = vadd.f32 %v3517_v47, %v2124_v15 }
0x1664   :  { %v2129_v18 = vsel %vm2128_vm6, %v3517_v47, %v2125_v13 }
0x1665   :  { %v2134_v37 = vsel %vm2131_vm7, %v2133_v5, %v2129_v18 }
0x1666   :  { %v2152_v39 = vmul.f32 %v2134_v37, %v4679_v26 }
0x16c3   :  { %v2155_v29 = vpop.permute.xlu1 %2154 }
0x16c4   :  { %v2157_v59 = vmul.f32 %v2155_v29, %v2134_v37 }
0x16c6   :  { %2159 = vrot.lane.b32.xlu2 %v2157_v59, %s3633_s19 }
0x1720   :  { %v2160_v7 = vpop.permute.xlu2 %2159 }
0x1721   :  { %v4737_v45 = vadd.f32 %v2160_v7, %v2152_v39 }
0x1723   :  { %3518 = vtanh.f32 %v4737_v45 }
0x1724   :  { %3520 = vpow2.f32 %v3303_v16 }
0x1729   :  { %v3519_v11 = vpop.eup %3518 }
0x172a   :  { %2165 = vrot.lane.b32.xlu0 %v3519_v11, %s3633_s19  ;;  %v3521_v33 = vpop.eup %3520 }
0x172b   :  { %v2120_v24 = vadd.f32 1.0, %v3521_v33 }
0x172d   :  { %3522 = vrcp.f32 %v2120_v24  ;;  %v2147_v26 = vand.u32 2147483648, %v2120_v24  ;;  %vm2141_vm9 = vweird.f32 %v2120_v24  ;;  %v2145_v4 = vand.u32 2147483647, %v2120_v24 }
0x172f   :  { %v2148_v48 = vor.u32 1.1754944e-38, %v2147_v26  ;;  %vm2146_vm11 = vcmp.eq.f32.partialorder %v2145_v4, 8.507059e+37 }
0x1733   :  { %v3523_v1 = vpop.eup %3522 }
0x1734   :  { %v2137_v44 = vmul.f32 %v3523_v1, %v2120_v24  ;;  %vm2142_vm8 = vweird.f32 %v3523_v1 }
0x1735   :  { %vm2143_vm10 = vmor %vm2141_vm9, %vm2142_vm8 }
0x1736   :  { %v2138_v52 = vsub.f32 1.0, %v2137_v44 }
0x1738   :  { %v2139_v56 = vmul.f32 %v3523_v1, %v2138_v52 }
0x173a   :  { %v2140_v57 = vadd.f32 %v3523_v1, %v2139_v56 }
0x173c   :  { %v2144_v8 = vsel %vm2143_vm10, %v3523_v1, %v2140_v57 }
0x173d   :  { %v2149_v10 = vsel %vm2146_vm11, %v2148_v48, %v2144_v8  ;;  %v2609_v48 = vld [vmem:[#allocation3 + $0x18] sm:$0xff] }
0x179c   :  { %v2166_v9 = vpop.permute.xlu0 %2165 }
0x179d   :  { %v2168_v12 = vmul.f32 %v2166_v9, %v2149_v10 }
0x179f   :  { %2169 = vst.msk [vmem:[#allocation3 + $0x58] sm:$0xff] %vm139_vm0, %v2168_v12  ;;  %3304 = vmatmul.msk.f32.vlgmr.msra.gmra.mxu2 %vm139_vm0, %v2168_v12  ;;  %3305 = vmatmul.msk.f32.vlgmr.msra.gmra.mxu3 %vm139_vm0, %v2168_v12 }
0x17a6   :  { %v2617_v28 = vld [vmem:[#allocation3 + $0x58] sm:$0xff] }
0x17a7   :  { %v2627_v43 = vsel %vm2622_vm1, %v2610_v14, %v2617_v28  ;;  %v2634_v2 = vsel %vm2622_vm1, %v2617_v28, %v2610_v14  ;;  %v829_v14 = vadd.f32 %v4575_v17, %v4206_v53 }
0x17a8   :  { %2643 = vst.msk [vmem:[#allocation4 + $0x30] sm:$0xff] %vm139_vm0, %v2627_v43 }
0x17a9   :  { %2650 = vst.msk [vmem:[#allocation4 + $0x68] sm:$0xff] %vm139_vm0, %v2634_v2  ;;  %v869_v28 = vadd.f32 %v4233_v3, %v829_v14 }
0x1822   :  { %v2212_v61 = vpop.f32.mrf.mxu3  ;;  %v2192_v62 = vpop.f32.mrf.mxu2 }
0x1823   :  { %v2216_v49 = vadd.f32 %v2212_v61, %v867_v32  ;;  %v2215_v41 = vadd.f32 %v2192_v62, %v866_v23  ;;  %v764_v32 = vadd.f32 %v4592_v36, %v4243_v20 }
0x1825   :  { %3524 = vtanh.f32 %v2216_v49  ;;  %v3306_v46 = vmul.f32 -1.442695, %v2215_v41  ;;  %v3307_v39 = vmul.f32 -1.442695, %v2216_v49  ;;  %v868_v49 = vadd.f32 %v4250_v30, %v764_v32 }
0x1827   :  { %3526 = vpow2.f32 %v3306_v46 }
0x182b   :  { %v3525_v60 = vpop.eup %3524 }
0x182c   :  { %2258 = vrot.lane.b32.xlu1 %v3525_v60, %s3633_s19 }
0x182d   :  { %v3527_v25 = vpop.eup %3526 }
0x182e   :  { %v2223_v40 = vadd.f32 1.0, %v3527_v25 }
0x1830   :  { %3528 = vrcp.f32 %v2223_v40  ;;  %v2236_v15 = vand.u32 2147483648, %v2223_v40  ;;  %vm2230_vm13 = vweird.f32 %v2223_v40  ;;  %v2234_v13 = vand.u32 2147483647, %v2223_v40 }
0x1832   :  { %v2237_v22 = vor.u32 1.1754944e-38, %v2236_v15  ;;  %vm2235_vm15 = vcmp.eq.f32.partialorder %v2234_v13, 8.507059e+37 }
0x1836   :  { %v3529_v51 = vpop.eup %3528 }
0x1837   :  { %v2226_v6 = vmul.f32 %v3529_v51, %v2223_v40  ;;  %vm2231_vm12 = vweird.f32 %v3529_v51 }
0x1838   :  { %vm2232_vm14 = vmor %vm2230_vm13, %vm2231_vm12 }
0x1839   :  { %v2227_v47 = vsub.f32 1.0, %v2226_v6 }
0x183b   :  { %v2228_v63 = vmul.f32 %v3529_v51, %v2227_v47 }
0x183d   :  { %v2229_v27 = vadd.f32 %v3529_v51, %v2228_v63 }
0x183f   :  { %v2233_v19 = vsel %vm2232_vm14, %v3529_v51, %v2229_v27 }
0x1840   :  { %v2238_v35 = vsel %vm2235_vm15, %v2237_v22, %v2233_v19 }
0x1841   :  { %v2256_v5 = vmul.f32 %v2238_v35, %v4737_v45 }
0x189e   :  { %v2259_v0 = vpop.permute.xlu1 %2258 }
0x189f   :  { %v2261_v18 = vmul.f32 %v2259_v0, %v2238_v35 }
0x18a1   :  { %2263 = vrot.lane.b32.xlu2 %v2261_v18, %s3633_s19 }
0x18fb   :  { %v2264_v29 = vpop.permute.xlu2 %2263 }
0x18fc   :  { %v4759_v37 = vadd.f32 %v2264_v29, %v2256_v5 }
0x18fe   :  { %3530 = vtanh.f32 %v4759_v37 }
0x18ff   :  { %3532 = vpow2.f32 %v3307_v39 }
0x1904   :  { %v3531_v59 = vpop.eup %3530 }
0x1905   :  { %2269 = vrot.lane.b32.xlu0 %v3531_v59, %s3633_s19  ;;  %v3533_v7 = vpop.eup %3532 }
0x1906   :  { %v2224_v11 = vadd.f32 1.0, %v3533_v7 }
0x1908   :  { %3534 = vrcp.f32 %v2224_v11  ;;  %v2251_v45 = vand.u32 2147483648, %v2224_v11  ;;  %vm2245_vm3 = vweird.f32 %v2224_v11  ;;  %v2249_v52 = vand.u32 2147483647, %v2224_v11 }
0x190a   :  { %v2252_v57 = vor.u32 1.1754944e-38, %v2251_v45  ;;  %vm2250_vm5 = vcmp.eq.f32.partialorder %v2249_v52, 8.507059e+37 }
0x190e   :  { %v3535_v16 = vpop.eup %3534 }
0x190f   :  { %v2241_v33 = vmul.f32 %v3535_v16, %v2224_v11  ;;  %vm2246_vm2 = vweird.f32 %v3535_v16 }
0x1910   :  { %vm2247_vm4 = vmor %vm2245_vm3, %vm2246_vm2 }
0x1911   :  { %v2242_v24 = vsub.f32 1.0, %v2241_v33 }
0x1913   :  { %v2243_v1 = vmul.f32 %v3535_v16, %v2242_v24 }
0x1915   :  { %v2244_v44 = vadd.f32 %v3535_v16, %v2243_v1 }
0x1917   :  { %v2248_v56 = vsel %vm2247_vm4, %v3535_v16, %v2244_v44  ;;  %v2608_v44 = vld [vmem:[#allocation3 + $0x10] sm:$0xff] }
0x1918   :  { %v2253_v26 = vsel %vm2250_vm5, %v2252_v57, %v2248_v56  ;;  %v832_v57 = vadd.f32 %v4577_v42, %v4216_v58 }
0x1977   :  { %v2270_v4 = vpop.permute.xlu0 %2269 }
0x1978   :  { %v2272_v8 = vmul.f32 %v2270_v4, %v2253_v26  ;;  %v871_v26 = vadd.f32 %v4233_v3, %v832_v57  ;;  %v4856_v57 = vld [vmem:[#allocation4 + $0x40] sm:$0xff] }
0x197a   :  { %2273 = vst.msk [vmem:[#allocation3 + $0x60] sm:$0xff] %vm139_vm0, %v2272_v8  ;;  %3308 = vmatmul.msk.f32.vlgmr.msrb.gmra.mxu0 %vm139_vm0, %v2272_v8  ;;  %3309 = vmatmul.msk.f32.vlgmr.msra.gmra.mxu1 %vm139_vm0, %v2272_v8 }
0x1981   :  { %v2618_v10 = vld [vmem:[#allocation3 + $0x60] sm:$0xff] }
0x1982   :  { %v2626_v9 = vsel %vm2622_vm1, %v2609_v48, %v2618_v10  ;;  %v2635_v12 = vsel %vm2622_vm1, %v2618_v10, %v2609_v48  ;;  %v767_v10 = vadd.f32 %v4594_v50, %v4245_v21 }
0x1983   :  { %2642 = vst.msk [vmem:[#allocation4 + $0x28] sm:$0xff] %vm139_vm0, %v2626_v9 }
0x1984   :  { %2651 = vst.msk [vmem:[#allocation4 + $0x70] sm:$0xff] %vm139_vm0, %v2635_v12  ;;  %v870_v12 = vadd.f32 %v4250_v30, %v767_v10  ;;  %v4876_v10 = vld [vmem:[#allocation4 + $0x68] sm:$0xff] }
0x19f7   :  { %v2316_v43 = vpop.f32.mrf.mxu1  ;;  %v2296_v61 = vpop.f32.mrf.mxu0 }
0x19f8   :  { %v2320_v2 = vadd.f32 %v2316_v43, %v869_v28  ;;  %v2319_v60 = vadd.f32 %v2296_v61, %v868_v49 }
0x19fa   :  { %3536 = vtanh.f32 %v2320_v2  ;;  %v3310_v34 = vmul.f32 -1.442695, %v2319_v60  ;;  %v3311_v22 = vmul.f32 -1.442695, %v2320_v2 }
0x19fc   :  { %3538 = vpow2.f32 %v3310_v34 }
0x1a00   :  { %v3537_v55 = vpop.eup %3536 }
0x1a01   :  { %2362 = vrot.lane.b32.xlu1 %v3537_v55, %s3633_s19 }
0x1a02   :  { %v3539_v62 = vpop.eup %3538 }
0x1a03   :  { %v2327_v23 = vadd.f32 1.0, %v3539_v62 }
0x1a05   :  { %3540 = vrcp.f32 %v2327_v23  ;;  %v2340_v40 = vand.u32 2147483648, %v2327_v23  ;;  %vm2334_vm7 = vweird.f32 %v2327_v23  ;;  %v2338_v51 = vand.u32 2147483647, %v2327_v23 }
0x1a07   :  { %v2341_v36 = vor.u32 1.1754944e-38, %v2340_v40  ;;  %vm2339_vm9 = vcmp.eq.f32.partialorder %v2338_v51, 8.507059e+37 }
0x1a0b   :  { %v3541_v53 = vpop.eup %3540 }
0x1a0c   :  { %v2330_v17 = vmul.f32 %v3541_v53, %v2327_v23  ;;  %vm2335_vm6 = vweird.f32 %v3541_v53 }
0x1a0d   :  { %vm2336_vm8 = vmor %vm2334_vm7, %vm2335_vm6 }
0x1a0e   :  { %v2331_v41 = vsub.f32 1.0, %v2330_v17  ;;  %v2693_v17 = vld [vmem:[%s5165_s3 + $0x130] sm:$0xff] }
0x1a10   :  { %v2332_v46 = vmul.f32 %v3541_v53, %v2331_v41  ;;  %v2692_v41 = vld [vmem:[%s5165_s3 + $0x128] sm:$0xff] }
0x1a12   :  { %v2333_v25 = vadd.f32 %v3541_v53, %v2332_v46 }
0x1a14   :  { %v2337_v20 = vsel %vm2336_vm8, %v3541_v53, %v2333_v25  ;;  %v2694_v53 = vld [vmem:[%s5165_s3 + $0x138] sm:$0xff] }
0x1a15   :  { %v2342_v47 = vsel %vm2339_vm9, %v2341_v36, %v2337_v20  ;;  %2978 = vmatpush.msrb.mxu0 %v2694_v53  ;;  %v2666_v53 = vld [vmem:[%s5165_s3 + $0x58] sm:$0xff] }
0x1a16   :  { %v2360_v27 = vmul.f32 %v2342_v47, %v4759_v37 }
0x1a17   :  { %2979 = vmatpush.msrb.mxu0 %v2693_v17 }
0x1a19   :  { %2980 = vmatpush.msrb.mxu0 %v2692_v41  ;;  %v2664_v41 = vld [vmem:[%s5165_s3 + $0x48] sm:$0xff] }
0x1a73   :  { %v2363_v6 = vpop.permute.xlu1 %2362 }
0x1a74   :  { %v2365_v63 = vmul.f32 %v2363_v6, %v2342_v47  ;;  %v2691_v47 = vld [vmem:[%s5165_s3 + $0x120] sm:$0xff] }
0x1a75   :  { %2981 = vmatpush.msrb.mxu0 %v2691_v47  ;;  %v2659_v47 = vld [vmem:[%s5165_s3 + $0x20] sm:$0xff] }
0x1a76   :  { %2367 = vrot.lane.b32.xlu2 %v2365_v63, %s3633_s19  ;;  %v2690_v63 = vld [vmem:[%s5165_s3 + $0x118] sm:$0xff] }
0x1a77   :  { %2982 = vmatpush.msrb.mxu0 %v2690_v63  ;;  %v2658_v63 = vld [vmem:[%s5165_s3 + $0x18] sm:$0xff] }
0x1ad0   :  { %v2368_v15 = vpop.permute.xlu2 %2367 }
0x1ad1   :  { %v4781_v13 = vadd.f32 %v2368_v15, %v2360_v27  ;;  %v2689_v27 = vld [vmem:[%s5165_s3 + $0x110] sm:$0xff]  ;;  %v2688_v15 = vld [vmem:[%s5165_s3 + $0x108] sm:$0xff] }
0x1ad2   :  { %2983 = vmatpush.msrb.mxu0 %v2689_v27  ;;  %v2657_v27 = vld [vmem:[%s5165_s3 + $0x10] sm:$0xff] }
0x1ad3   :  { %3542 = vtanh.f32 %v4781_v13 }
0x1ad4   :  { %3544 = vpow2.f32 %v3311_v22  ;;  %2984 = vmatpush.msrb.mxu0 %v2688_v15  ;;  %v2656_v15 = vld [vmem:[%s5165_s3 + $0x8] sm:$0xff] }
0x1ad9   :  { %v3543_v19 = vpop.eup %3542 }
0x1ada   :  { %2373 = vrot.lane.b32.xlu0 %v3543_v19, %s3633_s19  ;;  %v3545_v0 = vpop.eup %3544  ;;  %v2687_v19 = vld [vmem:[%s5165_s3 + $0x100] sm:$0xff] }
0x1adb   :  { %v2328_v35 = vadd.f32 1.0, %v3545_v0  ;;  %2985 = vmatpush.msrb.mxu0 %v2687_v19 }
0x1add   :  { %3546 = vrcp.f32 %v2328_v35  ;;  %v2355_v37 = vand.u32 2147483648, %v2328_v35  ;;  %vm2349_vm11 = vweird.f32 %v2328_v35  ;;  %v2353_v7 = vand.u32 2147483647, %v2328_v35 }
0x1adf   :  { %v2356_v16 = vor.u32 1.1754944e-38, %v2355_v37  ;;  %vm2354_vm13 = vcmp.eq.f32.partialorder %v2353_v7, 8.507059e+37 }
0x1ae3   :  { %v3547_v18 = vpop.eup %3546 }
0x1ae4   :  { %v2345_v5 = vmul.f32 %v3547_v18, %v2328_v35  ;;  %vm2350_vm10 = vweird.f32 %v3547_v18 }
0x1ae5   :  { %vm2351_vm12 = vmor %vm2349_vm11, %vm2350_vm10 }
0x1ae6   :  { %v2346_v29 = vsub.f32 1.0, %v2345_v5 }
0x1ae8   :  { %v2347_v59 = vmul.f32 %v3547_v18, %v2346_v29 }
0x1aea   :  { %v2348_v39 = vadd.f32 %v3547_v18, %v2347_v59 }
0x1aec   :  { %v2352_v11 = vsel %vm2351_vm12, %v3547_v18, %v2348_v39 }
0x1aed   :  { %v2357_v33 = vsel %vm2354_vm13, %v2356_v16, %v2352_v11  ;;  %v2607_v16 = vld [vmem:[#allocation3 + $0x8] sm:$0xff] }
0x1b4c   :  { %v2374_v24 = vpop.permute.xlu0 %2373 }
0x1b4d   :  { %v2376_v1 = vmul.f32 %v2374_v24, %v2357_v33 }
0x1b4f   :  { %2377 = vst.msk [vmem:[#allocation3 + $0x68] sm:$0xff] %vm139_vm0, %v2376_v1  ;;  %3312 = vmatmul.msk.f32.vlgmr.msrb.gmra.mxu2 %vm139_vm0, %v2376_v1  ;;  %3313 = vmatmul.msk.f32.vlgmr.msrb.gmra.mxu3 %vm139_vm0, %v2376_v1 }
0x1b56   :  { %v2619_v45 = vld [vmem:[#allocation3 + $0x68] sm:$0xff] }
0x1b57   :  { %v2625_v52 = vsel %vm2622_vm1, %v2608_v44, %v2619_v45  ;;  %v2636_v56 = vsel %vm2622_vm1, %v2619_v45, %v2608_v44  ;;  %v4844_v45 = vld [vmem:[#allocation4 + $0x28] sm:$0xff] }
0x1b58   :  { %2641 = vst.msk [vmem:[#allocation4 + $0x20] sm:$0xff] %vm139_vm0, %v2625_v52  ;;  %v4848_v52 = vld [vmem:[#allocation4 + $0x30] sm:$0xff] }
0x1b59   :  { %2652 = vst.msk [vmem:[#allocation4 + $0x78] sm:$0xff] %vm139_vm0, %v2636_v56  ;;  %v4852_v56 = vld [vmem:[#allocation4 + $0x38] sm:$0xff] }
0x1b5f   :  { %v4834_v24 = vld [vmem:[#allocation4 + $0x20] sm:$0xff] }
0x1bd2   :  { %v2420_v4 = vpop.f32.mrf.mxu3  ;;  %v2400_v9 = vpop.f32.mrf.mxu2 }
0x1bd3   :  { %v2424_v8 = vadd.f32 %v2420_v4, %v871_v26  ;;  %v2423_v14 = vadd.f32 %v2400_v9, %v870_v12  ;;  %v4860_v26 = vld [vmem:[#allocation4 + $0x48] sm:$0xff]  ;;  %v4864_v4 = vld [vmem:[#allocation4 + $0x50] sm:$0xff]  ;;  %v4884_v12 = vld [vmem:[#allocation4 + $0x78] sm:$0xff] }
0x1bd4   :  { %v4880_v9 = vld [vmem:[#allocation4 + $0x70] sm:$0xff] }
0x1bd5   :  { %3548 = vtanh.f32 %v2424_v8  ;;  %v3314_v28 = vmul.f32 -1.442695, %v2423_v14  ;;  %v3315_v20 = vmul.f32 -1.442695, %v2424_v8  ;;  %v4868_v8 = vld [vmem:[#allocation4 + $0x58] sm:$0xff] }
0x1bd7   :  { %3550 = vpow2.f32 %v3314_v28  ;;  %v5169_v28 = vld [vmem:[#allocation5_spill] sm:$0xff] }
0x1bdb   :  { %v3549_v48 = vpop.eup %3548 }
0x1bdc   :  { %2466 = vrot.lane.b32.xlu1 %v3549_v48, %s3633_s19  ;;  %v4872_v48 = vld [vmem:[#allocation4 + $0x60] sm:$0xff] }
0x1bdd   :  { %v3551_v43 = vpop.eup %3550 }
0x1bde   :  { %v2431_v2 = vadd.f32 1.0, %v3551_v43  ;;  %v835_v43 = vadd.f32 %v4579_v54, %v5169_v28  ;;  %v4970_v28 = vld [vmem:[#allocation4 + $0x90] sm:$0xff] }
0x1be0   :  { %3552 = vrcp.f32 %v2431_v2  ;;  %v2444_v49 = vand.u32 2147483648, %v2431_v2  ;;  %vm2438_vm15 = vweird.f32 %v2431_v2  ;;  %v2442_v60 = vand.u32 2147483647, %v2431_v2 }
0x1be2   :  { %v2445_v50 = vor.u32 1.1754944e-38, %v2444_v49  ;;  %vm2443_vm3 = vcmp.eq.f32.partialorder %v2442_v60, 8.507059e+37 }
0x1be6   :  { %v3553_v58 = vpop.eup %3552 }
0x1be7   :  { %v2434_v42 = vmul.f32 %v3553_v58, %v2431_v2  ;;  %vm2439_vm14 = vweird.f32 %v3553_v58  ;;  %v873_v2 = vadd.f32 %v4233_v3, %v835_v43  ;;  %v5170_v3 = vld [vmem:[#allocation6_spill] sm:$0xff] }
0x1be8   :  { %vm2440_vm2 = vmor %vm2438_vm15, %vm2439_vm14  ;;  %v770_v54 = vadd.f32 %v4596_v38, %v5170_v3  ;;  %v2667_v38 = vld [vmem:[%s5165_s3 + $0x60] sm:$0xff]  ;;  %v2685_v3 = vld [vmem:[%s5165_s3 + $0xf0] sm:$0xff] }
0x1be9   :  { %v2435_v55 = vsub.f32 1.0, %v2434_v42 }
0x1beb   :  { %v2436_v32 = vmul.f32 %v3553_v58, %v2435_v55 }
0x1bed   :  { %v2437_v61 = vadd.f32 %v3553_v58, %v2436_v32  ;;  %v4899_v32 = vld [vmem:[#allocation4 + $0x8] sm:$0xff] }
0x1bef   :  { %v2441_v21 = vsel %vm2440_vm2, %v3553_v58, %v2437_v61  ;;  %vm3123_vm2 = vcmask 39936  }
0x1bf0   :  { %v2446_v62 = vsel %vm2443_vm3, %v2445_v50, %v2441_v21  ;;  %v2670_v21 = vld [vmem:[%s5165_s3 + $0x78] sm:$0xff]  ;;  %v2669_v50 = vld [vmem:[%s5165_s3 + $0x70] sm:$0xff] }
0x1bf1   :  { %v2464_v46 = vmul.f32 %v2446_v62, %v4781_v13  ;;  %2840 = vmatpush.msra.mxu2 %v2670_v21  ;;  %v2681_v21 = vld [vmem:[%s5165_s3 + $0xd0] sm:$0xff] }
0x1bf3   :  { %2841 = vmatpush.msra.mxu2 %v2669_v50 }
0x1c4e   :  { %v2467_v34 = vpop.permute.xlu1 %2466 }
0x1c4f   :  { %v2469_v23 = vmul.f32 %v2467_v34, %v2446_v62  ;;  %v872_v34 = vadd.f32 %v4250_v30, %v770_v54  ;;  %v2668_v62 = vld [vmem:[%s5165_s3 + $0x68] sm:$0xff]  ;;  %v2665_v30 = vld [vmem:[%s5165_s3 + $0x50] sm:$0xff]  ;;  %v2683_v54 = vld [vmem:[%s5165_s3 + $0xe0] sm:$0xff] }
0x1c50   :  { %2842 = vmatpush.msra.mxu2 %v2668_v62 }
0x1c51   :  { %2471 = vrot.lane.b32.xlu2 %v2469_v23, %s3633_s19 }
0x1c52   :  { %2843 = vmatpush.msra.mxu2 %v2667_v38  ;;  %v2679_v38 = vld [vmem:[%s5165_s3 + $0xc0] sm:$0xff] }
0x1c54   :  { %2844 = vmatpush.msra.mxu2 %v2666_v53  ;;  %v2678_v53 = vld [vmem:[%s5165_s3 + $0xb8] sm:$0xff] }
0x1c56   :  { %2845 = vmatpush.msra.mxu2 %v2665_v30  ;;  %v2676_v30 = vld [vmem:[%s5165_s3 + $0xa8] sm:$0xff] }
0x1c58   :  { %2846 = vmatpush.msra.mxu2 %v2664_v41  ;;  %v2675_v41 = vld [vmem:[%s5165_s3 + $0xa0] sm:$0xff] }
0x1cab   :  { %v2472_v25 = vpop.permute.xlu2 %2471 }
0x1cac   :  { %v4812_v40 = vadd.f32 %v2472_v25, %v2464_v46  ;;  %v2663_v46 = vld [vmem:[%s5165_s3 + $0x40] sm:$0xff]  ;;  %v2662_v25 = vld [vmem:[%s5165_s3 + $0x38] sm:$0xff] }
0x1cad   :  { %2847 = vmatpush.msra.mxu2 %v2663_v46  ;;  %v2674_v46 = vld [vmem:[%s5165_s3 + $0x98] sm:$0xff] }
0x1cae   :  { %3554 = vtanh.f32 %v4812_v40 }
0x1caf   :  { %3556 = vpow2.f32 %v3315_v20  ;;  %2848 = vmatpush.msra.mxu2 %v2662_v25 }
0x1cb4   :  { %v3555_v51 = vpop.eup %3554 }
0x1cb5   :  { %2477 = vrot.lane.b32.xlu0 %v3555_v51, %s3633_s19  ;;  %v3557_v36 = vpop.eup %3556  ;;  %v2661_v51 = vld [vmem:[%s5165_s3 + $0x30] sm:$0xff] }
0x1cb6   :  { %v2432_v6 = vadd.f32 1.0, %v3557_v36  ;;  %2849 = vmatpush.msra.mxu2 %v2661_v51  ;;  %v2673_v51 = vld [vmem:[%s5165_s3 + $0x90] sm:$0xff] }
0x1cb8   :  { %3558 = vrcp.f32 %v2432_v6  ;;  %v2459_v5 = vand.u32 2147483648, %v2432_v6  ;;  %vm2453_vm5 = vweird.f32 %v2432_v6  ;;  %v2457_v29 = vand.u32 2147483647, %v2432_v6 }
0x1cba   :  { %v2460_v39 = vor.u32 1.1754944e-38, %v2459_v5  ;;  %vm2458_vm7 = vcmp.eq.f32.partialorder %v2457_v29, 8.507059e+37 }
0x1cbe   :  { %v3559_v13 = vpop.eup %3558 }
0x1cbf   :  { %v2449_v22 = vmul.f32 %v3559_v13, %v2432_v6  ;;  %vm2454_vm4 = vweird.f32 %v3559_v13  ;;  %v2660_v6 = vld [vmem:[%s5165_s3 + $0x28] sm:$0xff] }
0x1cc0   :  { %vm2455_vm6 = vmor %vm2453_vm5, %vm2454_vm4  ;;  %2850 = vmatpush.msra.mxu2 %v2660_v6  ;;  %v2671_v6 = vld [vmem:[%s5165_s3 + $0x80] sm:$0xff] }
0x1cc1   :  { %v2450_v0 = vsub.f32 1.0, %v2449_v22 }
0x1cc2   :  { %2851 = vmatpush.msra.mxu2 %v2659_v47 }
0x1cc3   :  { %v2451_v35 = vmul.f32 %v3559_v13, %v2450_v0 }
0x1cc4   :  { %2852 = vmatpush.msra.mxu2 %v2658_v63 }
0x1cc5   :  { %v2452_v18 = vadd.f32 %v3559_v13, %v2451_v35 }
0x1cc6   :  { %2853 = vmatpush.msra.mxu2 %v2657_v27 }
0x1cc7   :  { %v2456_v59 = vsel %vm2455_vm6, %v3559_v13, %v2452_v18  ;;  %v2655_v13 = vld [vmem:[%s5165_s3] sm:$0xff] }
0x1cc8   :  { %v2461_v37 = vsel %vm2458_vm7, %v2460_v39, %v2456_v59  ;;  %2854 = vmatpush.msra.mxu2 %v2656_v15 }
0x1cca   :  { %2855 = vmatpush.msra.mxu2 %v2655_v13 }
0x1d27   :  { %v2478_v7 = vpop.permute.xlu0 %2477 }
0x1d28   :  { %v2480_v11 = vmul.f32 %v2478_v7, %v2461_v37 }
0x1d2a   :  { %2481 = vst.msk [vmem:[#allocation3 + $0x70] sm:$0xff] %vm139_vm0, %v2480_v11  ;;  %3316 = vmatmul.msk.f32.vlgmr.msra.gmra.mxu0 %vm139_vm0, %v2480_v11  ;;  %3317 = vmatmul.msk.f32.vlgmr.msrb.gmra.mxu1 %vm139_vm0, %v2480_v11 }
0x1d31   :  { %v2620_v33 = vld [vmem:[#allocation3 + $0x70] sm:$0xff] }
0x1d32   :  { %3320 = vmatmul.msk.f32.vlgmr.msrb.gmra.mxu0 %vm139_vm0, %v4834_v24  ;;  %v2637_v1 = vsel %vm2622_vm1, %v2620_v33, %v2607_v16  ;;  %v2624_v44 = vsel %vm2622_vm1, %v2607_v16, %v2620_v33  ;;  %v2696_v33 = vld [vmem:[#allocation4] sm:$0xff] }
0x1d33   :  { %2653 = vst.msk [vmem:[#allocation4 + $0x80] sm:$0xff] %vm139_vm0, %v2637_v1 }
0x1d34   :  { %2640 = vst.msk [vmem:[#allocation4 + $0x18] sm:$0xff] %vm139_vm0, %v2624_v44 }
0x1d3a   :  { %3321 = vmatmul.msk.f32.gmra.mxu0 %vm139_vm0, %v4844_v45  ;;  %v4888_v14 = vld [vmem:[#allocation4 + $0x80] sm:$0xff] }
0x1d3b   :  { %v4901_v61 = vld [vmem:[#allocation4 + $0x18] sm:$0xff] }
0x1d3c   :  { %v3366_v49 = vpack.i.bf16 %v4901_v61, %v4899_v32 }
0x1d42   :  { %3322 = vmatmul.msk.f32.gmra.mxu0 %vm139_vm0, %v4848_v52 }
0x1d4a   :  { %3323 = vmatmul.msk.f32.gmra.mxu0 %vm139_vm0, %v4852_v56 }
0x1d52   :  { %3324 = vmatmul.msk.f32.gmra.mxu0 %vm139_vm0, %v4856_v57 }
0x1d5a   :  { %3325 = vmatmul.msk.f32.gmra.mxu0 %vm139_vm0, %v4860_v26 }
0x1d62   :  { %3326 = vmatmul.msk.f32.gmra.mxu0 %vm139_vm0, %v4864_v4 }
0x1d6a   :  { %3327 = vmatmul.msk.f32.gmra.mxu0 %vm139_vm0, %v4868_v8 }
0x1d72   :  { %3328 = vmatmul.msk.f32.gmra.mxu0 %vm139_vm0, %v4872_v48 }
0x1d7a   :  { %3329 = vmatmul.msk.f32.gmra.mxu0 %vm139_vm0, %v4876_v10 }
0x1d82   :  { %3330 = vmatmul.msk.f32.gmra.mxu0 %vm139_vm0, %v4880_v9 }
0x1d8a   :  { %3331 = vmatmul.msk.f32.gmra.mxu0 %vm139_vm0, %v4884_v12 }
0x1d92   :  { %3332 = vmatmul.msk.f32.gmra.mxu0 %vm139_vm0, %v4888_v14 }
0x1da7   :  { %v2524_v58 = vpop.f32.mrf.mxu1  ;;  %v2504_v60 = vpop.f32.mrf.mxu0 }
0x1da8   :  { %v4895_v42 = vadd.f32 %v2524_v58, %v873_v2  ;;  %v2527_v23 = vadd.f32 %v2504_v60, %v872_v34  ;;  %v2682_v60 = vld [vmem:[%s5165_s3 + $0xd8] sm:$0xff] }
0x1daa   :  { %3560 = vtanh.f32 %v4895_v42  ;;  %v3318_v17 = vmul.f32 -1.442695, %v2527_v23  ;;  %v3319_v50 = vmul.f32 -1.442695, %v4895_v42  ;;  %v2680_v23 = vld [vmem:[%s5165_s3 + $0xc8] sm:$0xff]  ;;  %v2677_v42 = vld [vmem:[%s5165_s3 + $0xb0] sm:$0xff] }
0x1dac   :  { %3562 = vpow2.f32 %v3318_v17 }
0x1db0   :  { %v3561_v55 = vpop.eup %3560 }
0x1db1   :  { %2570 = vrot.lane.b32.xlu1 %v3561_v55, %s3633_s19 }
0x1db2   :  { %v3563_v20 = vpop.eup %3562 }
0x1db3   :  { %v2535_v36 = vadd.f32 1.0, %v3563_v20  ;;  %v2672_v20 = vld [vmem:[%s5165_s3 + $0x88] sm:$0xff] }
0x1db5   :  { %3564 = vrcp.f32 %v2535_v36  ;;  %v2548_v5 = vand.u32 2147483648, %v2535_v36  ;;  %vm2542_vm9 = vweird.f32 %v2535_v36  ;;  %v2546_v29 = vand.u32 2147483647, %v2535_v36 }
0x1db7   :  { %v2549_v39 = vor.u32 1.1754944e-38, %v2548_v5  ;;  %vm2547_vm11 = vcmp.eq.f32.partialorder %v2546_v29, 8.507059e+37 }
0x1db9   :  { %3367 = vrot.lane.b32.xlu1 %v3366_v49, %s3633_s19  ;;  %v2686_v49 = vld [vmem:[%s5165_s3 + $0xf8] sm:$0xff] }
0x1dba   :  { %2905 = vmatpush.msra.mxu3 %v2686_v49 }
0x1dbb   :  { %v3565_v19 = vpop.eup %3564 }
0x1dbc   :  { %v2538_v22 = vmul.f32 %v3565_v19, %v2535_v36  ;;  %vm2543_vm8 = vweird.f32 %v3565_v19  ;;  %2906 = vmatpush.msra.mxu3 %v2685_v3 }
0x1dbd   :  { %vm2544_vm10 = vmor %vm2542_vm9, %vm2543_vm8 }
0x1dbe   :  { %v2539_v0 = vsub.f32 1.0, %v2538_v22 }
0x1dc0   :  { %v2540_v35 = vmul.f32 %v3565_v19, %v2539_v0 }
0x1dc1   :  { %2742 = vrot.lane.b32.xlu1 %v4848_v52, %s3633_s19 }
0x1dc2   :  { %v2541_v18 = vadd.f32 %v3565_v19, %v2540_v35 }
0x1dc4   :  { %v2545_v59 = vsel %vm2544_vm10, %v3565_v19, %v2541_v18  ;;  %v2606_v18 = vld [vmem:[#allocation3] sm:$0xff] }
0x1dc5   :  { %v2550_v7 = vsel %vm2547_vm11, %v2549_v39, %v2545_v59 }
0x1dc6   :  { %v2568_v43 = vmul.f32 %v2550_v7, %v4812_v40  ;;  %v2684_v40 = vld [vmem:[%s5165_s3 + $0xe8] sm:$0xff] }
0x1dc7   :  { %2907 = vmatpush.msra.mxu3 %v2684_v40 }
0x1dc9   :  { %2748 = vrot.lane.b32.xlu1 %v4860_v26, %s3633_s19  ;;  %2908 = vmatpush.msra.mxu3 %v2683_v54 }
0x1dcb   :  { %2909 = vmatpush.msra.mxu3 %v2682_v60 }
0x1dcd   :  { %2910 = vmatpush.msra.mxu3 %v2681_v21 }
0x1dcf   :  { %2911 = vmatpush.msra.mxu3 %v2680_v23 }
0x1dd1   :  { %2754 = vrot.lane.b32.xlu1 %v4872_v48, %s3633_s19  ;;  %2912 = vmatpush.msra.mxu3 %v2679_v38  ;;  %v5089_v38 = vpop.f32.mrf.mxu0 }
0x1dd3   :  { %2913 = vmatpush.msra.mxu3 %v2678_v53 }
0x1dd5   :  { %2914 = vmatpush.msra.mxu3 %v2677_v42 }
0x1dd7   :  { %2915 = vmatpush.msra.mxu3 %v2676_v30 }
0x1dd9   :  { %2760 = vrot.lane.b32.xlu1 %v4884_v12, %s3633_s19  ;;  %2916 = vmatpush.msra.mxu3 %v2675_v41  ;;  %v5093_v42 = vpop.f32.mrf.mxu0 }
0x1ddb   :  { %2917 = vmatpush.msra.mxu3 %v2674_v46 }
0x1ddd   :  { %2918 = vmatpush.msra.mxu3 %v2673_v51 }
0x1ddf   :  { %2919 = vmatpush.msra.mxu3 %v2672_v20 }
0x1de1   :  { %2784 = vrot.lane.b32.xlu1 %v4970_v28, %s3633_s19  ;;  %2920 = vmatpush.msra.mxu3 %v2671_v6  ;;  %v5097_v30 = vpop.f32.mrf.mxu0 }
0x1de9   :  { %v5099_v46 = vpop.f32.mrf.mxu0 }
0x1df1   :  { %v5107_v6 = vpop.f32.mrf.mxu0 }
0x1e23   :  { %v2571_v37 = vpop.permute.xlu1 %2570 }
0x1e24   :  { %v2573_v11 = vmul.f32 %v2571_v37, %v2550_v7 }
0x1e26   :  { %2575 = vrot.lane.b32.xlu2 %v2573_v11, %s3633_s19 }
0x1e2b   :  { %v4966_v16 = vpop.permute.xlu1 %3367 }
0x1e2c   :  { %v3369_v1 = vunpack.i.l.bf16 %v4966_v16  ;;  %v3370_v39 = vunpack.i.h.bf16 %v4966_v16 }
0x1e2e   :  { %v2788_v44 = vsel %vm139_vm0, %v2696_v33, %v3369_v1 }
0x1e2f   :  { %2856 = vmatmul.f32.vlgmr.msra.gmra.mxu2 %v2788_v44 }
0x1e80   :  { %v2576_v2 = vpop.permute.xlu2 %2575 }
0x1e81   :  { %v2578_v58 = vadd.f32 %v2576_v2, %v2568_v43 }
0x1e83   :  { %3566 = vtanh.f32 %v2578_v58  ;;  %v2743_v58 = vpop.permute.xlu1 %2742 }
0x1e84   :  { %3568 = vpow2.f32 %v3319_v50 }
0x1e89   :  { %v3567_v55 = vpop.eup %3566 }
0x1e8a   :  { %2581 = vrot.lane.b32.xlu0 %v3567_v55, %s3633_s19  ;;  %v3569_v34 = vpop.eup %3568  ;;  %v2793_v55 = vsel %vm139_vm0, %v4844_v45, %v2743_v58 }
0x1e8b   :  { %v2536_v62 = vadd.f32 1.0, %v3569_v34 }
0x1e8d   :  { %3570 = vrcp.f32 %v2536_v62  ;;  %v2563_v27 = vand.u32 2147483648, %v2536_v62  ;;  %vm2557_vm13 = vweird.f32 %v2536_v62  ;;  %v2561_v15 = vand.u32 2147483647, %v2536_v62 }
0x1e8f   :  { %v2564_v19 = vor.u32 1.1754944e-38, %v2563_v27  ;;  %vm2562_vm15 = vcmp.eq.f32.partialorder %v2561_v15, 8.507059e+37 }
0x1e92   :  { %2740 = vrot.lane.b32.xlu0 %v4844_v45, %s3633_s19 }
0x1e93   :  { %v3571_v17 = vpop.eup %3570 }
0x1e94   :  { %v2553_v25 = vmul.f32 %v3571_v17, %v2536_v62  ;;  %vm2558_vm12 = vweird.f32 %v3571_v17 }
0x1e95   :  { %vm2559_vm14 = vmor %vm2557_vm13, %vm2558_vm12 }
0x1e96   :  { %v2554_v36 = vsub.f32 1.0, %v2553_v25 }
0x1e98   :  { %v2555_v47 = vmul.f32 %v3571_v17, %v2554_v36 }
0x1e9a   :  { %2746 = vrot.lane.b32.xlu0 %v4856_v57, %s3633_s19  ;;  %v2556_v63 = vadd.f32 %v3571_v17, %v2555_v47 }
0x1e9c   :  { %v2560_v13 = vsel %vm2559_vm14, %v3571_v17, %v2556_v63 }
0x1e9d   :  { %v2565_v22 = vsel %vm2562_vm15, %v2564_v19, %v2560_v13 }
0x1ea2   :  { %2752 = vrot.lane.b32.xlu0 %v4868_v8, %s3633_s19 }
0x1eaa   :  { %2758 = vrot.lane.b32.xlu0 %v4880_v9, %s3633_s19 }
0x1efc   :  { %v2582_v0 = vpop.permute.xlu0 %2581 }
0x1efd   :  { %v2584_v35 = vmul.f32 %v2582_v0, %v2565_v22  ;;  %v3002_v22 = vpop.f32.mrf.mxu0 }
0x1eff   :  { %2585 = vst.msk [vmem:[#allocation3 + $0x78] sm:$0xff] %vm139_vm0, %v2584_v35 }
0x1f04   :  { %v2741_v43 = vpop.permute.xlu0 %2740 }
0x1f05   :  { %v2792_v2 = vsel %vm139_vm0, %v4834_v24, %v2741_v43 }
0x1f06   :  { %v2621_v5 = vld [vmem:[#allocation3 + $0x78] sm:$0xff] }
0x1f07   :  { %v2623_v29 = vsel %vm2622_vm1, %v2606_v18, %v2621_v5  ;;  %v2638_v59 = vsel %vm2622_vm1, %v2621_v5, %v2606_v18  ;;  %vm3099_vm1 = vcmask 64512  }
0x1f08   :  { %2639 = vst.msk [vmem:[#allocation4 + $0x10] sm:$0xff] %vm139_vm0, %v2623_v29 }
0x1f09   :  { %2654 = vst.msk [vmem:[#allocation4 + $0x88] sm:$0xff] %vm139_vm0, %v2638_v59  ;;  %v5114_v59 = vpop.f32.mrf.mxu0 }
0x1f0f   :  { %v2698_v37 = vld [vmem:[#allocation4 + $0x10] sm:$0xff] }
0x1f10   :  { %v5041_v7 = vld [vmem:[#allocation4 + $0x88] sm:$0xff]  ;;  %v2790_v11 = vsel %vm139_vm0, %v2698_v37, %v3370_v39  ;;  %v3371_v33 = vpack.i.bf16 %v4834_v24, %v2698_v37  ;;  %v2749_v24 = vpop.permute.xlu1 %2748 }
0x1f11   :  { %2782 = vrot.lane.b32.xlu0 %v5041_v7, %s3633_s19  ;;  %3333 = vmatmul.msk.f32.gmra.mxu0 %vm139_vm0, %v5041_v7  ;;  %v2796_v40 = vsel %vm139_vm0, %v4856_v57, %v2749_v24 }
0x1f12   :  { %2921 = vmatmul.f32.vlgmr.msra.gmra.mxu3 %v2790_v11  ;;  %3372 = vrot.lane.b32.xlu2 %v3371_v33, %s3633_s19 }
0x1f19   :  { %3334 = vmatmul.msk.f32.gmra.mxu0 %vm139_vm0, %v4970_v28 }
0x1f1a   :  { %2744 = vrot.lane.b32.xlu2 %v4852_v56, %s3633_s19 }
0x1f22   :  { %2750 = vrot.lane.b32.xlu2 %v4864_v4, %s3633_s19 }
0x1f2a   :  { %2756 = vrot.lane.b32.xlu2 %v4876_v10, %s3633_s19 }
0x1f32   :  { %2762 = vrot.lane.b32.xlu2 %v4888_v14, %s3633_s19 }
0x1f6c   :  { %v3373_v31 = vpop.permute.xlu2 %3372 }
0x1f6d   :  { %v3375_v16 = vunpack.i.h.bf16 %v3373_v31  ;;  %v3374_v1 = vunpack.i.l.bf16 %v3373_v31  ;;  %v3008_v31 = vpop.f32.mrf.mxu0 }
0x1f6f   :  { %v2789_v44 = vsel %vm139_vm0, %v4899_v32, %v3374_v1  ;;  %v2791_v28 = vsel %vm139_vm0, %v4901_v61, %v3375_v16  ;;  %v2747_v61 = vpop.permute.xlu0 %2746 }
0x1f70   :  { %2859 = vmatmul.f32.gmra.mxu2 %v2789_v44  ;;  %2924 = vmatmul.f32.gmra.mxu3 %v2791_v28  ;;  %v2795_v3 = vsel %vm139_vm0, %v4852_v56, %v2747_v61  ;;  %v2755_v56 = vpop.permute.xlu1 %2754 }
0x1f71   :  { %v2799_v21 = vsel %vm139_vm0, %v4868_v8, %v2755_v56 }
0x1f74   :  { %v2745_v49 = vpop.permute.xlu2 %2744 }
0x1f75   :  { %v2794_v32 = vsel %vm139_vm0, %v4848_v52, %v2745_v49  ;;  %v3011_v43 = vpop.f32.mrf.mxu0 }
0x1f77   :  { %v2753_v52 = vpop.permute.xlu0 %2752 }
0x1f78   :  { %2862 = vmatmul.f32.gmra.mxu2 %v2790_v11  ;;  %2927 = vmatmul.f32.gmra.mxu3 %v2792_v2  ;;  %v2798_v60 = vsel %vm139_vm0, %v4864_v4, %v2753_v52  ;;  %v2715_v4 = vld [vmem:[#allocation4 + $0x98] sm:$0xff]  ;;  %v2761_v62 = vpop.permute.xlu1 %2760 }
0x1f79   :  { %3335 = vmatmul.msk.f32.gmra.mxu0 %vm139_vm0, %v2715_v4  ;;  %v2802_v8 = vsel %vm139_vm0, %v4880_v9, %v2761_v62 }
0x1f7c   :  { %v2751_v45 = vpop.permute.xlu2 %2750 }
0x1f7d   :  { %v2797_v54 = vsel %vm139_vm0, %v4860_v26, %v2751_v45  ;;  %v3014_v24 = vpop.f32.mrf.mxu0 }
0x1f7f   :  { %v2759_v26 = vpop.permute.xlu0 %2758 }
0x1f80   :  { %2865 = vmatmul.f32.gmra.mxu2 %v2791_v28  ;;  %2930 = vmatmul.f32.gmra.mxu3 %v2793_v55  ;;  %v2801_v34 = vsel %vm139_vm0, %v4876_v10, %v2759_v26  ;;  %v2785_v17 = vpop.permute.xlu1 %2784 }
0x1f81   :  { %v2805_v9 = vsel %vm139_vm0, %v5041_v7, %v2785_v17 }
0x1f84   :  { %v2757_v57 = vpop.permute.xlu2 %2756 }
0x1f85   :  { %v2800_v50 = vsel %vm139_vm0, %v4872_v48, %v2757_v57 }
0x1f87   :  { %v2783_v10 = vpop.permute.xlu0 %2782 }
0x1f88   :  { %2868 = vmatmul.f32.gmra.mxu2 %v2792_v2  ;;  %2933 = vmatmul.f32.gmra.mxu3 %v2794_v32  ;;  %v2804_v53 = vsel %vm139_vm0, %v4888_v14, %v2783_v10  ;;  %v5104_v14 = vld [vmem:[%s5165_s3 + $0x140] ss:$0 sm:$0xff] }
0x1f8c   :  { %v2763_v23 = vpop.permute.xlu2 %2762 }
0x1f8d   :  { %v2803_v48 = vsel %vm139_vm0, %v4884_v12, %v2763_v23  ;;  %v2857_v12 = vpop.f32.mrf.mxu2  ;;  %vm3073_vm0 = vcmask 130048  }
0x1f90   :  { %2871 = vmatmul.f32.gmra.mxu2 %v2793_v55  ;;  %2936 = vmatmul.f32.gmra.mxu3 %v2795_v3 }
0x1f95   :  { %v2922_v41 = vpop.f32.mrf.mxu3 }
0x1f98   :  { %2874 = vmatmul.f32.gmra.mxu2 %v2794_v32  ;;  %2939 = vmatmul.f32.gmra.mxu3 %v2796_v40 }
0x1fa0   :  { %2877 = vmatmul.f32.gmra.mxu2 %v2795_v3  ;;  %2942 = vmatmul.f32.gmra.mxu3 %v2797_v54 }
0x1fa8   :  { %2880 = vmatmul.f32.gmra.mxu2 %v2796_v40  ;;  %2945 = vmatmul.f32.gmra.mxu3 %v2798_v60 }
0x1fb0   :  { %2883 = vmatmul.f32.gmra.mxu2 %v2797_v54  ;;  %2948 = vmatmul.f32.gmra.mxu3 %v2799_v21  ;;  %v3017_v54 = vpop.f32.mrf.mxu0 }
0x1fb8   :  { %2886 = vmatmul.f32.gmra.mxu2 %v2798_v60  ;;  %2951 = vmatmul.f32.gmra.mxu3 %v2800_v50  ;;  %v5123_v56 = vpop.f32.mrf.mxu0 }
0x1fc0   :  { %2889 = vmatmul.f32.gmra.mxu2 %v2799_v21  ;;  %2954 = vmatmul.f32.gmra.mxu3 %v2801_v34 }
0x1fc8   :  { %2892 = vmatmul.f32.gmra.mxu2 %v2800_v50  ;;  %2957 = vmatmul.f32.gmra.mxu3 %v2802_v8  ;;  %v3023_v50 = vpop.f32.mrf.mxu0 }
0x1fd0   :  { %2895 = vmatmul.f32.gmra.mxu2 %v2801_v34  ;;  %2960 = vmatmul.f32.gmra.mxu3 %v2803_v48  ;;  %v3026_v23 = vpop.f32.mrf.mxu0 }
0x1fd8   :  { %2898 = vmatmul.f32.gmra.mxu2 %v2802_v8  ;;  %2963 = vmatmul.f32.gmra.mxu3 %v2804_v53  ;;  %v2858_v8 = vadd.f32 %v5104_v14, %v2857_v12 }
0x1fda   :  { %v2923_v10 = vadd.f32 %v2922_v41, %v2858_v8 }
0x1fdc   :  { %v2988_v12 = vadd.f32 %v5089_v38, %v2923_v10 }
0x1fe0   :  { %2901 = vmatmul.f32.gmra.mxu2 %v2803_v48  ;;  %2966 = vmatmul.f32.gmra.mxu3 %v2805_v9 }
0x1ff3   :  { %v2860_v25 = vpop.f32.mrf.mxu2  ;;  %v2925_v51 = vpop.f32.mrf.mxu3 }
0x1ff4   :  { %v2861_v20 = vadd.f32 %v5104_v14, %v2860_v25 }
0x1ff6   :  { %v2926_v36 = vadd.f32 %v2925_v51, %v2861_v20 }
0x1ff8   :  { %v2991_v53 = vadd.f32 %v5093_v42, %v2926_v36 }
0x1ffa   :  { %3572 = vtanh.f32 %v2991_v53 }
0x1ffb   :  { %v2863_v47 = vpop.f32.mrf.mxu2  ;;  %v2928_v63 = vpop.f32.mrf.mxu3 }
0x1ffc   :  { %v2864_v27 = vadd.f32 %v5104_v14, %v2863_v47 }
0x1ffe   :  { %v2929_v15 = vadd.f32 %v2928_v63, %v2864_v27 }
0x2000   :  { %v2994_v41 = vadd.f32 %v5097_v30, %v2929_v15 }
0x2003   :  { %v2866_v13 = vpop.f32.mrf.mxu2  ;;  %v2931_v19 = vpop.f32.mrf.mxu3 }
0x2004   :  { %v2867_v0 = vadd.f32 %v5104_v14, %v2866_v13 }
0x2006   :  { %v5111_v35 = vadd.f32 %v2931_v19, %v2867_v0  ;;  %v3067_v0 = vld [vmem:[%s5165_s3 + $0x150] sm:$0xff] }
0x2007   :  { %3091 = vmatpush.msra.mxu1 %v3067_v0 }
0x200b   :  { %v2869_v18 = vpop.f32.mrf.mxu2  ;;  %v2934_v5 = vpop.f32.mrf.mxu3 }
0x200c   :  { %v2870_v29 = vadd.f32 %v5104_v14, %v2869_v18 }
0x200e   :  { %v2935_v39 = vadd.f32 %v2934_v5, %v2870_v29  ;;  %v3029_v5 = vpop.f32.mrf.mxu0 }
0x2010   :  { %v3000_v18 = vadd.f32 %v5107_v6, %v2935_v39 }
0x2013   :  { %v2872_v37 = vpop.f32.mrf.mxu2  ;;  %v2937_v7 = vpop.f32.mrf.mxu3 }
0x2014   :  { %v2873_v11 = vadd.f32 %v5104_v14, %v2872_v37  ;;  %v3069_v37 = vld [vmem:[%s5165_s3 + $0x160] sm:$0xff] }
0x2016   :  { %v2938_v33 = vadd.f32 %v2937_v7, %v2873_v11  ;;  %v3573_v11 = vpop.eup %3572 }
0x2018   :  { %v3003_v63 = vadd.f32 %v3002_v22, %v2938_v33  ;;  %v3066_v22 = vld [vmem:[%s5165_s3 + $0x148] sm:$0xff] }
0x2019   :  { %3092 = vmatpush.msra.mxu1 %v3066_v22 }
0x201b   :  { %v2875_v16 = vpop.f32.mrf.mxu2  ;;  %v2940_v1 = vpop.f32.mrf.mxu3  ;;  %3118 = vmatpush.msrb.mxu1 %v3069_v37 }
0x201c   :  { %v2876_v44 = vadd.f32 %v5104_v14, %v2875_v16 }
0x201e   :  { %v5118_v28 = vadd.f32 %v2940_v1, %v2876_v44 }
0x2020   :  { %v3006_v33 = vadd.f32 %v5114_v59, %v5118_v28 }
0x2023   :  { %v2878_v2 = vpop.f32.mrf.mxu2  ;;  %v2943_v58 = vpop.f32.mrf.mxu3 }
0x2024   :  { %v2879_v55 = vadd.f32 %v5104_v14, %v2878_v2 }
0x2026   :  { %v2944_v49 = vadd.f32 %v2943_v58, %v2879_v55 }
0x2028   :  { %v5121_v32 = vadd.f32 %v3008_v31, %v2944_v49 }
0x202b   :  { %v2881_v61 = vpop.f32.mrf.mxu2  ;;  %v2946_v3 = vpop.f32.mrf.mxu3 }
0x202c   :  { %v2882_v17 = vadd.f32 %v5104_v14, %v2881_v61 }
0x202e   :  { %v2947_v19 = vadd.f32 %v2946_v3, %v2882_v17 }
0x2030   :  { %v3012_v30 = vadd.f32 %v3011_v43, %v2947_v19  ;;  %v3379_v19 = vld [vmem:[%s5165_s3 + $0x168] ss:$0 sm:$0xff] }
0x2033   :  { %v2884_v40 = vpop.f32.mrf.mxu2  ;;  %v2949_v45 = vpop.f32.mrf.mxu3 }
0x2034   :  { %v2885_v4 = vadd.f32 %v5104_v14, %v2884_v40 }
0x2036   :  { %v2950_v62 = vadd.f32 %v2949_v45, %v2885_v4 }
0x2038   :  { %v3015_v51 = vadd.f32 %v3014_v24, %v2950_v62  ;;  %v2997_v24 = vadd.f32 %v5099_v46, %v5111_v35 }
0x203a   :  { %3574 = vtanh.f32 %v3015_v51 }
0x203b   :  { %v2887_v52 = vpop.f32.mrf.mxu2  ;;  %v2952_v60 = vpop.f32.mrf.mxu3  ;;  %3576 = vtanh.f32 %v3003_v63 }
0x203c   :  { %v2888_v20 = vadd.f32 %v5104_v14, %v2887_v52 }
0x203e   :  { %v2953_v42 = vadd.f32 %v2952_v60, %v2888_v20 }
0x2040   :  { %v3018_v6 = vadd.f32 %v3017_v54, %v2953_v42  ;;  %v3575_v31 = vpop.eup %3574 }
0x2041   :  { %v3577_v1 = vpop.eup %3576  ;;  %v3052_v55 = vmax.f32 %v3573_v11, %v3575_v31 }
0x2043   :  { %v2890_v21 = vpop.f32.mrf.mxu2  ;;  %v2955_v57 = vpop.f32.mrf.mxu3 }
0x2044   :  { %v2891_v39 = vadd.f32 %v5104_v14, %v2890_v21  ;;  %v3032_v21 = vpop.f32.mrf.mxu0 }
0x2046   :  { %v2956_v43 = vadd.f32 %v2955_v57, %v2891_v39 }
0x2048   :  { %v3021_v45 = vadd.f32 %v5123_v56, %v2956_v43 }
0x204b   :  { %v2893_v26 = vpop.f32.mrf.mxu2  ;;  %v2958_v34 = vpop.f32.mrf.mxu3 }
0x204c   :  { %v2894_v48 = vadd.f32 %v5104_v14, %v2893_v26 }
0x204e   :  { %v2959_v27 = vadd.f32 %v2958_v34, %v2894_v48 }
0x2050   :  { %v3024_v38 = vadd.f32 %v3023_v50, %v2959_v27 }
0x2053   :  { %v2896_v9 = vpop.f32.mrf.mxu2  ;;  %v2961_v25 = vpop.f32.mrf.mxu3 }
0x2054   :  { %v2897_v47 = vadd.f32 %v5104_v14, %v2896_v9 }
0x2056   :  { %v2962_v13 = vadd.f32 %v2961_v25, %v2897_v47 }
0x2058   :  { %v3027_v36 = vadd.f32 %v3026_v23, %v2962_v13 }
0x205a   :  { %3578 = vtanh.f32 %v3027_v36 }
0x205b   :  { %3580 = vtanh.f32 %v2988_v12  ;;  %v2899_v15 = vpop.f32.mrf.mxu2  ;;  %v2964_v29 = vpop.f32.mrf.mxu3 }
0x205c   :  { %3582 = vtanh.f32 %v2994_v41  ;;  %v2900_v7 = vadd.f32 %v5104_v14, %v2899_v15 }
0x205d   :  { %3584 = vtanh.f32 %v3000_v18 }
0x205e   :  { %3586 = vtanh.f32 %v3024_v38  ;;  %v2965_v16 = vadd.f32 %v2964_v29, %v2900_v7 }
0x205f   :  { %3588 = vtanh.f32 %v3012_v30 }
0x2060   :  { %v3579_v44 = vpop.eup %3578  ;;  %3590 = vtanh.f32 %v3018_v6  ;;  %v3030_v2 = vadd.f32 %v3029_v5, %v2965_v16 }
0x2061   :  { %v3581_v58 = vpop.eup %3580  ;;  %3592 = vtanh.f32 %v3006_v33  ;;  %v3056_v49 = vmax.f32 %v3577_v1, %v3579_v44 }
0x2062   :  { %v3583_v61 = vpop.eup %3582  ;;  %3594 = vtanh.f32 %v3030_v2 }
0x2063   :  { %v3585_v3 = vpop.eup %3584  ;;  %v3060_v59 = vmax.f32 %v3052_v55, %v3056_v49  ;;  %v2902_v28 = vpop.f32.mrf.mxu2  ;;  %3596 = vtanh.f32 %v2997_v24 }
0x2064   :  { %v3587_v40 = vpop.eup %3586  ;;  %v2903_v54 = vadd.f32 %v5104_v14, %v2902_v28  ;;  %v2967_v60 = vpop.f32.mrf.mxu3  ;;  %3598 = vtanh.f32 %v3021_v45 }
0x2065   :  { %v3589_v52 = vpop.eup %3588  ;;  %v3055_v34 = vmax.f32 %v3585_v3, %v3587_v40  ;;  %3600 = vtanh.f32 %v5121_v32  ;;  %v3378_v32 = vld [vmem:[%s5165_s3 + $0x158] ss:$0 sm:$0xff] }
0x2066   :  { %v3591_v57 = vpop.eup %3590  ;;  %v2968_v50 = vadd.f32 %v2967_v60, %v2903_v54  ;;  %v3051_v46 = vmax.f32 %v3581_v58, %v3589_v52 }
0x2067   :  { %v3593_v26 = vpop.eup %3592  ;;  %v3053_v35 = vmax.f32 %v3583_v61, %v3591_v57 }
0x2068   :  { %v3595_v4 = vpop.eup %3594  ;;  %v3033_v62 = vadd.f32 %v3032_v21, %v2968_v50  ;;  %v3059_v56 = vmax.f32 %v3051_v46, %v3055_v34 }
0x2069   :  { %v3057_v8 = vmax.f32 %v3593_v26, %v3595_v4  ;;  %v3597_v14 = vpop.eup %3596 }
0x206a   :  { %3602 = vtanh.f32 %v3033_v62  ;;  %v3599_v10 = vpop.eup %3598 }
0x206b   :  { %v3061_v23 = vmax.f32 %v3053_v35, %v3057_v8  ;;  %v3601_v53 = vpop.eup %3600  ;;  %v3054_v9 = vmax.f32 %v3597_v14, %v3599_v10 }
0x206d   :  { %v3063_v48 = vmax.f32 %v3059_v56, %v3061_v23 }
0x2070   :  { %v3603_v17 = vpop.eup %3602 }
0x2071   :  { %v3058_v25 = vmax.f32 %v3601_v53, %v3603_v17 }
0x2073   :  { %v3062_v51 = vmax.f32 %v3054_v9, %v3058_v25 }
0x2075   :  { %v3064_v20 = vmax.f32 %v3060_v59, %v3062_v51 }
0x2077   :  { %v3065_v47 = vmax.f32 %v3063_v48, %v3064_v20 }
0x2079   :  { %v3071_v63 = vmax.f32 %v3065_v47, 0.0 }
0x207b   :  { %3336 = vmatmul.msk.f32.vlgmr.msra.gmra.mxu1 %vm3073_vm0, %v3071_v63 }
0x20f8   :  { %v3094_v27 = vpop.f32.mrf.mxu1 }
0x20f9   :  { %v3095_v13 = vadd.f32 %v3378_v32, %v3094_v27 }
0x20fb   :  { %v3097_v12 = vmax.f32 %v3095_v13, 0.0 }
0x20fd   :  { %3337 = vmatmul.msk.f32.vlgmr.msrb.gmra.mxu1 %vm3099_vm1, %v3097_v12 }
0x217a   :  { %v3120_v41 = vpop.f32.mrf.mxu1 }
0x217b   :  { %v3121_v42 = vadd.f32 %v3379_v19, %v3120_v41 }
0x217d   :  { %3124 = vst.msk [vmem:[%s5166_s4] sm:$0xff] %vm3123_vm2, %v3121_v42 }

</bundles_post_ra>
